<compile_context>
chip_gen: v7x
topology: tpu7x:2x2x1
jax: 0.10.0
libtpu: 0.0.40
codegen_flags: <defaults>
</compile_context>

<pallas_src>
import jax
import jax.numpy as jnp
from jax.experimental import pallas as pl
from jax.experimental.pallas import tpu as pltpu

LANE = 128  # fused head width: [classifier hidden 64 | domain hidden 64]


def _make_kernel(T, Bp, H):
    """Fused LSTM_DAT forward for static (T, padded batch Bp, hidden H)."""
    bf16 = jnp.bfloat16
    f32 = jnp.float32

    def kernel(xt_ref, wih_ref, b_in_ref, w_rec_hbm, w_h1_ref, b_h1_ref,
               w_out_ref, b_out_ref, out_ref,
               gxf_ref, gxb_ref, w_rec_vmem, rec_sem):
        # ---- start recurrent-weight DMA; hide it behind the projection -----
        rec_cp = pltpu.make_async_copy(w_rec_hbm, w_rec_vmem, rec_sem)
        rec_cp.start()

        # ---- input projection for all timesteps, both directions -----------
        # One MXU pass per direction, outside the recurrent dependency chain.
        # Materialised in VMEM scratch so only one (Bp,4H) block is live per
        # recurrence step (keeps the vreg file for the gate chain).
        xt = xt_ref[...]                                      # (T*Bp, D) bf16
        gxf_ref[...] = (jnp.dot(xt, wih_ref[0],
                                preferred_element_type=f32) + b_in_ref[0])
        gxb_ref[...] = (jnp.dot(xt, wih_ref[1],
                                preferred_element_type=f32) + b_in_ref[1])

        rec_cp.wait()
        w_rec_f = w_rec_vmem[0]                               # (H, 4H) bf16
        w_rec_b = w_rec_vmem[1]

        # ---- recurrence (serial critical path): bf16 MXU feeds, f32 gates --
        h_f = jnp.zeros((Bp, H), f32)
        c_f = jnp.zeros((Bp, H), f32)
        h_b = jnp.zeros((Bp, H), f32)
        c_b = jnp.zeros((Bp, H), f32)

        def cell(g, c):
            i = jax.nn.sigmoid(g[:, 0 * H:1 * H])
            f = jax.nn.sigmoid(g[:, 1 * H:2 * H])
            gg = jnp.tanh(g[:, 2 * H:3 * H])
            o = jax.nn.sigmoid(g[:, 3 * H:4 * H])
            c = f * c + i * gg
            return o * jnp.tanh(c), c

        for t in range(T):                      # static -> fully unrolled
            g_f = gxf_ref[pl.ds(t * Bp, Bp), :] + jnp.dot(
                h_f.astype(bf16), w_rec_f, preferred_element_type=f32)
            g_b = gxb_ref[pl.ds((T - 1 - t) * Bp, Bp), :] + jnp.dot(
                h_b.astype(bf16), w_rec_b, preferred_element_type=f32)
            h_f, c_f = cell(g_f, c_f)
            h_b, c_b = cell(g_b, c_b)

        # h_f == h_n[-2], h_b == h_n[-1] of the torch bi-LSTM.
        # ---- heads: fused hidden layer + fused lane-dense output layer -----
        z = jnp.maximum(
            jnp.dot(h_f.astype(bf16), w_h1_ref[0], preferred_element_type=f32)
            + jnp.dot(h_b.astype(bf16), w_h1_ref[1], preferred_element_type=f32)
            + b_h1_ref[...], 0.0)                             # (Bp, 128)
        out_ref[...] = (jnp.dot(z.astype(bf16), w_out_ref[...],
                                preferred_element_type=f32)
                        + b_out_ref[...]).astype(out_ref.dtype)

    return kernel


def prepare_params(p):
    """One-time weight re-layout / bf16 cast (hoisted out of the call path)."""
    f32, bf16 = jnp.float32, jnp.bfloat16
    H = p["whh_f"].shape[0]
    C = p["wc2"].shape[1]
    Dm = p["wd2"].shape[1]
    n_h = p["wc1"].shape[1]                                   # 64
    assert n_h + p["wd1"].shape[1] == LANE and C + Dm <= LANE

    wih = jnp.stack([p["wih_f"], p["wih_b"]]).astype(bf16)        # (2, D, 4H)
    b_in = jnp.stack([p["b_f"], p["b_b"]]).astype(f32)            # (2, 1, 4H)
    w_rec = jnp.stack([p["whh_f"], p["whh_b"]]).astype(bf16)      # (2, H, 4H)

    w_h1_full = jnp.concatenate([p["wc1"], p["wd1"]], axis=1)     # (2H, 128)
    w_h1 = jnp.stack([w_h1_full[:H], w_h1_full[H:]]).astype(bf16)  # (2, H, 128)
    b_h1 = jnp.concatenate([p["bc1"], p["bd1"]], axis=1).astype(f32)  # (1, 128)

    w_out = jnp.zeros((LANE, LANE), f32)
    w_out = w_out.at[:n_h, :C].set(p["wc2"])
    w_out = w_out.at[n_h:, C:C + Dm].set(p["wd2"])
    b_out = jnp.zeros((1, LANE), f32)
    b_out = b_out.at[:, :C].set(p["bc2"])
    b_out = b_out.at[:, C:C + Dm].set(p["bd2"])

    return {"wih": wih, "b_in": b_in, "w_rec": w_rec,
            "w_h1": w_h1, "b_h1": b_h1,
            "w_out": w_out.astype(bf16), "b_out": b_out,
            "H": H, "C": C, "Dm": Dm}


def lstm_dat_forward(x, prep):
    """x: (B, T, D) f32. prep: output of prepare_params (built once)."""
    B, T, D = x.shape
    H, C, Dm = prep["H"], prep["C"], prep["Dm"]
    Bp = ((B + 7) // 8) * 8            # pad batch to the 8-sublane granularity
    f32 = jnp.float32

    xt = jnp.transpose(x, (1, 0, 2))                          # (T, B, D)
    xt = jnp.pad(xt, ((0, 0), (0, Bp - B), (0, 0)))           # (T, Bp, D)
    xt = xt.reshape(T * Bp, D).astype(jnp.bfloat16)

    operands = (xt, prep["wih"], prep["b_in"], prep["w_rec"],
                prep["w_h1"], prep["b_h1"], prep["w_out"], prep["b_out"])

    def const_spec(arr):
        nd = arr.ndim
        return pl.BlockSpec(arr.shape, lambda i, _nd=nd: (0,) * _nd)

    in_specs = [
        const_spec(xt), const_spec(prep["wih"]), const_spec(prep["b_in"]),
        pl.BlockSpec(memory_space=pl.ANY),        # w_rec: manual overlapped DMA
        const_spec(prep["w_h1"]), const_spec(prep["b_h1"]),
        const_spec(prep["w_out"]), const_spec(prep["b_out"]),
    ]

    grid_spec = pltpu.PrefetchScalarGridSpec(
        num_scalar_prefetch=0,
        grid=(1,),
        in_specs=in_specs,
        out_specs=pl.BlockSpec((Bp, LANE), lambda i: (0, 0)),
        scratch_shapes=[
            pltpu.VMEM((T * Bp, 4 * H), f32),          # gx forward
            pltpu.VMEM((T * Bp, 4 * H), f32),          # gx backward
            pltpu.VMEM((2, H, 4 * H), jnp.bfloat16),   # recurrent weights
            pltpu.SemaphoreType.DMA(()),
        ],
    )

    out = pl.pallas_call(
        _make_kernel(T, Bp, H),
        grid_spec=grid_spec,
        out_shape=jax.ShapeDtypeStruct((Bp, LANE), f32),
        compiler_params=pltpu.CompilerParams(
            dimension_semantics=("arbitrary",)),
    )(*operands)

    return out[:B, :C], out[:B, C:C + Dm]


def init_params(key, D, H, C=2, Dm=5):
    ks = jax.random.split(key, 16)

    def u(k, shape, bound):
        return jax.random.uniform(k, shape, jnp.float32, -bound, bound)

    k_lstm = 1.0 / float(jnp.sqrt(H))
    wih_f = u(ks[0], (4 * H, D), k_lstm)
    whh_f = u(ks[1], (4 * H, H), k_lstm)
    bih_f = u(ks[2], (4 * H,), k_lstm)
    bhh_f = u(ks[3], (4 * H,), k_lstm)
    wih_b = u(ks[4], (4 * H, D), k_lstm)
    whh_b = u(ks[5], (4 * H, H), k_lstm)
    bih_b = u(ks[6], (4 * H,), k_lstm)
    bhh_b = u(ks[7], (4 * H,), k_lstm)

    k1 = 1.0 / float(jnp.sqrt(2 * H))
    wc1 = u(ks[8], (64, 2 * H), k1)
    bc1 = u(ks[9], (64,), k1)
    wd1 = u(ks[12], (64, 2 * H), k1)
    bd1 = u(ks[13], (64,), k1)

    k2 = 1.0 / float(jnp.sqrt(64))
    wc2 = u(ks[10], (C, 64), k2)
    bc2 = u(ks[11], (C,), k2)
    wd2 = u(ks[14], (Dm, 64), k2)
    bd2 = u(ks[15], (Dm,), k2)

    return {
        "wih_f": wih_f.T, "whh_f": whh_f.T, "b_f": (bih_f + bhh_f).reshape(1, 4 * H),
        "wih_b": wih_b.T, "whh_b": whh_b.T, "b_b": (bih_b + bhh_b).reshape(1, 4 * H),
        "wc1": wc1.T, "bc1": bc1.reshape(1, 64),
        "wc2": wc2.T, "bc2": bc2.reshape(1, C),
        "wd1": wd1.T, "bd1": bd1.reshape(1, 64),
        "wd2": wd2.T, "bd2": bd2.reshape(1, Dm),
    }


def lstm_dat_ref(x, p):
    """Pure-JAX f32 reference matching torch.nn.LSTM (1 layer, bi) + heads."""
    B, T, D = x.shape
    H = p["whh_f"].shape[0]

    def run_dir(wih, whh, b, reverse):
        h = jnp.zeros((B, H), jnp.float32)
        c = jnp.zeros((B, H), jnp.float32)
        order = range(T - 1, -1, -1) if reverse else range(T)
        for t in order:
            gates = x[:, t, :] @ wih + h @ whh + b
            i = jax.nn.sigmoid(gates[:, 0:H])
            f = jax.nn.sigmoid(gates[:, H:2 * H])
            g = jnp.tanh(gates[:, 2 * H:3 * H])
            o = jax.nn.sigmoid(gates[:, 3 * H:4 * H])
            c = f * c + i * g
            h = o * jnp.tanh(c)
        return h

    hf = run_dir(p["wih_f"], p["whh_f"], p["b_f"], reverse=False)  # h_n[-2]
    hb = run_dir(p["wih_b"], p["whh_b"], p["b_b"], reverse=True)   # h_n[-1]
    h_final = jnp.concatenate([hf, hb], axis=1)

    hc = jnp.maximum(h_final @ p["wc1"] + p["bc1"], 0.0)
    cls = hc @ p["wc2"] + p["bc2"]
    hd = jnp.maximum(h_final @ p["wd1"] + p["bd1"], 0.0)   # GRL = identity fwd
    dom = hd @ p["wd2"] + p["bd2"]
    return cls, dom


if __name__ == "__main__":
    B, T, D, H = 4, 8, 64, 128   # small shapes consistent with the module
    C, Dm = 2, 5

    key = jax.random.PRNGKey(0)
    kx, kp = jax.random.split(key)
    x = jax.random.normal(kx, (B, T, D), jnp.float32)
    params = init_params(kp, D, H, C, Dm)

    prep = prepare_params(params)        # one-time re-layout, not per call
    cls, dom = lstm_dat_forward(x, prep)
    cls, dom = jax.block_until_ready((cls, dom))

    cls_ref, dom_ref = lstm_dat_ref(x, params)
    assert cls.shape == (B, C) and dom.shape == (B, Dm)
    # bf16 MXU operands with f32 accumulation -> slightly looser tolerance.
    assert jnp.allclose(cls, cls_ref, atol=5e-2, rtol=5e-2)
    assert jnp.allclose(dom, dom_ref, atol=5e-2, rtol=5e-2)

    print("KERNEL_OK")
</pallas_src>

<mosaic_0001>
module attributes {stable_mosaic.version = 11 : i64} {
  func.func @kernel(%arg0: i32, %arg1: memref<64x64xbf16, #tpu.memory_space<vmem>>, %arg2: memref<2x64x512xbf16, #tpu.memory_space<vmem>>, %arg3: memref<2x1x512xf32, #tpu.memory_space<vmem>>, %arg4: memref<2x128x512xbf16, #tpu.memory_space<any>>, %arg5: memref<2x128x128xbf16, #tpu.memory_space<vmem>>, %arg6: memref<1x128xf32, #tpu.memory_space<vmem>>, %arg7: memref<128x128xbf16, #tpu.memory_space<vmem>>, %arg8: memref<1x128xf32, #tpu.memory_space<vmem>>, %arg9: memref<8x128xf32, #tpu.memory_space<vmem>>, %arg10: memref<64x512xf32, #tpu.memory_space<vmem>>, %arg11: memref<64x512xf32, #tpu.memory_space<vmem>>, %arg12: memref<2x128x512xbf16, #tpu.memory_space<vmem>>, %arg13: memref<!tpu.dma_semaphore, #tpu.memory_space<semaphore_mem>>) attributes {dimension_semantics = [#tpu.dimension_semantics<arbitrary>], iteration_bounds = array<i64: 1>, scalar_prefetch = 0 : i64, scratch_operands = 4 : i64, tpu.core_type = #tpu.core_type<tc>, window_params = [{pipeline_mode = #tpu.pipeline_mode<synchronous>, transform_indices = @transform_0, window_bounds = array<i64: 64, 64>}, {pipeline_mode = #tpu.pipeline_mode<synchronous>, transform_indices = @transform_1, window_bounds = array<i64: 2, 64, 512>}, {pipeline_mode = #tpu.pipeline_mode<synchronous>, transform_indices = @transform_2, window_bounds = array<i64: 2, 1, 512>}, {}, {pipeline_mode = #tpu.pipeline_mode<synchronous>, transform_indices = @transform_4, window_bounds = array<i64: 2, 128, 128>}, {pipeline_mode = #tpu.pipeline_mode<synchronous>, transform_indices = @transform_5, window_bounds = array<i64: 1, 128>}, {pipeline_mode = #tpu.pipeline_mode<synchronous>, transform_indices = @transform_6, window_bounds = array<i64: 128, 128>}, {pipeline_mode = #tpu.pipeline_mode<synchronous>, transform_indices = @transform_7, window_bounds = array<i64: 1, 128>}, {pipeline_mode = #tpu.pipeline_mode<synchronous>, transform_indices = @transform_8, window_bounds = array<i64: 8, 128>}]} {
    tpu.enqueue_dma source(%arg4 : memref<2x128x512xbf16, #tpu.memory_space<any>>) target(%arg12 : memref<2x128x512xbf16, #tpu.memory_space<vmem>>) target_semaphore(%arg13 : memref<!tpu.dma_semaphore, #tpu.memory_space<semaphore_mem>>)
    %c0 = arith.constant 0 : index
    %c0_0 = arith.constant 0 : index
    %0 = vector.load %arg1[%c0, %c0_0] : memref<64x64xbf16, #tpu.memory_space<vmem>>, vector<64x64xbf16>
    %c0_1 = arith.constant 0 : index
    %c0_2 = arith.constant 0 : index
    %c0_3 = arith.constant 0 : index
    %1 = vector.load %arg2[%c0_1, %c0_2, %c0_3] : memref<2x64x512xbf16, #tpu.memory_space<vmem>>, vector<1x64x512xbf16>
    %2 = vector.shape_cast %1 : vector<1x64x512xbf16> to vector<64x512xbf16>
    %cst = arith.constant dense<0.000000e+00> : vector<64x512xf32>
    %3 = tpu.matmul %0, %2, %cst {dimension_numbers = #tpu.dot_dimension_numbers<[1], [0], [0], [1], [0, 0, 1, 1], [], []>} : vector<64x64xbf16>, vector<64x512xbf16>, vector<64x512xf32> -> vector<64x512xf32>
    %c0_4 = arith.constant 0 : index
    %c0_5 = arith.constant 0 : index
    %c0_6 = arith.constant 0 : index
    %4 = vector.load %arg3[%c0_4, %c0_5, %c0_6] : memref<2x1x512xf32, #tpu.memory_space<vmem>>, vector<1x1x512xf32>
    %5 = vector.shape_cast %4 : vector<1x1x512xf32> to vector<1x512xf32>
    %6 = vector.broadcast %5 : vector<1x512xf32> to vector<64x512xf32>
    %7 = arith.addf %3, %6 : vector<64x512xf32>
    %c0_7 = arith.constant 0 : index
    %c0_8 = arith.constant 0 : index
    %8 = vector.load %arg10[%c0_7, %c0_8] : memref<64x512xf32, #tpu.memory_space<vmem>>, vector<64x512xf32>
    tpu.vector_store %arg10[%c0_7, %c0_8], %7 {strides = array<i32>} : memref<64x512xf32, #tpu.memory_space<vmem>>, vector<64x512xf32>,
    %c1 = arith.constant 1 : index
    %c0_9 = arith.constant 0 : index
    %c0_10 = arith.constant 0 : index
    %9 = vector.load %arg2[%c1, %c0_9, %c0_10] : memref<2x64x512xbf16, #tpu.memory_space<vmem>>, vector<1x64x512xbf16>
    %10 = vector.shape_cast %9 : vector<1x64x512xbf16> to vector<64x512xbf16>
    %cst_11 = arith.constant dense<0.000000e+00> : vector<64x512xf32>
    %11 = tpu.matmul %0, %10, %cst_11 {dimension_numbers = #tpu.dot_dimension_numbers<[1], [0], [0], [1], [0, 0, 1, 1], [], []>} : vector<64x64xbf16>, vector<64x512xbf16>, vector<64x512xf32> -> vector<64x512xf32>
    %c1_12 = arith.constant 1 : index
    %c0_13 = arith.constant 0 : index
    %c0_14 = arith.constant 0 : index
    %12 = vector.load %arg3[%c1_12, %c0_13, %c0_14] : memref<2x1x512xf32, #tpu.memory_space<vmem>>, vector<1x1x512xf32>
    %13 = vector.shape_cast %12 : vector<1x1x512xf32> to vector<1x512xf32>
    %14 = vector.broadcast %13 : vector<1x512xf32> to vector<64x512xf32>
    %15 = arith.addf %11, %14 : vector<64x512xf32>
    %c0_15 = arith.constant 0 : index
    %c0_16 = arith.constant 0 : index
    %16 = vector.load %arg11[%c0_15, %c0_16] : memref<64x512xf32, #tpu.memory_space<vmem>>, vector<64x512xf32>
    tpu.vector_store %arg11[%c0_15, %c0_16], %15 {strides = array<i32>} : memref<64x512xf32, #tpu.memory_space<vmem>>, vector<64x512xf32>,
    tpu.wait_dma2 semaphore(%arg13 : memref<!tpu.dma_semaphore, #tpu.memory_space<semaphore_mem>>) src(%arg4 : memref<2x128x512xbf16, #tpu.memory_space<any>>) dst(%arg12 : memref<2x128x512xbf16, #tpu.memory_space<vmem>>)
    %c0_17 = arith.constant 0 : index
    %c0_18 = arith.constant 0 : index
    %c0_19 = arith.constant 0 : index
    %17 = vector.load %arg12[%c0_17, %c0_18, %c0_19] : memref<2x128x512xbf16, #tpu.memory_space<vmem>>, vector<1x128x512xbf16>
    %18 = vector.shape_cast %17 : vector<1x128x512xbf16> to vector<128x512xbf16>
    %c1_20 = arith.constant 1 : index
    %c0_21 = arith.constant 0 : index
    %c0_22 = arith.constant 0 : index
    %19 = vector.load %arg12[%c1_20, %c0_21, %c0_22] : memref<2x128x512xbf16, #tpu.memory_space<vmem>>, vector<1x128x512xbf16>
    %20 = vector.shape_cast %19 : vector<1x128x512xbf16> to vector<128x512xbf16>
    %cst_23 = arith.constant 0.000000e+00 : f32
    %21 = vector.broadcast %cst_23 : f32 to vector<8x128xf32>
    %cst_24 = arith.constant 0.000000e+00 : f32
    %22 = vector.broadcast %cst_24 : f32 to vector<8x128xf32>
    %cst_25 = arith.constant 0.000000e+00 : f32
    %23 = vector.broadcast %cst_25 : f32 to vector<8x128xf32>
    %cst_26 = arith.constant 0.000000e+00 : f32
    %24 = vector.broadcast %cst_26 : f32 to vector<8x128xf32>
    %c0_27 = arith.constant 0 : index
    %c0_28 = arith.constant 0 : index
    %25 = vector.load %arg10[%c0_27, %c0_28] : memref<64x512xf32, #tpu.memory_space<vmem>>, vector<8x512xf32>
    %26 = arith.truncf %21 : vector<8x128xf32> to vector<8x128xbf16>
    %cst_29 = arith.constant dense<0.000000e+00> : vector<8x512xf32>
    %27 = tpu.matmul %26, %18, %cst_29 {dimension_numbers = #tpu.dot_dimension_numbers<[1], [0], [0], [1], [0, 0, 1, 1], [], []>} : vector<8x128xbf16>, vector<128x512xbf16>, vector<8x512xf32> -> vector<8x512xf32>
    %28 = arith.addf %25, %27 : vector<8x512xf32>
    %c56 = arith.constant 56 : index
    %c0_30 = arith.constant 0 : index
    %29 = vector.load %arg11[%c56, %c0_30] : memref<64x512xf32, #tpu.memory_space<vmem>>, vector<8x512xf32>
    %30 = arith.truncf %23 : vector<8x128xf32> to vector<8x128xbf16>
    %cst_31 = arith.constant dense<0.000000e+00> : vector<8x512xf32>
    %31 = tpu.matmul %30, %20, %cst_31 {dimension_numbers = #tpu.dot_dimension_numbers<[1], [0], [0], [1], [0, 0, 1, 1], [], []>} : vector<8x128xbf16>, vector<128x512xbf16>, vector<8x512xf32> -> vector<8x512xf32>
    %32 = arith.addf %29, %31 : vector<8x512xf32>
    %33 = vector.extract_strided_slice %28 {offsets = [0, 0], sizes = [8, 128], strides = [1, 1]} : vector<8x512xf32> to vector<8x128xf32>
    %34 = arith.negf %33 : vector<8x128xf32>
    %35 = math.exp %34 : vector<8x128xf32>
    %cst_32 = arith.constant 1.000000e+00 : f32
    %36 = vector.broadcast %cst_32 : f32 to vector<8x128xf32>
    %37 = arith.addf %36, %35 : vector<8x128xf32>
    %38 = arith.divf %36, %37 : vector<8x128xf32>
    %39 = vector.extract_strided_slice %28 {offsets = [0, 128], sizes = [8, 128], strides = [1, 1]} : vector<8x512xf32> to vector<8x128xf32>
    %40 = arith.negf %39 : vector<8x128xf32>
    %41 = math.exp %40 : vector<8x128xf32>
    %cst_33 = arith.constant 1.000000e+00 : f32
    %42 = vector.broadcast %cst_33 : f32 to vector<8x128xf32>
    %43 = arith.addf %42, %41 : vector<8x128xf32>
    %44 = arith.divf %42, %43 : vector<8x128xf32>
    %45 = vector.extract_strided_slice %28 {offsets = [0, 256], sizes = [8, 128], strides = [1, 1]} : vector<8x512xf32> to vector<8x128xf32>
    %46 = math.tanh %45 : vector<8x128xf32>
    %47 = vector.extract_strided_slice %28 {offsets = [0, 384], sizes = [8, 128], strides = [1, 1]} : vector<8x512xf32> to vector<8x128xf32>
    %48 = arith.negf %47 : vector<8x128xf32>
    %49 = math.exp %48 : vector<8x128xf32>
    %cst_34 = arith.constant 1.000000e+00 : f32
    %50 = vector.broadcast %cst_34 : f32 to vector<8x128xf32>
    %51 = arith.addf %50, %49 : vector<8x128xf32>
    %52 = arith.divf %50, %51 : vector<8x128xf32>
    %53 = arith.mulf %44, %22 : vector<8x128xf32>
    %54 = arith.mulf %38, %46 : vector<8x128xf32>
    %55 = arith.addf %53, %54 : vector<8x128xf32>
    %56 = math.tanh %55 : vector<8x128xf32>
    %57 = arith.mulf %52, %56 : vector<8x128xf32>
    %58 = vector.extract_strided_slice %32 {offsets = [0, 0], sizes = [8, 128], strides = [1, 1]} : vector<8x512xf32> to vector<8x128xf32>
    %59 = arith.negf %58 : vector<8x128xf32>
    %60 = math.exp %59 : vector<8x128xf32>
    %cst_35 = arith.constant 1.000000e+00 : f32
    %61 = vector.broadcast %cst_35 : f32 to vector<8x128xf32>
    %62 = arith.addf %61, %60 : vector<8x128xf32>
    %63 = arith.divf %61, %62 : vector<8x128xf32>
    %64 = vector.extract_strided_slice %32 {offsets = [0, 128], sizes = [8, 128], strides = [1, 1]} : vector<8x512xf32> to vector<8x128xf32>
    %65 = arith.negf %64 : vector<8x128xf32>
    %66 = math.exp %65 : vector<8x128xf32>
    %cst_36 = arith.constant 1.000000e+00 : f32
    %67 = vector.broadcast %cst_36 : f32 to vector<8x128xf32>
    %68 = arith.addf %67, %66 : vector<8x128xf32>
    %69 = arith.divf %67, %68 : vector<8x128xf32>
    %70 = vector.extract_strided_slice %32 {offsets = [0, 256], sizes = [8, 128], strides = [1, 1]} : vector<8x512xf32> to vector<8x128xf32>
    %71 = math.tanh %70 : vector<8x128xf32>
    %72 = vector.extract_strided_slice %32 {offsets = [0, 384], sizes = [8, 128], strides = [1, 1]} : vector<8x512xf32> to vector<8x128xf32>
    %73 = arith.negf %72 : vector<8x128xf32>
    %74 = math.exp %73 : vector<8x128xf32>
    %cst_37 = arith.constant 1.000000e+00 : f32
    %75 = vector.broadcast %cst_37 : f32 to vector<8x128xf32>
    %76 = arith.addf %75, %74 : vector<8x128xf32>
    %77 = arith.divf %75, %76 : vector<8x128xf32>
    %78 = arith.mulf %69, %24 : vector<8x128xf32>
    %79 = arith.mulf %63, %71 : vector<8x128xf32>
    %80 = arith.addf %78, %79 : vector<8x128xf32>
    %81 = math.tanh %80 : vector<8x128xf32>
    %82 = arith.mulf %77, %81 : vector<8x128xf32>
    %c8 = arith.constant 8 : index
    %c0_38 = arith.constant 0 : index
    %83 = vector.load %arg10[%c8, %c0_38] : memref<64x512xf32, #tpu.memory_space<vmem>>, vector<8x512xf32>
    %84 = arith.truncf %57 : vector<8x128xf32> to vector<8x128xbf16>
    %cst_39 = arith.constant dense<0.000000e+00> : vector<8x512xf32>
    %85 = tpu.matmul %84, %18, %cst_39 {dimension_numbers = #tpu.dot_dimension_numbers<[1], [0], [0], [1], [0, 0, 1, 1], [], []>} : vector<8x128xbf16>, vector<128x512xbf16>, vector<8x512xf32> -> vector<8x512xf32>
    %86 = arith.addf %83, %85 : vector<8x512xf32>
    %c48 = arith.constant 48 : index
    %c0_40 = arith.constant 0 : index
    %87 = vector.load %arg11[%c48, %c0_40] : memref<64x512xf32, #tpu.memory_space<vmem>>, vector<8x512xf32>
    %88 = arith.truncf %82 : vector<8x128xf32> to vector<8x128xbf16>
    %cst_41 = arith.constant dense<0.000000e+00> : vector<8x512xf32>
    %89 = tpu.matmul %88, %20, %cst_41 {dimension_numbers = #tpu.dot_dimension_numbers<[1], [0], [0], [1], [0, 0, 1, 1], [], []>} : vector<8x128xbf16>, vector<128x512xbf16>, vector<8x512xf32> -> vector<8x512xf32>
    %90 = arith.addf %87, %89 : vector<8x512xf32>
    %91 = vector.extract_strided_slice %86 {offsets = [0, 0], sizes = [8, 128], strides = [1, 1]} : vector<8x512xf32> to vector<8x128xf32>
    %92 = arith.negf %91 : vector<8x128xf32>
    %93 = math.exp %92 : vector<8x128xf32>
    %cst_42 = arith.constant 1.000000e+00 : f32
    %94 = vector.broadcast %cst_42 : f32 to vector<8x128xf32>
    %95 = arith.addf %94, %93 : vector<8x128xf32>
    %96 = arith.divf %94, %95 : vector<8x128xf32>
    %97 = vector.extract_strided_slice %86 {offsets = [0, 128], sizes = [8, 128], strides = [1, 1]} : vector<8x512xf32> to vector<8x128xf32>
    %98 = arith.negf %97 : vector<8x128xf32>
    %99 = math.exp %98 : vector<8x128xf32>
    %cst_43 = arith.constant 1.000000e+00 : f32
    %100 = vector.broadcast %cst_43 : f32 to vector<8x128xf32>
    %101 = arith.addf %100, %99 : vector<8x128xf32>
    %102 = arith.divf %100, %101 : vector<8x128xf32>
    %103 = vector.extract_strided_slice %86 {offsets = [0, 256], sizes = [8, 128], strides = [1, 1]} : vector<8x512xf32> to vector<8x128xf32>
    %104 = math.tanh %103 : vector<8x128xf32>
    %105 = vector.extract_strided_slice %86 {offsets = [0, 384], sizes = [8, 128], strides = [1, 1]} : vector<8x512xf32> to vector<8x128xf32>
    %106 = arith.negf %105 : vector<8x128xf32>
    %107 = math.exp %106 : vector<8x128xf32>
    %cst_44 = arith.constant 1.000000e+00 : f32
    %108 = vector.broadcast %cst_44 : f32 to vector<8x128xf32>
    %109 = arith.addf %108, %107 : vector<8x128xf32>
    %110 = arith.divf %108, %109 : vector<8x128xf32>
    %111 = arith.mulf %102, %55 : vector<8x128xf32>
    %112 = arith.mulf %96, %104 : vector<8x128xf32>
    %113 = arith.addf %111, %112 : vector<8x128xf32>
    %114 = math.tanh %113 : vector<8x128xf32>
    %115 = arith.mulf %110, %114 : vector<8x128xf32>
    %116 = vector.extract_strided_slice %90 {offsets = [0, 0], sizes = [8, 128], strides = [1, 1]} : vector<8x512xf32> to vector<8x128xf32>
    %117 = arith.negf %116 : vector<8x128xf32>
    %118 = math.exp %117 : vector<8x128xf32>
    %cst_45 = arith.constant 1.000000e+00 : f32
    %119 = vector.broadcast %cst_45 : f32 to vector<8x128xf32>
    %120 = arith.addf %119, %118 : vector<8x128xf32>
    %121 = arith.divf %119, %120 : vector<8x128xf32>
    %122 = vector.extract_strided_slice %90 {offsets = [0, 128], sizes = [8, 128], strides = [1, 1]} : vector<8x512xf32> to vector<8x128xf32>
    %123 = arith.negf %122 : vector<8x128xf32>
    %124 = math.exp %123 : vector<8x128xf32>
    %cst_46 = arith.constant 1.000000e+00 : f32
    %125 = vector.broadcast %cst_46 : f32 to vector<8x128xf32>
    %126 = arith.addf %125, %124 : vector<8x128xf32>
    %127 = arith.divf %125, %126 : vector<8x128xf32>
    %128 = vector.extract_strided_slice %90 {offsets = [0, 256], sizes = [8, 128], strides = [1, 1]} : vector<8x512xf32> to vector<8x128xf32>
    %129 = math.tanh %128 : vector<8x128xf32>
    %130 = vector.extract_strided_slice %90 {offsets = [0, 384], sizes = [8, 128], strides = [1, 1]} : vector<8x512xf32> to vector<8x128xf32>
    %131 = arith.negf %130 : vector<8x128xf32>
    %132 = math.exp %131 : vector<8x128xf32>
    %cst_47 = arith.constant 1.000000e+00 : f32
    %133 = vector.broadcast %cst_47 : f32 to vector<8x128xf32>
    %134 = arith.addf %133, %132 : vector<8x128xf32>
    %135 = arith.divf %133, %134 : vector<8x128xf32>
    %136 = arith.mulf %127, %80 : vector<8x128xf32>
    %137 = arith.mulf %121, %129 : vector<8x128xf32>
    %138 = arith.addf %136, %137 : vector<8x128xf32>
    %139 = math.tanh %138 : vector<8x128xf32>
    %140 = arith.mulf %135, %139 : vector<8x128xf32>
    %c16 = arith.constant 16 : index
    %c0_48 = arith.constant 0 : index
    %141 = vector.load %arg10[%c16, %c0_48] : memref<64x512xf32, #tpu.memory_space<vmem>>, vector<8x512xf32>
    %142 = arith.truncf %115 : vector<8x128xf32> to vector<8x128xbf16>
    %cst_49 = arith.constant dense<0.000000e+00> : vector<8x512xf32>
    %143 = tpu.matmul %142, %18, %cst_49 {dimension_numbers = #tpu.dot_dimension_numbers<[1], [0], [0], [1], [0, 0, 1, 1], [], []>} : vector<8x128xbf16>, vector<128x512xbf16>, vector<8x512xf32> -> vector<8x512xf32>
    %144 = arith.addf %141, %143 : vector<8x512xf32>
    %c40 = arith.constant 40 : index
    %c0_50 = arith.constant 0 : index
    %145 = vector.load %arg11[%c40, %c0_50] : memref<64x512xf32, #tpu.memory_space<vmem>>, vector<8x512xf32>
    %146 = arith.truncf %140 : vector<8x128xf32> to vector<8x128xbf16>
    %cst_51 = arith.constant dense<0.000000e+00> : vector<8x512xf32>
    %147 = tpu.matmul %146, %20, %cst_51 {dimension_numbers = #tpu.dot_dimension_numbers<[1], [0], [0], [1], [0, 0, 1, 1], [], []>} : vector<8x128xbf16>, vector<128x512xbf16>, vector<8x512xf32> -> vector<8x512xf32>
    %148 = arith.addf %145, %147 : vector<8x512xf32>
    %149 = vector.extract_strided_slice %144 {offsets = [0, 0], sizes = [8, 128], strides = [1, 1]} : vector<8x512xf32> to vector<8x128xf32>
    %150 = arith.negf %149 : vector<8x128xf32>
    %151 = math.exp %150 : vector<8x128xf32>
    %cst_52 = arith.constant 1.000000e+00 : f32
    %152 = vector.broadcast %cst_52 : f32 to vector<8x128xf32>
    %153 = arith.addf %152, %151 : vector<8x128xf32>
    %154 = arith.divf %152, %153 : vector<8x128xf32>
    %155 = vector.extract_strided_slice %144 {offsets = [0, 128], sizes = [8, 128], strides = [1, 1]} : vector<8x512xf32> to vector<8x128xf32>
    %156 = arith.negf %155 : vector<8x128xf32>
    %157 = math.exp %156 : vector<8x128xf32>
    %cst_53 = arith.constant 1.000000e+00 : f32
    %158 = vector.broadcast %cst_53 : f32 to vector<8x128xf32>
    %159 = arith.addf %158, %157 : vector<8x128xf32>
    %160 = arith.divf %158, %159 : vector<8x128xf32>
    %161 = vector.extract_strided_slice %144 {offsets = [0, 256], sizes = [8, 128], strides = [1, 1]} : vector<8x512xf32> to vector<8x128xf32>
    %162 = math.tanh %161 : vector<8x128xf32>
    %163 = vector.extract_strided_slice %144 {offsets = [0, 384], sizes = [8, 128], strides = [1, 1]} : vector<8x512xf32> to vector<8x128xf32>
    %164 = arith.negf %163 : vector<8x128xf32>
    %165 = math.exp %164 : vector<8x128xf32>
    %cst_54 = arith.constant 1.000000e+00 : f32
    %166 = vector.broadcast %cst_54 : f32 to vector<8x128xf32>
    %167 = arith.addf %166, %165 : vector<8x128xf32>
    %168 = arith.divf %166, %167 : vector<8x128xf32>
    %169 = arith.mulf %160, %113 : vector<8x128xf32>
    %170 = arith.mulf %154, %162 : vector<8x128xf32>
    %171 = arith.addf %169, %170 : vector<8x128xf32>
    %172 = math.tanh %171 : vector<8x128xf32>
    %173 = arith.mulf %168, %172 : vector<8x128xf32>
    %174 = vector.extract_strided_slice %148 {offsets = [0, 0], sizes = [8, 128], strides = [1, 1]} : vector<8x512xf32> to vector<8x128xf32>
    %175 = arith.negf %174 : vector<8x128xf32>
    %176 = math.exp %175 : vector<8x128xf32>
    %cst_55 = arith.constant 1.000000e+00 : f32
    %177 = vector.broadcast %cst_55 : f32 to vector<8x128xf32>
    %178 = arith.addf %177, %176 : vector<8x128xf32>
    %179 = arith.divf %177, %178 : vector<8x128xf32>
    %180 = vector.extract_strided_slice %148 {offsets = [0, 128], sizes = [8, 128], strides = [1, 1]} : vector<8x512xf32> to vector<8x128xf32>
    %181 = arith.negf %180 : vector<8x128xf32>
    %182 = math.exp %181 : vector<8x128xf32>
    %cst_56 = arith.constant 1.000000e+00 : f32
    %183 = vector.broadcast %cst_56 : f32 to vector<8x128xf32>
    %184 = arith.addf %183, %182 : vector<8x128xf32>
    %185 = arith.divf %183, %184 : vector<8x128xf32>
    %186 = vector.extract_strided_slice %148 {offsets = [0, 256], sizes = [8, 128], strides = [1, 1]} : vector<8x512xf32> to vector<8x128xf32>
    %187 = math.tanh %186 : vector<8x128xf32>
    %188 = vector.extract_strided_slice %148 {offsets = [0, 384], sizes = [8, 128], strides = [1, 1]} : vector<8x512xf32> to vector<8x128xf32>
    %189 = arith.negf %188 : vector<8x128xf32>
    %190 = math.exp %189 : vector<8x128xf32>
    %cst_57 = arith.constant 1.000000e+00 : f32
    %191 = vector.broadcast %cst_57 : f32 to vector<8x128xf32>
    %192 = arith.addf %191, %190 : vector<8x128xf32>
    %193 = arith.divf %191, %192 : vector<8x128xf32>
    %194 = arith.mulf %185, %138 : vector<8x128xf32>
    %195 = arith.mulf %179, %187 : vector<8x128xf32>
    %196 = arith.addf %194, %195 : vector<8x128xf32>
    %197 = math.tanh %196 : vector<8x128xf32>
    %198 = arith.mulf %193, %197 : vector<8x128xf32>
    %c24 = arith.constant 24 : index
    %c0_58 = arith.constant 0 : index
    %199 = vector.load %arg10[%c24, %c0_58] : memref<64x512xf32, #tpu.memory_space<vmem>>, vector<8x512xf32>
    %200 = arith.truncf %173 : vector<8x128xf32> to vector<8x128xbf16>
    %cst_59 = arith.constant dense<0.000000e+00> : vector<8x512xf32>
    %201 = tpu.matmul %200, %18, %cst_59 {dimension_numbers = #tpu.dot_dimension_numbers<[1], [0], [0], [1], [0, 0, 1, 1], [], []>} : vector<8x128xbf16>, vector<128x512xbf16>, vector<8x512xf32> -> vector<8x512xf32>
    %202 = arith.addf %199, %201 : vector<8x512xf32>
    %c32 = arith.constant 32 : index
    %c0_60 = arith.constant 0 : index
    %203 = vector.load %arg11[%c32, %c0_60] : memref<64x512xf32, #tpu.memory_space<vmem>>, vector<8x512xf32>
    %204 = arith.truncf %198 : vector<8x128xf32> to vector<8x128xbf16>
    %cst_61 = arith.constant dense<0.000000e+00> : vector<8x512xf32>
    %205 = tpu.matmul %204, %20, %cst_61 {dimension_numbers = #tpu.dot_dimension_numbers<[1], [0], [0], [1], [0, 0, 1, 1], [], []>} : vector<8x128xbf16>, vector<128x512xbf16>, vector<8x512xf32> -> vector<8x512xf32>
    %206 = arith.addf %203, %205 : vector<8x512xf32>
    %207 = vector.extract_strided_slice %202 {offsets = [0, 0], sizes = [8, 128], strides = [1, 1]} : vector<8x512xf32> to vector<8x128xf32>
    %208 = arith.negf %207 : vector<8x128xf32>
    %209 = math.exp %208 : vector<8x128xf32>
    %cst_62 = arith.constant 1.000000e+00 : f32
    %210 = vector.broadcast %cst_62 : f32 to vector<8x128xf32>
    %211 = arith.addf %210, %209 : vector<8x128xf32>
    %212 = arith.divf %210, %211 : vector<8x128xf32>
    %213 = vector.extract_strided_slice %202 {offsets = [0, 128], sizes = [8, 128], strides = [1, 1]} : vector<8x512xf32> to vector<8x128xf32>
    %214 = arith.negf %213 : vector<8x128xf32>
    %215 = math.exp %214 : vector<8x128xf32>
    %cst_63 = arith.constant 1.000000e+00 : f32
    %216 = vector.broadcast %cst_63 : f32 to vector<8x128xf32>
    %217 = arith.addf %216, %215 : vector<8x128xf32>
    %218 = arith.divf %216, %217 : vector<8x128xf32>
    %219 = vector.extract_strided_slice %202 {offsets = [0, 256], sizes = [8, 128], strides = [1, 1]} : vector<8x512xf32> to vector<8x128xf32>
    %220 = math.tanh %219 : vector<8x128xf32>
    %221 = vector.extract_strided_slice %202 {offsets = [0, 384], sizes = [8, 128], strides = [1, 1]} : vector<8x512xf32> to vector<8x128xf32>
    %222 = arith.negf %221 : vector<8x128xf32>
    %223 = math.exp %222 : vector<8x128xf32>
    %cst_64 = arith.constant 1.000000e+00 : f32
    %224 = vector.broadcast %cst_64 : f32 to vector<8x128xf32>
    %225 = arith.addf %224, %223 : vector<8x128xf32>
    %226 = arith.divf %224, %225 : vector<8x128xf32>
    %227 = arith.mulf %218, %171 : vector<8x128xf32>
    %228 = arith.mulf %212, %220 : vector<8x128xf32>
    %229 = arith.addf %227, %228 : vector<8x128xf32>
    %230 = math.tanh %229 : vector<8x128xf32>
    %231 = arith.mulf %226, %230 : vector<8x128xf32>
    %232 = vector.extract_strided_slice %206 {offsets = [0, 0], sizes = [8, 128], strides = [1, 1]} : vector<8x512xf32> to vector<8x128xf32>
    %233 = arith.negf %232 : vector<8x128xf32>
    %234 = math.exp %233 : vector<8x128xf32>
    %cst_65 = arith.constant 1.000000e+00 : f32
    %235 = vector.broadcast %cst_65 : f32 to vector<8x128xf32>
    %236 = arith.addf %235, %234 : vector<8x128xf32>
    %237 = arith.divf %235, %236 : vector<8x128xf32>
    %238 = vector.extract_strided_slice %206 {offsets = [0, 128], sizes = [8, 128], strides = [1, 1]} : vector<8x512xf32> to vector<8x128xf32>
    %239 = arith.negf %238 : vector<8x128xf32>
    %240 = math.exp %239 : vector<8x128xf32>
    %cst_66 = arith.constant 1.000000e+00 : f32
    %241 = vector.broadcast %cst_66 : f32 to vector<8x128xf32>
    %242 = arith.addf %241, %240 : vector<8x128xf32>
    %243 = arith.divf %241, %242 : vector<8x128xf32>
    %244 = vector.extract_strided_slice %206 {offsets = [0, 256], sizes = [8, 128], strides = [1, 1]} : vector<8x512xf32> to vector<8x128xf32>
    %245 = math.tanh %244 : vector<8x128xf32>
    %246 = vector.extract_strided_slice %206 {offsets = [0, 384], sizes = [8, 128], strides = [1, 1]} : vector<8x512xf32> to vector<8x128xf32>
    %247 = arith.negf %246 : vector<8x128xf32>
    %248 = math.exp %247 : vector<8x128xf32>
    %cst_67 = arith.constant 1.000000e+00 : f32
    %249 = vector.broadcast %cst_67 : f32 to vector<8x128xf32>
    %250 = arith.addf %249, %248 : vector<8x128xf32>
    %251 = arith.divf %249, %250 : vector<8x128xf32>
    %252 = arith.mulf %243, %196 : vector<8x128xf32>
    %253 = arith.mulf %237, %245 : vector<8x128xf32>
    %254 = arith.addf %252, %253 : vector<8x128xf32>
    %255 = math.tanh %254 : vector<8x128xf32>
    %256 = arith.mulf %251, %255 : vector<8x128xf32>
    %c32_68 = arith.constant 32 : index
    %c0_69 = arith.constant 0 : index
    %257 = vector.load %arg10[%c32_68, %c0_69] : memref<64x512xf32, #tpu.memory_space<vmem>>, vector<8x512xf32>
    %258 = arith.truncf %231 : vector<8x128xf32> to vector<8x128xbf16>
    %cst_70 = arith.constant dense<0.000000e+00> : vector<8x512xf32>
    %259 = tpu.matmul %258, %18, %cst_70 {dimension_numbers = #tpu.dot_dimension_numbers<[1], [0], [0], [1], [0, 0, 1, 1], [], []>} : vector<8x128xbf16>, vector<128x512xbf16>, vector<8x512xf32> -> vector<8x512xf32>
    %260 = arith.addf %257, %259 : vector<8x512xf32>
    %c24_71 = arith.constant 24 : index
    %c0_72 = arith.constant 0 : index
    %261 = vector.load %arg11[%c24_71, %c0_72] : memref<64x512xf32, #tpu.memory_space<vmem>>, vector<8x512xf32>
    %262 = arith.truncf %256 : vector<8x128xf32> to vector<8x128xbf16>
    %cst_73 = arith.constant dense<0.000000e+00> : vector<8x512xf32>
    %263 = tpu.matmul %262, %20, %cst_73 {dimension_numbers = #tpu.dot_dimension_numbers<[1], [0], [0], [1], [0, 0, 1, 1], [], []>} : vector<8x128xbf16>, vector<128x512xbf16>, vector<8x512xf32> -> vector<8x512xf32>
    %264 = arith.addf %261, %263 : vector<8x512xf32>
    %265 = vector.extract_strided_slice %260 {offsets = [0, 0], sizes = [8, 128], strides = [1, 1]} : vector<8x512xf32> to vector<8x128xf32>
    %266 = arith.negf %265 : vector<8x128xf32>
    %267 = math.exp %266 : vector<8x128xf32>
    %cst_74 = arith.constant 1.000000e+00 : f32
    %268 = vector.broadcast %cst_74 : f32 to vector<8x128xf32>
    %269 = arith.addf %268, %267 : vector<8x128xf32>
    %270 = arith.divf %268, %269 : vector<8x128xf32>
    %271 = vector.extract_strided_slice %260 {offsets = [0, 128], sizes = [8, 128], strides = [1, 1]} : vector<8x512xf32> to vector<8x128xf32>
    %272 = arith.negf %271 : vector<8x128xf32>
    %273 = math.exp %272 : vector<8x128xf32>
    %cst_75 = arith.constant 1.000000e+00 : f32
    %274 = vector.broadcast %cst_75 : f32 to vector<8x128xf32>
    %275 = arith.addf %274, %273 : vector<8x128xf32>
    %276 = arith.divf %274, %275 : vector<8x128xf32>
    %277 = vector.extract_strided_slice %260 {offsets = [0, 256], sizes = [8, 128], strides = [1, 1]} : vector<8x512xf32> to vector<8x128xf32>
    %278 = math.tanh %277 : vector<8x128xf32>
    %279 = vector.extract_strided_slice %260 {offsets = [0, 384], sizes = [8, 128], strides = [1, 1]} : vector<8x512xf32> to vector<8x128xf32>
    %280 = arith.negf %279 : vector<8x128xf32>
    %281 = math.exp %280 : vector<8x128xf32>
    %cst_76 = arith.constant 1.000000e+00 : f32
    %282 = vector.broadcast %cst_76 : f32 to vector<8x128xf32>
    %283 = arith.addf %282, %281 : vector<8x128xf32>
    %284 = arith.divf %282, %283 : vector<8x128xf32>
    %285 = arith.mulf %276, %229 : vector<8x128xf32>
    %286 = arith.mulf %270, %278 : vector<8x128xf32>
    %287 = arith.addf %285, %286 : vector<8x128xf32>
    %288 = math.tanh %287 : vector<8x128xf32>
    %289 = arith.mulf %284, %288 : vector<8x128xf32>
    %290 = vector.extract_strided_slice %264 {offsets = [0, 0], sizes = [8, 128], strides = [1, 1]} : vector<8x512xf32> to vector<8x128xf32>
    %291 = arith.negf %290 : vector<8x128xf32>
    %292 = math.exp %291 : vector<8x128xf32>
    %cst_77 = arith.constant 1.000000e+00 : f32
    %293 = vector.broadcast %cst_77 : f32 to vector<8x128xf32>
    %294 = arith.addf %293, %292 : vector<8x128xf32>
    %295 = arith.divf %293, %294 : vector<8x128xf32>
    %296 = vector.extract_strided_slice %264 {offsets = [0, 128], sizes = [8, 128], strides = [1, 1]} : vector<8x512xf32> to vector<8x128xf32>
    %297 = arith.negf %296 : vector<8x128xf32>
    %298 = math.exp %297 : vector<8x128xf32>
    %cst_78 = arith.constant 1.000000e+00 : f32
    %299 = vector.broadcast %cst_78 : f32 to vector<8x128xf32>
    %300 = arith.addf %299, %298 : vector<8x128xf32>
    %301 = arith.divf %299, %300 : vector<8x128xf32>
    %302 = vector.extract_strided_slice %264 {offsets = [0, 256], sizes = [8, 128], strides = [1, 1]} : vector<8x512xf32> to vector<8x128xf32>
    %303 = math.tanh %302 : vector<8x128xf32>
    %304 = vector.extract_strided_slice %264 {offsets = [0, 384], sizes = [8, 128], strides = [1, 1]} : vector<8x512xf32> to vector<8x128xf32>
    %305 = arith.negf %304 : vector<8x128xf32>
    %306 = math.exp %305 : vector<8x128xf32>
    %cst_79 = arith.constant 1.000000e+00 : f32
    %307 = vector.broadcast %cst_79 : f32 to vector<8x128xf32>
    %308 = arith.addf %307, %306 : vector<8x128xf32>
    %309 = arith.divf %307, %308 : vector<8x128xf32>
    %310 = arith.mulf %301, %254 : vector<8x128xf32>
    %311 = arith.mulf %295, %303 : vector<8x128xf32>
    %312 = arith.addf %310, %311 : vector<8x128xf32>
    %313 = math.tanh %312 : vector<8x128xf32>
    %314 = arith.mulf %309, %313 : vector<8x128xf32>
    %c40_80 = arith.constant 40 : index
    %c0_81 = arith.constant 0 : index
    %315 = vector.load %arg10[%c40_80, %c0_81] : memref<64x512xf32, #tpu.memory_space<vmem>>, vector<8x512xf32>
    %316 = arith.truncf %289 : vector<8x128xf32> to vector<8x128xbf16>
    %cst_82 = arith.constant dense<0.000000e+00> : vector<8x512xf32>
    %317 = tpu.matmul %316, %18, %cst_82 {dimension_numbers = #tpu.dot_dimension_numbers<[1], [0], [0], [1], [0, 0, 1, 1], [], []>} : vector<8x128xbf16>, vector<128x512xbf16>, vector<8x512xf32> -> vector<8x512xf32>
    %318 = arith.addf %315, %317 : vector<8x512xf32>
    %c16_83 = arith.constant 16 : index
    %c0_84 = arith.constant 0 : index
    %319 = vector.load %arg11[%c16_83, %c0_84] : memref<64x512xf32, #tpu.memory_space<vmem>>, vector<8x512xf32>
    %320 = arith.truncf %314 : vector<8x128xf32> to vector<8x128xbf16>
    %cst_85 = arith.constant dense<0.000000e+00> : vector<8x512xf32>
    %321 = tpu.matmul %320, %20, %cst_85 {dimension_numbers = #tpu.dot_dimension_numbers<[1], [0], [0], [1], [0, 0, 1, 1], [], []>} : vector<8x128xbf16>, vector<128x512xbf16>, vector<8x512xf32> -> vector<8x512xf32>
    %322 = arith.addf %319, %321 : vector<8x512xf32>
    %323 = vector.extract_strided_slice %318 {offsets = [0, 0], sizes = [8, 128], strides = [1, 1]} : vector<8x512xf32> to vector<8x128xf32>
    %324 = arith.negf %323 : vector<8x128xf32>
    %325 = math.exp %324 : vector<8x128xf32>
    %cst_86 = arith.constant 1.000000e+00 : f32
    %326 = vector.broadcast %cst_86 : f32 to vector<8x128xf32>
    %327 = arith.addf %326, %325 : vector<8x128xf32>
    %328 = arith.divf %326, %327 : vector<8x128xf32>
    %329 = vector.extract_strided_slice %318 {offsets = [0, 128], sizes = [8, 128], strides = [1, 1]} : vector<8x512xf32> to vector<8x128xf32>
    %330 = arith.negf %329 : vector<8x128xf32>
    %331 = math.exp %330 : vector<8x128xf32>
    %cst_87 = arith.constant 1.000000e+00 : f32
    %332 = vector.broadcast %cst_87 : f32 to vector<8x128xf32>
    %333 = arith.addf %332, %331 : vector<8x128xf32>
    %334 = arith.divf %332, %333 : vector<8x128xf32>
    %335 = vector.extract_strided_slice %318 {offsets = [0, 256], sizes = [8, 128], strides = [1, 1]} : vector<8x512xf32> to vector<8x128xf32>
    %336 = math.tanh %335 : vector<8x128xf32>
    %337 = vector.extract_strided_slice %318 {offsets = [0, 384], sizes = [8, 128], strides = [1, 1]} : vector<8x512xf32> to vector<8x128xf32>
    %338 = arith.negf %337 : vector<8x128xf32>
    %339 = math.exp %338 : vector<8x128xf32>
    %cst_88 = arith.constant 1.000000e+00 : f32
    %340 = vector.broadcast %cst_88 : f32 to vector<8x128xf32>
    %341 = arith.addf %340, %339 : vector<8x128xf32>
    %342 = arith.divf %340, %341 : vector<8x128xf32>
    %343 = arith.mulf %334, %287 : vector<8x128xf32>
    %344 = arith.mulf %328, %336 : vector<8x128xf32>
    %345 = arith.addf %343, %344 : vector<8x128xf32>
    %346 = math.tanh %345 : vector<8x128xf32>
    %347 = arith.mulf %342, %346 : vector<8x128xf32>
    %348 = vector.extract_strided_slice %322 {offsets = [0, 0], sizes = [8, 128], strides = [1, 1]} : vector<8x512xf32> to vector<8x128xf32>
    %349 = arith.negf %348 : vector<8x128xf32>
    %350 = math.exp %349 : vector<8x128xf32>
    %cst_89 = arith.constant 1.000000e+00 : f32
    %351 = vector.broadcast %cst_89 : f32 to vector<8x128xf32>
    %352 = arith.addf %351, %350 : vector<8x128xf32>
    %353 = arith.divf %351, %352 : vector<8x128xf32>
    %354 = vector.extract_strided_slice %322 {offsets = [0, 128], sizes = [8, 128], strides = [1, 1]} : vector<8x512xf32> to vector<8x128xf32>
    %355 = arith.negf %354 : vector<8x128xf32>
    %356 = math.exp %355 : vector<8x128xf32>
    %cst_90 = arith.constant 1.000000e+00 : f32
    %357 = vector.broadcast %cst_90 : f32 to vector<8x128xf32>
    %358 = arith.addf %357, %356 : vector<8x128xf32>
    %359 = arith.divf %357, %358 : vector<8x128xf32>
    %360 = vector.extract_strided_slice %322 {offsets = [0, 256], sizes = [8, 128], strides = [1, 1]} : vector<8x512xf32> to vector<8x128xf32>
    %361 = math.tanh %360 : vector<8x128xf32>
    %362 = vector.extract_strided_slice %322 {offsets = [0, 384], sizes = [8, 128], strides = [1, 1]} : vector<8x512xf32> to vector<8x128xf32>
    %363 = arith.negf %362 : vector<8x128xf32>
    %364 = math.exp %363 : vector<8x128xf32>
    %cst_91 = arith.constant 1.000000e+00 : f32
    %365 = vector.broadcast %cst_91 : f32 to vector<8x128xf32>
    %366 = arith.addf %365, %364 : vector<8x128xf32>
    %367 = arith.divf %365, %366 : vector<8x128xf32>
    %368 = arith.mulf %359, %312 : vector<8x128xf32>
    %369 = arith.mulf %353, %361 : vector<8x128xf32>
    %370 = arith.addf %368, %369 : vector<8x128xf32>
    %371 = math.tanh %370 : vector<8x128xf32>
    %372 = arith.mulf %367, %371 : vector<8x128xf32>
    %c48_92 = arith.constant 48 : index
    %c0_93 = arith.constant 0 : index
    %373 = vector.load %arg10[%c48_92, %c0_93] : memref<64x512xf32, #tpu.memory_space<vmem>>, vector<8x512xf32>
    %374 = arith.truncf %347 : vector<8x128xf32> to vector<8x128xbf16>
    %cst_94 = arith.constant dense<0.000000e+00> : vector<8x512xf32>
    %375 = tpu.matmul %374, %18, %cst_94 {dimension_numbers = #tpu.dot_dimension_numbers<[1], [0], [0], [1], [0, 0, 1, 1], [], []>} : vector<8x128xbf16>, vector<128x512xbf16>, vector<8x512xf32> -> vector<8x512xf32>
    %376 = arith.addf %373, %375 : vector<8x512xf32>
    %c8_95 = arith.constant 8 : index
    %c0_96 = arith.constant 0 : index
    %377 = vector.load %arg11[%c8_95, %c0_96] : memref<64x512xf32, #tpu.memory_space<vmem>>, vector<8x512xf32>
    %378 = arith.truncf %372 : vector<8x128xf32> to vector<8x128xbf16>
    %cst_97 = arith.constant dense<0.000000e+00> : vector<8x512xf32>
    %379 = tpu.matmul %378, %20, %cst_97 {dimension_numbers = #tpu.dot_dimension_numbers<[1], [0], [0], [1], [0, 0, 1, 1], [], []>} : vector<8x128xbf16>, vector<128x512xbf16>, vector<8x512xf32> -> vector<8x512xf32>
    %380 = arith.addf %377, %379 : vector<8x512xf32>
    %381 = vector.extract_strided_slice %376 {offsets = [0, 0], sizes = [8, 128], strides = [1, 1]} : vector<8x512xf32> to vector<8x128xf32>
    %382 = arith.negf %381 : vector<8x128xf32>
    %383 = math.exp %382 : vector<8x128xf32>
    %cst_98 = arith.constant 1.000000e+00 : f32
    %384 = vector.broadcast %cst_98 : f32 to vector<8x128xf32>
    %385 = arith.addf %384, %383 : vector<8x128xf32>
    %386 = arith.divf %384, %385 : vector<8x128xf32>
    %387 = vector.extract_strided_slice %376 {offsets = [0, 128], sizes = [8, 128], strides = [1, 1]} : vector<8x512xf32> to vector<8x128xf32>
    %388 = arith.negf %387 : vector<8x128xf32>
    %389 = math.exp %388 : vector<8x128xf32>
    %cst_99 = arith.constant 1.000000e+00 : f32
    %390 = vector.broadcast %cst_99 : f32 to vector<8x128xf32>
    %391 = arith.addf %390, %389 : vector<8x128xf32>
    %392 = arith.divf %390, %391 : vector<8x128xf32>
    %393 = vector.extract_strided_slice %376 {offsets = [0, 256], sizes = [8, 128], strides = [1, 1]} : vector<8x512xf32> to vector<8x128xf32>
    %394 = math.tanh %393 : vector<8x128xf32>
    %395 = vector.extract_strided_slice %376 {offsets = [0, 384], sizes = [8, 128], strides = [1, 1]} : vector<8x512xf32> to vector<8x128xf32>
    %396 = arith.negf %395 : vector<8x128xf32>
    %397 = math.exp %396 : vector<8x128xf32>
    %cst_100 = arith.constant 1.000000e+00 : f32
    %398 = vector.broadcast %cst_100 : f32 to vector<8x128xf32>
    %399 = arith.addf %398, %397 : vector<8x128xf32>
    %400 = arith.divf %398, %399 : vector<8x128xf32>
    %401 = arith.mulf %392, %345 : vector<8x128xf32>
    %402 = arith.mulf %386, %394 : vector<8x128xf32>
    %403 = arith.addf %401, %402 : vector<8x128xf32>
    %404 = math.tanh %403 : vector<8x128xf32>
    %405 = arith.mulf %400, %404 : vector<8x128xf32>
    %406 = vector.extract_strided_slice %380 {offsets = [0, 0], sizes = [8, 128], strides = [1, 1]} : vector<8x512xf32> to vector<8x128xf32>
    %407 = arith.negf %406 : vector<8x128xf32>
    %408 = math.exp %407 : vector<8x128xf32>
    %cst_101 = arith.constant 1.000000e+00 : f32
    %409 = vector.broadcast %cst_101 : f32 to vector<8x128xf32>
    %410 = arith.addf %409, %408 : vector<8x128xf32>
    %411 = arith.divf %409, %410 : vector<8x128xf32>
    %412 = vector.extract_strided_slice %380 {offsets = [0, 128], sizes = [8, 128], strides = [1, 1]} : vector<8x512xf32> to vector<8x128xf32>
    %413 = arith.negf %412 : vector<8x128xf32>
    %414 = math.exp %413 : vector<8x128xf32>
    %cst_102 = arith.constant 1.000000e+00 : f32
    %415 = vector.broadcast %cst_102 : f32 to vector<8x128xf32>
    %416 = arith.addf %415, %414 : vector<8x128xf32>
    %417 = arith.divf %415, %416 : vector<8x128xf32>
    %418 = vector.extract_strided_slice %380 {offsets = [0, 256], sizes = [8, 128], strides = [1, 1]} : vector<8x512xf32> to vector<8x128xf32>
    %419 = math.tanh %418 : vector<8x128xf32>
    %420 = vector.extract_strided_slice %380 {offsets = [0, 384], sizes = [8, 128], strides = [1, 1]} : vector<8x512xf32> to vector<8x128xf32>
    %421 = arith.negf %420 : vector<8x128xf32>
    %422 = math.exp %421 : vector<8x128xf32>
    %cst_103 = arith.constant 1.000000e+00 : f32
    %423 = vector.broadcast %cst_103 : f32 to vector<8x128xf32>
    %424 = arith.addf %423, %422 : vector<8x128xf32>
    %425 = arith.divf %423, %424 : vector<8x128xf32>
    %426 = arith.mulf %417, %370 : vector<8x128xf32>
    %427 = arith.mulf %411, %419 : vector<8x128xf32>
    %428 = arith.addf %426, %427 : vector<8x128xf32>
    %429 = math.tanh %428 : vector<8x128xf32>
    %430 = arith.mulf %425, %429 : vector<8x128xf32>
    %c56_104 = arith.constant 56 : index
    %c0_105 = arith.constant 0 : index
    %431 = vector.load %arg10[%c56_104, %c0_105] : memref<64x512xf32, #tpu.memory_space<vmem>>, vector<8x512xf32>
    %432 = arith.truncf %405 : vector<8x128xf32> to vector<8x128xbf16>
    %cst_106 = arith.constant dense<0.000000e+00> : vector<8x512xf32>
    %433 = tpu.matmul %432, %18, %cst_106 {dimension_numbers = #tpu.dot_dimension_numbers<[1], [0], [0], [1], [0, 0, 1, 1], [], []>} : vector<8x128xbf16>, vector<128x512xbf16>, vector<8x512xf32> -> vector<8x512xf32>
    %434 = arith.addf %431, %433 : vector<8x512xf32>
    %c0_107 = arith.constant 0 : index
    %c0_108 = arith.constant 0 : index
    %435 = vector.load %arg11[%c0_107, %c0_108] : memref<64x512xf32, #tpu.memory_space<vmem>>, vector<8x512xf32>
    %436 = arith.truncf %430 : vector<8x128xf32> to vector<8x128xbf16>
    %cst_109 = arith.constant dense<0.000000e+00> : vector<8x512xf32>
    %437 = tpu.matmul %436, %20, %cst_109 {dimension_numbers = #tpu.dot_dimension_numbers<[1], [0], [0], [1], [0, 0, 1, 1], [], []>} : vector<8x128xbf16>, vector<128x512xbf16>, vector<8x512xf32> -> vector<8x512xf32>
    %438 = arith.addf %435, %437 : vector<8x512xf32>
    %439 = vector.extract_strided_slice %434 {offsets = [0, 0], sizes = [8, 128], strides = [1, 1]} : vector<8x512xf32> to vector<8x128xf32>
    %440 = arith.negf %439 : vector<8x128xf32>
    %441 = math.exp %440 : vector<8x128xf32>
    %cst_110 = arith.constant 1.000000e+00 : f32
    %442 = vector.broadcast %cst_110 : f32 to vector<8x128xf32>
    %443 = arith.addf %442, %441 : vector<8x128xf32>
    %444 = arith.divf %442, %443 : vector<8x128xf32>
    %445 = vector.extract_strided_slice %434 {offsets = [0, 128], sizes = [8, 128], strides = [1, 1]} : vector<8x512xf32> to vector<8x128xf32>
    %446 = arith.negf %445 : vector<8x128xf32>
    %447 = math.exp %446 : vector<8x128xf32>
    %cst_111 = arith.constant 1.000000e+00 : f32
    %448 = vector.broadcast %cst_111 : f32 to vector<8x128xf32>
    %449 = arith.addf %448, %447 : vector<8x128xf32>
    %450 = arith.divf %448, %449 : vector<8x128xf32>
    %451 = vector.extract_strided_slice %434 {offsets = [0, 256], sizes = [8, 128], strides = [1, 1]} : vector<8x512xf32> to vector<8x128xf32>
    %452 = math.tanh %451 : vector<8x128xf32>
    %453 = vector.extract_strided_slice %434 {offsets = [0, 384], sizes = [8, 128], strides = [1, 1]} : vector<8x512xf32> to vector<8x128xf32>
    %454 = arith.negf %453 : vector<8x128xf32>
    %455 = math.exp %454 : vector<8x128xf32>
    %cst_112 = arith.constant 1.000000e+00 : f32
    %456 = vector.broadcast %cst_112 : f32 to vector<8x128xf32>
    %457 = arith.addf %456, %455 : vector<8x128xf32>
    %458 = arith.divf %456, %457 : vector<8x128xf32>
    %459 = arith.mulf %450, %403 : vector<8x128xf32>
    %460 = arith.mulf %444, %452 : vector<8x128xf32>
    %461 = arith.addf %459, %460 : vector<8x128xf32>
    %462 = math.tanh %461 : vector<8x128xf32>
    %463 = arith.mulf %458, %462 : vector<8x128xf32>
    %464 = vector.extract_strided_slice %438 {offsets = [0, 0], sizes = [8, 128], strides = [1, 1]} : vector<8x512xf32> to vector<8x128xf32>
    %465 = arith.negf %464 : vector<8x128xf32>
    %466 = math.exp %465 : vector<8x128xf32>
    %cst_113 = arith.constant 1.000000e+00 : f32
    %467 = vector.broadcast %cst_113 : f32 to vector<8x128xf32>
    %468 = arith.addf %467, %466 : vector<8x128xf32>
    %469 = arith.divf %467, %468 : vector<8x128xf32>
    %470 = vector.extract_strided_slice %438 {offsets = [0, 128], sizes = [8, 128], strides = [1, 1]} : vector<8x512xf32> to vector<8x128xf32>
    %471 = arith.negf %470 : vector<8x128xf32>
    %472 = math.exp %471 : vector<8x128xf32>
    %cst_114 = arith.constant 1.000000e+00 : f32
    %473 = vector.broadcast %cst_114 : f32 to vector<8x128xf32>
    %474 = arith.addf %473, %472 : vector<8x128xf32>
    %475 = arith.divf %473, %474 : vector<8x128xf32>
    %476 = vector.extract_strided_slice %438 {offsets = [0, 256], sizes = [8, 128], strides = [1, 1]} : vector<8x512xf32> to vector<8x128xf32>
    %477 = math.tanh %476 : vector<8x128xf32>
    %478 = vector.extract_strided_slice %438 {offsets = [0, 384], sizes = [8, 128], strides = [1, 1]} : vector<8x512xf32> to vector<8x128xf32>
    %479 = arith.negf %478 : vector<8x128xf32>
    %480 = math.exp %479 : vector<8x128xf32>
    %cst_115 = arith.constant 1.000000e+00 : f32
    %481 = vector.broadcast %cst_115 : f32 to vector<8x128xf32>
    %482 = arith.addf %481, %480 : vector<8x128xf32>
    %483 = arith.divf %481, %482 : vector<8x128xf32>
    %484 = arith.mulf %475, %428 : vector<8x128xf32>
    %485 = arith.mulf %469, %477 : vector<8x128xf32>
    %486 = arith.addf %484, %485 : vector<8x128xf32>
    %487 = math.tanh %486 : vector<8x128xf32>
    %488 = arith.mulf %483, %487 : vector<8x128xf32>
    %489 = arith.truncf %463 : vector<8x128xf32> to vector<8x128xbf16>
    %c0_116 = arith.constant 0 : index
    %c0_117 = arith.constant 0 : index
    %c0_118 = arith.constant 0 : index
    %490 = vector.load %arg5[%c0_116, %c0_117, %c0_118] : memref<2x128x128xbf16, #tpu.memory_space<vmem>>, vector<1x128x128xbf16>
    %491 = vector.shape_cast %490 : vector<1x128x128xbf16> to vector<128x128xbf16>
    %cst_119 = arith.constant dense<0.000000e+00> : vector<8x128xf32>
    %492 = tpu.matmul %489, %491, %cst_119 {dimension_numbers = #tpu.dot_dimension_numbers<[1], [0], [0], [1], [0, 0, 1, 1], [], []>} : vector<8x128xbf16>, vector<128x128xbf16>, vector<8x128xf32> -> vector<8x128xf32>
    %493 = arith.truncf %488 : vector<8x128xf32> to vector<8x128xbf16>
    %c1_120 = arith.constant 1 : index
    %c0_121 = arith.constant 0 : index
    %c0_122 = arith.constant 0 : index
    %494 = vector.load %arg5[%c1_120, %c0_121, %c0_122] : memref<2x128x128xbf16, #tpu.memory_space<vmem>>, vector<1x128x128xbf16>
    %495 = vector.shape_cast %494 : vector<1x128x128xbf16> to vector<128x128xbf16>
    %cst_123 = arith.constant dense<0.000000e+00> : vector<8x128xf32>
    %496 = tpu.matmul %493, %495, %cst_123 {dimension_numbers = #tpu.dot_dimension_numbers<[1], [0], [0], [1], [0, 0, 1, 1], [], []>} : vector<8x128xbf16>, vector<128x128xbf16>, vector<8x128xf32> -> vector<8x128xf32>
    %497 = arith.addf %492, %496 : vector<8x128xf32>
    %c0_124 = arith.constant 0 : index
    %c0_125 = arith.constant 0 : index
    %498 = vector.load %arg6[%c0_124, %c0_125] : memref<1x128xf32, #tpu.memory_space<vmem>>, vector<1x128xf32>
    %499 = vector.broadcast %498 : vector<1x128xf32> to vector<8x128xf32>
    %500 = arith.addf %497, %499 : vector<8x128xf32>
    %cst_126 = arith.constant 0.000000e+00 : f32
    %501 = vector.broadcast %cst_126 : f32 to vector<8x128xf32>
    %502 = arith.maximumf %500, %501 : vector<8x128xf32>
    %503 = arith.truncf %502 : vector<8x128xf32> to vector<8x128xbf16>
    %c0_127 = arith.constant 0 : index
    %c0_128 = arith.constant 0 : index
    %504 = vector.load %arg7[%c0_127, %c0_128] : memref<128x128xbf16, #tpu.memory_space<vmem>>, vector<128x128xbf16>
    %cst_129 = arith.constant dense<0.000000e+00> : vector<8x128xf32>
    %505 = tpu.matmul %503, %504, %cst_129 {dimension_numbers = #tpu.dot_dimension_numbers<[1], [0], [0], [1], [0, 0, 1, 1], [], []>} : vector<8x128xbf16>, vector<128x128xbf16>, vector<8x128xf32> -> vector<8x128xf32>
    %c0_130 = arith.constant 0 : index
    %c0_131 = arith.constant 0 : index
    %506 = vector.load %arg8[%c0_130, %c0_131] : memref<1x128xf32, #tpu.memory_space<vmem>>, vector<1x128xf32>
    %507 = vector.broadcast %506 : vector<1x128xf32> to vector<8x128xf32>
    %508 = arith.addf %505, %507 : vector<8x128xf32>
    %c0_132 = arith.constant 0 : index
    %c0_133 = arith.constant 0 : index
    %509 = vector.load %arg9[%c0_132, %c0_133] : memref<8x128xf32, #tpu.memory_space<vmem>>, vector<8x128xf32>
    tpu.vector_store %arg9[%c0_132, %c0_133], %508 {strides = array<i32>} : memref<8x128xf32, #tpu.memory_space<vmem>>, vector<8x128xf32>,
    return
  }
  func.func @transform_0(%arg0: i32) -> (i32, i32) {
    %c0_i32 = arith.constant 0 : i32
    %c0_i32_0 = arith.constant 0 : i32
    %c0_i32_1 = arith.constant 0 : i32
    return %c0_i32, %c0_i32_0 : i32, i32
  }
  func.func @transform_1(%arg0: i32) -> (i32, i32, i32) {
    %c0_i32 = arith.constant 0 : i32
    %c0_i32_0 = arith.constant 0 : i32
    %c0_i32_1 = arith.constant 0 : i32
    %c0_i32_2 = arith.constant 0 : i32
    return %c0_i32, %c0_i32_0, %c0_i32_1 : i32, i32, i32
  }
  func.func @transform_2(%arg0: i32) -> (i32, i32, i32) {
    %c0_i32 = arith.constant 0 : i32
    %c0_i32_0 = arith.constant 0 : i32
    %c0_i32_1 = arith.constant 0 : i32
    %c0_i32_2 = arith.constant 0 : i32
    return %c0_i32, %c0_i32_0, %c0_i32_1 : i32, i32, i32
  }
  func.func @transform_4(%arg0: i32) -> (i32, i32, i32) {
    %c0_i32 = arith.constant 0 : i32
    %c0_i32_0 = arith.constant 0 : i32
    %c0_i32_1 = arith.constant 0 : i32
    %c0_i32_2 = arith.constant 0 : i32
    return %c0_i32, %c0_i32_0, %c0_i32_1 : i32, i32, i32
  }
  func.func @transform_5(%arg0: i32) -> (i32, i32) {
    %c0_i32 = arith.constant 0 : i32
    %c0_i32_0 = arith.constant 0 : i32
    %c0_i32_1 = arith.constant 0 : i32
    return %c0_i32, %c0_i32_0 : i32, i32
  }
  func.func @transform_6(%arg0: i32) -> (i32, i32) {
    %c0_i32 = arith.constant 0 : i32
    %c0_i32_0 = arith.constant 0 : i32
    %c0_i32_1 = arith.constant 0 : i32
    return %c0_i32, %c0_i32_0 : i32, i32
  }
  func.func @transform_7(%arg0: i32) -> (i32, i32) {
    %c0_i32 = arith.constant 0 : i32
    %c0_i32_0 = arith.constant 0 : i32
    %c0_i32_1 = arith.constant 0 : i32
    return %c0_i32, %c0_i32_0 : i32, i32
  }
  func.func @transform_8(%arg0: i32) -> (i32, i32) {
    %c0_i32 = arith.constant 0 : i32
    %c0_i32_0 = arith.constant 0 : i32
    %c0_i32_1 = arith.constant 0 : i32
    return %c0_i32, %c0_i32_0 : i32, i32
  }
}

</mosaic_0001>

<bundles_post_ra>
// kernel: tpu_custom_call.1
= control target key start
LH: loop header
LB: loop body
LE: loop exit
PB: predicated region body
PF: predicated region fallthrough
CT: control target
= control target key end

     0   :  { %13 = vsyncpa [#allocation7], 0  ;;  %s5142_s0 = inlined_call_operand.hbm [shape: bf16[64,64], index: 0, kind: input, shape index: {}]   ;;  %s5143_s1 = inlined_call_operand.hbm [shape: bf16[2,64,512], index: 1, kind: input, shape index: {}]   ;;  %s5144_s2 = inlined_call_operand.hbm [shape: f32[2,1,512], index: 2, kind: input, shape index: {}]   ;;  %s5145_s3 = inlined_call_operand.hbm [shape: bf16[2,128,512], index: 3, kind: input, shape index: {}]   ;;  %s5146_s4 = inlined_call_operand.hbm [shape: bf16[2,128,128], index: 4, kind: input, shape index: {}]   ;;  %s5147_s5 = inlined_call_operand.vmem [shape: f32[1,128], index: 5, kind: input, shape index: {}]   ;;  %s5148_s6 = inlined_call_operand.hbm [shape: bf16[128,128], index: 6, kind: input, shape index: {}]   ;;  %s5149_s7 = inlined_call_operand.vmem [shape: f32[1,128], index: 7, kind: input, shape index: {}]   ;;  %s5150_s8 = inlined_call_operand.hbm [shape: f32[8,128], index: 8, kind: output, shape index: {}]  }
   0x1   :  { %14 = vsyncpa [#allocation10], 0 }
   0x2   :  { %15 = vsyncpa [#allocation13], 0 }
   0x3   :  { %16 = vsyncpa [#allocation8], 0  ;;  %s3812_s27 = smov [#allocation9]   ;;  %s3670_s9 = scalar_lea.hbm %s5143_s1, 4096 }
   0x4   :  { %s34_s28 = sshll.u32 %s3812_s27, 4  ;;  %p3671_p0 = scmp.ne.s32.totalorder %s5143_s1, %s3670_s9  ;;  %s35_s28 = int_to_ptr.vmem [resolvable:$true] %s34_s28 }
   0x5   :  { %p3674_p1 = scmp.lt.u32.totalorder %s3670_s9, %s5143_s1 }
   0x7   :  { %p3676_p2 = pnand %p3674_p1, %p3671_p0 }
   0x9   :  { %3679 = shalt.err (!%p3676_p2)
}
   0xa   :  { %s3680_s14 = scalar_lea.vmem %s35_s28, 4096  ;;  %p3685_p4 = scmp.lt.s32.totalorder %s35_s28, %s35_s28 }
   0xb   :  { %p3681_p3 = scmp.ne.s32.totalorder %s35_s28, %s3680_s14  ;;  %p3686_p5 = scmp.lt.s32.totalorder %s3680_s14, %s3680_s14 }
   0xd   :  { %p3687_p6 = por %p3686_p5, %p3685_p4 }
   0xf   :  { %p3688_p7 = pnand %p3687_p6, %p3681_p3 }
  0x11   :  { %3691 = shalt.err (!%p3688_p7)
}
  0x12   :  { %s3813_s15 = smov 256   ;;  %s3814_s16 = smov 16  }
  0x13   :  { %40 = dma.hbm_to_vmem [thread:$0]  %s5143_s1, 4096, %s35_s28, [#allocation10], %s3813_s15, %s3813_s15, %s3814_s16  }
  0x14   :  { %s3815_s19 = smov [#allocation12]   ;;  %s3816_s21 = smov [#allocation6]  }
  0x15   :  { %s58_s20 = sshll.u32 %s3815_s19, 4  ;;  %s22_s22 = sshll.u32 %s3816_s21, 4  ;;  %s59_s20 = int_to_ptr.vmem [resolvable:$true] %s58_s20  ;;  %s23_s22 = int_to_ptr.vmem [resolvable:$true] %s22_s22 }
  0x16   :  { %s3692_s25 = scalar_lea.hbm %s5146_s4, 2048 }
  0x17   :  { %p3693_p8 = scmp.ne.s32.totalorder %s5146_s4, %s3692_s25  ;;  %p3696_p9 = scmp.lt.u32.totalorder %s3692_s25, %s5146_s4 }
  0x19   :  { %p3698_p10 = pnand %p3696_p9, %p3693_p8 }
  0x1b   :  { %3701 = shalt.err (!%p3698_p10)
}
  0x1c   :  { %s3702_s1 = scalar_lea.vmem %s59_s20, 2048  ;;  %p3707_p12 = scmp.lt.s32.totalorder %s59_s20, %s59_s20 }
  0x1d   :  { %p3703_p11 = scmp.ne.s32.totalorder %s59_s20, %s3702_s1  ;;  %p3708_p13 = scmp.lt.s32.totalorder %s3702_s1, %s3702_s1 }
  0x1f   :  { %p3709_p0 = por %p3708_p13, %p3707_p12 }
  0x21   :  { %p3710_p1 = pnand %p3709_p0, %p3703_p11 }
  0x23   :  { %3713 = shalt.err (!%p3710_p1)
}
  0x24   :  { %s3817_s28 = smov 64   ;;  %s3818_s9 = smov 4  }
  0x25   :  { %64 = dma.hbm_to_vmem [thread:$0]  %s5146_s4, 2048, %s59_s20, [#allocation13], %s3817_s28, %s3817_s28, %s3818_s9  }
  0x26   :  { %s3714_s14 = scalar_lea.hbm %s5142_s0, 512 }
  0x27   :  { %p3715_p2 = scmp.ne.s32.totalorder %s5142_s0, %s3714_s14  ;;  %p3718_p3 = scmp.lt.u32.totalorder %s3714_s14, %s5142_s0 }
  0x29   :  { %p3720_p4 = pnand %p3718_p3, %p3715_p2 }
  0x2b   :  { %3723 = shalt.err (!%p3720_p4)
}
  0x2c   :  { %s3724_s21 = scalar_lea.vmem %s23_s22, 512  ;;  %p3729_p6 = scmp.lt.s32.totalorder %s23_s22, %s23_s22 }
  0x2d   :  { %p3725_p5 = scmp.ne.s32.totalorder %s23_s22, %s3724_s21  ;;  %p3730_p7 = scmp.lt.s32.totalorder %s3724_s21, %s3724_s21 }
  0x2f   :  { %p3731_p8 = por %p3730_p7, %p3729_p6 }
  0x31   :  { %p3732_p9 = pnand %p3731_p8, %p3725_p5 }
  0x33   :  { %3735 = shalt.err (!%p3732_p9)
}
  0x34   :  { %28 = dma.hbm_to_vmem [thread:$0]  %s5142_s0, 512, %s23_s22, [#allocation7], %s3817_s28, %s3817_s28, %s3818_s9  }
  0x35   :  { %s3819_s23 = smov [#allocation11]   ;;  %s3820_s25 = smov [#allocation14]  }
  0x36   :  { %s46_s24 = sshll.u32 %s3819_s23, 4  ;;  %s72_s26 = sshll.u32 %s3820_s25, 4  ;;  %s47_s24 = int_to_ptr.vmem [resolvable:$true] %s46_s24  ;;  %s73_s26 = int_to_ptr.vmem [resolvable:$true] %s72_s26 }
  0x37   :  { %s3736_s30 = scalar_lea.hbm %s5144_s2, 128 }
  0x38   :  { %p3737_p10 = scmp.ne.s32.totalorder %s5144_s2, %s3736_s30  ;;  %p3740_p11 = scmp.lt.u32.totalorder %s3736_s30, %s5144_s2 }
  0x3a   :  { %p3742_p12 = pnand %p3740_p11, %p3737_p10 }
  0x3c   :  { %3745 = shalt.err (!%p3742_p12)
}
  0x3d   :  { %s3746_s0 = scalar_lea.vmem %s47_s24, 128  ;;  %p3751_p0 = scmp.lt.s32.totalorder %s47_s24, %s47_s24 }
  0x3e   :  { %p3747_p13 = scmp.ne.s32.totalorder %s47_s24, %s3746_s0  ;;  %p3752_p1 = scmp.lt.s32.totalorder %s3746_s0, %s3746_s0 }
  0x40   :  { %p3753_p2 = por %p3752_p1, %p3751_p0 }
  0x42   :  { %p3754_p3 = pnand %p3753_p2, %p3747_p13 }
  0x44   :  { %3757 = shalt.err (!%p3754_p3)
}
  0x45   :  { %52 = dma.hbm_to_vmem [thread:$0]  %s5144_s2, 128, %s47_s24, [#allocation10], %s3817_s28, %s3817_s28, %s3818_s9  }
  0x46   :  { %s3758_s17 = scalar_lea.hbm %s5148_s6, 1024 }
  0x47   :  { %p3759_p4 = scmp.ne.s32.totalorder %s5148_s6, %s3758_s17  ;;  %p3762_p5 = scmp.lt.u32.totalorder %s3758_s17, %s5148_s6 }
  0x49   :  { %p3764_p6 = pnand %p3762_p5, %p3759_p4 }
  0x4b   :  { %3767 = shalt.err (!%p3764_p6)
}
  0x4c   :  { %s3768_s20 = scalar_lea.vmem %s73_s26, 1024  ;;  %p3773_p8 = scmp.lt.s32.totalorder %s73_s26, %s73_s26 }
  0x4d   :  { %p3769_p7 = scmp.ne.s32.totalorder %s73_s26, %s3768_s20  ;;  %p3774_p9 = scmp.lt.s32.totalorder %s3768_s20, %s3768_s20 }
  0x4f   :  { %p3775_p10 = por %p3774_p9, %p3773_p8 }
  0x51   :  { %p3776_p11 = pnand %p3775_p10, %p3769_p7 }
  0x53   :  { %3779 = shalt.err (!%p3776_p11)
}
  0x54   :  { %78 = dma.hbm_to_vmem [thread:$0]  %s5148_s6, 1024, %s73_s26, [#allocation13], %s3817_s28, %s3817_s28, %s3818_s9  }
  0x55   :  { %3802 = dma.done.wait [#allocation7], 512  }
  0x56   :  { %3803 = vsyncadd [#allocation7], 4294966784 }
  0x57   :  { %3804 = dma.done.wait [#allocation10], 4224  }
  0x58   :  { %3805 = vsyncadd [#allocation10], 4294963072 }
  0x59   :  { %3806 = dma.done.wait [#allocation13], 3072  }
  0x5a   :  { %3807 = vsyncadd [#allocation13], 4294964224  ;;  %s101_s24 = sld [smem:[#allocation0]]   ;;  %s3821_s25 = smov 512   ;;  %v5151_v0 = vmov 0   ;;  %vm278_vm0 = vcmask 523264   ;;  %v158_v37 = vlaneseq }
  0x5b   :  { %113 = sst [smem:[#allocation17]] %s3821_s25  ;;  %343 = vmatprep.mubr.bf16.mxu1 %v5151_v0  ;;  %323 = vmatprep.mubr.bf16.mxu0 %v5151_v0  ;;  %s3823_s6 = smov [#allocation4]  }
  0x5c   :  { %115 = sst [smem:[#allocation17 + $0x1]] %s3821_s25  ;;  %s109_s26 = sshll.u32 %s3823_s6, 4  ;;  %v4002_v38 = vshrl.u32 %v158_v37, 7  ;;  %s110_s26 = int_to_ptr.vmem [resolvable:$true] %s109_s26 }
  0x5d   :  { %117 = sst [smem:[#allocation17 + $0x2]] %s3818_s9  ;;  %s3824_s27 = smov 128  }
  0x5e   :  { %119 = sst [smem:[#allocation17 + $0x3]] %s3817_s28  ;;  %s3825_s29 = smov 2   ;;  %v160_v39 = vsub.s32 0, %v4002_v38  ;;  %v164_v41 = vsub.s32 1, %v4002_v38 }
  0x5f   :  { %121 = sst [smem:[#allocation17 + $0x4]] %s3824_s27  ;;  %s3826_s10 = smov [#allocation5]  }
  0x60   :  { %123 = sst [smem:[#allocation17 + $0x5]] %s3825_s29  ;;  %s3031_s30 = sshll.u32 %s101_s24, 26 }
  0x61   :  { %125 = sst [smem:[#allocation17 + $0x6]] %s3813_s15  ;;  %s3032_s1 = sadd.s32 134217728, %s3031_s30 }
  0x62   :  { %127 = sst [smem:[#allocation17 + $0x7]] %s3817_s28  ;;  %s3827_s11 = smov [#allocation16]  }
  0x63   :  { %129 = sst [smem:[#allocation17 + $0x8]] %s3818_s9 }
  0x64   :  { %131 = dma.general %s5145_s3, 8192, %s110_s26, %s3826_s10, %s3827_s11, [#allocation17], %s3032_s1, 0  }
  0x65   :  { %v3274_v1 = vld [vmem:[#allocation9 + $0x4] ss:$16 sps:$4 sm:$0xff]   ;;  %v3276_v2 = vld [vmem:[#allocation9] ss:$16 sps:$4 sm:$0xff]   ;;  %v3289_v9 = vld [vmem:[#allocation9 + $0xc] ss:$16 sps:$4 sm:$0xff]  }
  0x66   :  { %3247 = vmatprep.subr.bf16.mxu1 %v3274_v1  ;;  %v3277_v3 = vld [vmem:[#allocation9 + $0x24] ss:$16 sps:$4 sm:$0xff]   ;;  %291 = vmatprep.subr.bf16.mxu0 %v3274_v1  ;;  %v3279_v4 = vld [vmem:[#allocation9 + $0x20] ss:$16 sps:$4 sm:$0xff]   ;;  %v3287_v11 = vld [vmem:[#allocation9 + $0x8] ss:$16 sps:$4 sm:$0xff]  }
  0x67   :  { %3251 = vmatpush1.bf16.msra.mxu1 %v3276_v2  ;;  %292 = vmatpush1.bf16.msra.mxu0 %v3276_v2  ;;  %v3280_v5 = vld [vmem:[#allocation9 + $0x44] ss:$16 sps:$4 sm:$0xff]   ;;  %v3282_v6 = vld [vmem:[#allocation9 + $0x40] ss:$16 sps:$4 sm:$0xff]   ;;  %v3292_v12 = vld [vmem:[#allocation9 + $0x2c] ss:$16 sps:$4 sm:$0xff]  }
  0x68   :  { %3248 = vmatprep.subr.bf16.mxu1 %v3277_v3  ;;  %293 = vmatprep.subr.bf16.mxu0 %v3277_v3  ;;  %v3283_v7 = vld [vmem:[#allocation9 + $0x64] ss:$16 sps:$4 sm:$0xff]   ;;  %v3285_v8 = vld [vmem:[#allocation9 + $0x60] ss:$16 sps:$4 sm:$0xff]   ;;  %v3290_v16 = vld [vmem:[#allocation9 + $0x28] ss:$16 sps:$4 sm:$0xff]  }
  0x69   :  { %v3960_v10 = vld [vmem:[#allocation6 + $0x10] sm:$0xff]   ;;  %v3962_v13 = vld [vmem:[#allocation6] sm:$0xff]   ;;  %v3296_v17 = vld [vmem:[#allocation9 + $0x4c] ss:$16 sps:$4 sm:$0xff]   ;;  %v168_v1 = vsub.s32 2, %v4002_v38 }
  0x6a   :  { %v3308_v14 = vld [vmem:[#allocation9 + $0x80] ss:$16 sps:$4 sm:$0xff]   ;;  %v3310_v15 = vld [vmem:[#allocation9 + $0x84] ss:$16 sps:$4 sm:$0xff]   ;;  %v3293_v20 = vld [vmem:[#allocation6 + $0x18] sm:$0xff]  }
  0x6b   :  { %3252 = vmatpush1.bf16.msra.mxu1 %v3279_v4  ;;  %294 = vmatpush1.bf16.msra.mxu0 %v3279_v4  ;;  %v3314_v18 = vld [vmem:[#allocation9 + $0xa0] ss:$16 sps:$4 sm:$0xff]   ;;  %v3316_v19 = vld [vmem:[#allocation9 + $0xa4] ss:$16 sps:$4 sm:$0xff]   ;;  %v3294_v21 = vld [vmem:[#allocation9 + $0x48] ss:$16 sps:$4 sm:$0xff]  }
  0x6c   :  { %3249 = vmatprep.subr.bf16.mxu1 %v3280_v5  ;;  %295 = vmatprep.subr.bf16.mxu0 %v3280_v5  ;;  %v3299_v22 = vld [vmem:[#allocation9 + $0x6c] ss:$16 sps:$4 sm:$0xff]   ;;  %v3319_v24 = vld [vmem:[#allocation9 + $0xc4] ss:$16 sps:$4 sm:$0xff]   ;;  %v3317_v25 = vld [vmem:[#allocation9 + $0xc0] ss:$16 sps:$4 sm:$0xff]  }
  0x6d   :  { %v3304_v23 = vld [vmem:[#allocation6 + $0x8] sm:$0xff]   ;;  %v3325_v26 = vld [vmem:[#allocation9 + $0xe4] ss:$16 sps:$4 sm:$0xff]   ;;  %v3323_v29 = vld [vmem:[#allocation9 + $0xe0] ss:$16 sps:$4 sm:$0xff]  }
  0x6e   :  { %v3297_v27 = vld [vmem:[#allocation9 + $0x68] ss:$16 sps:$4 sm:$0xff]   ;;  %v3303_v28 = vld [vmem:[#allocation9 + $0x8c] ss:$16 sps:$4 sm:$0xff]   ;;  %v156_v40 = vld [vmem:[#allocation11] sm:$0xf] }
  0x6f   :  { %3253 = vmatpush1.bf16.msra.mxu1 %v3282_v6  ;;  %296 = vmatpush1.bf16.msra.mxu0 %v3282_v6  ;;  %v3301_v30 = vld [vmem:[#allocation9 + $0x88] ss:$16 sps:$4 sm:$0xff]   ;;  %v3307_v31 = vld [vmem:[#allocation9 + $0xac] ss:$16 sps:$4 sm:$0xff]   ;;  %v161_v42 = vrot.slane %v156_v40, %v160_v39  ;;  %v165_v43 = vrot.slane %v156_v40, %v164_v41  ;;  %v172_v6 = vsub.s32 3, %v4002_v38 }
  0x70   :  { %3250 = vmatprep.subr.bf16.mxu1 %v3283_v7  ;;  %297 = vmatprep.subr.bf16.mxu0 %v3283_v7  ;;  %v3305_v32 = vld [vmem:[#allocation9 + $0xa8] ss:$16 sps:$4 sm:$0xff]   ;;  %v3313_v33 = vld [vmem:[#allocation9 + $0xcc] ss:$16 sps:$4 sm:$0xff]  }
  0x71   :  { %v3311_v34 = vld [vmem:[#allocation9 + $0xc8] ss:$16 sps:$4 sm:$0xff]   ;;  %v3322_v35 = vld [vmem:[#allocation9 + $0xec] ss:$16 sps:$4 sm:$0xff]  }
  0x72   :  { %v3320_v36 = vld [vmem:[#allocation9 + $0xe8] ss:$16 sps:$4 sm:$0xff]  }
  0x73   :  { %3254 = vmatpush1.bf16.msra.mxu1 %v3285_v8  ;;  %298 = vmatpush1.bf16.msra.mxu0 %v3285_v8 }
  0x74   :  { %364 = vmatprep.subr.bf16.mxu1 %v3289_v9  ;;  %589 = vmatprep.subr.bf16.mxu0 %v3310_v15  ;;  %v4040_v15 = vld [vmem:[#allocation11 + $0x4] sm:$0xf] }
  0x76   :  { %3055 = vmatmul.mubr.msk.bf16.vlgmr.msra.gmra.mrb[0].mxu1 %vm278_vm0, %v3960_v10  ;;  %3053 = vmatmul.mubr.msk.bf16.vlgmr.msra.gmra.mrb[0].mxu0 %vm278_vm0, %v3962_v13 }
  0x77   :  { %365 = vmatpush1.bf16.msra.mxu1 %v3287_v11  ;;  %353 = vmatprep.mubr.bf16.mxu1 %v5151_v0 }
  0x78   :  { %366 = vmatprep.subr.bf16.mxu1 %v3292_v12  ;;  %590 = vmatpush1.bf16.msra.mxu0 %v3308_v14 }
  0x79   :  { %333 = vmatprep.mubr.bf16.mxu0 %v5151_v0  ;;  %591 = vmatprep.subr.bf16.mxu0 %v3316_v19 }
  0x7b   :  { %367 = vmatpush1.bf16.msra.mxu1 %v3290_v16  ;;  %v169_v16 = vrot.slane %v156_v40, %v168_v1 }
  0x7c   :  { %368 = vmatprep.subr.bf16.mxu1 %v3296_v17  ;;  %592 = vmatpush1.bf16.msra.mxu0 %v3314_v18  ;;  %v173_v17 = vrot.slane %v156_v40, %v172_v6  ;;  %v4047_v18 = vrot.slane %v4040_v15, %v160_v39 }
  0x7d   :  { %593 = vmatprep.subr.bf16.mxu0 %v3319_v24 }
  0x7e   :  { %3056 = vmatmul.mubr.msk.bf16.gmra.mrb[4].mxu1 %vm278_vm0, %v3293_v20  ;;  %3054 = vmatmul.mubr.msk.bf16.gmra.mrb[4].mxu0 %vm278_vm0, %v3304_v23 }
  0x7f   :  { %369 = vmatpush1.bf16.msra.mxu1 %v3294_v21  ;;  %396 = vmatprep.mubr.bf16.mxu1 %v5151_v0 }
  0x80   :  { %370 = vmatprep.subr.bf16.mxu1 %v3299_v22  ;;  %594 = vmatpush1.bf16.msra.mxu0 %v3317_v25 }
  0x81   :  { %621 = vmatprep.mubr.bf16.mxu0 %v5151_v0  ;;  %595 = vmatprep.subr.bf16.mxu0 %v3325_v26 }
  0x83   :  { %371 = vmatpush1.bf16.msra.mxu1 %v3297_v27 }
  0x84   :  { %662 = vmatprep.subr.bf16.mxu1 %v3303_v28  ;;  %596 = vmatpush1.bf16.msra.mxu0 %v3323_v29 }
  0x86   :  { %3057 = vmatmul.mubr.msk.bf16.vlgmr.msra.gmra.mrb[8].mxu1 %vm278_vm0, %v3962_v13 }
  0x87   :  { %663 = vmatpush1.bf16.msra.mxu1 %v3301_v30  ;;  %406 = vmatprep.mubr.bf16.mxu1 %v5151_v0 }
  0x88   :  { %664 = vmatprep.subr.bf16.mxu1 %v3307_v31  ;;  %3077 = vmatmul.mubr.msk.bf16.vlgmr.msra.gmra.mrb[8].mxu0 %vm278_vm0, %v3962_v13 }
  0x89   :  { %631 = vmatprep.mubr.bf16.mxu0 %v5151_v0 }
  0x8b   :  { %665 = vmatpush1.bf16.msra.mxu1 %v3305_v32 }
  0x8c   :  { %666 = vmatprep.subr.bf16.mxu1 %v3313_v33 }
  0x8e   :  { %3058 = vmatmul.mubr.msk.bf16.gmra.mrb[12].mxu1 %vm278_vm0, %v3304_v23 }
  0x8f   :  { %416 = vmatprep.mubr.bf16.mxu1 %v5151_v0  ;;  %667 = vmatpush1.bf16.msra.mxu1 %v3311_v34 }
  0x90   :  { %668 = vmatprep.subr.bf16.mxu1 %v3322_v35  ;;  %3078 = vmatmul.mubr.msk.bf16.gmra.mrb[12].mxu0 %vm278_vm0, %v3304_v23 }
  0x91   :  { %641 = vmatprep.mubr.bf16.mxu0 %v5151_v0 }
  0x93   :  { %669 = vmatpush1.bf16.msra.mxu1 %v3320_v36 }
  0x96   :  { %3059 = vmatmul.mubr.msk.bf16.gmra.mrb[16].mxu1 %vm278_vm0, %v3960_v10 }
  0x97   :  { %426 = vmatprep.mubr.bf16.mxu1 %v5151_v0 }
  0x98   :  { %3079 = vmatmul.mubr.msk.bf16.gmra.mrb[16].mxu0 %vm278_vm0, %v3960_v10 }
  0x99   :  { %651 = vmatprep.mubr.bf16.mxu0 %v5151_v0 }
  0x9e   :  { %3060 = vmatmul.mubr.msk.bf16.gmra.mrb[20].mxu1 %vm278_vm0, %v3293_v20 }
  0x9f   :  { %694 = vmatprep.mubr.bf16.mxu1 %v5151_v0 }
  0xa0   :  { %3080 = vmatmul.mubr.msk.bf16.gmra.mrb[20].mxu0 %vm278_vm0, %v3293_v20 }
  0xa6   :  { %3081 = vmatmul.mubr.msk.bf16.vlgmr.msra.gmra.mrb[24].mxu1 %vm278_vm0, %v3962_v13 }
  0xa7   :  { %704 = vmatprep.mubr.bf16.mxu1 %v5151_v0 }
  0xae   :  { %3082 = vmatmul.mubr.msk.bf16.gmra.mrb[28].mxu1 %vm278_vm0, %v3304_v23 }
  0xaf   :  { %714 = vmatprep.mubr.bf16.mxu1 %v5151_v0 }
  0xb6   :  { %3083 = vmatmul.mubr.msk.bf16.gmra.mrb[32].mxu1 %vm278_vm0, %v3960_v10 }
  0xb7   :  { %724 = vmatprep.mubr.bf16.mxu1 %v5151_v0 }
  0xbe   :  { %3084 = vmatmul.mubr.msk.bf16.gmra.mrb[36].mxu1 %vm278_vm0, %v3293_v20  ;;  %v4050_v20 = vrot.slane %v4040_v15, %v164_v41 }
 0x149   :  { %v345_v44 = vpop.f32.mrb[0].mxu1  ;;  %v325_v45 = vpop.f32.mrb[0].mxu0 }
 0x14a   :  { %v4006_v46 = vadd.f32 %v345_v44, %v161_v42  ;;  %v347_v47 = vpop.f32.mrb[1].mxu1  ;;  %v4008_v48 = vadd.f32 %v325_v45, %v161_v42  ;;  %v327_v49 = vpop.f32.mrb[1].mxu0 }
 0x14b   :  { %v4010_v50 = vadd.f32 %v347_v47, %v165_v43  ;;  %v349_v51 = vpop.f32.mrb[2].mxu1  ;;  %v4012_v52 = vadd.f32 %v327_v49, %v165_v43  ;;  %v329_v53 = vpop.f32.mrb[2].mxu0 }
 0x14c   :  { %5266 = vst [vmem:[#allocation23_spill] sm:$0xff] %v4006_v46  ;;  %v4014_v54 = vadd.f32 %v349_v51, %v161_v42  ;;  %v351_v55 = vpop.f32.mrb[3].mxu1  ;;  %v4016_v56 = vadd.f32 %v329_v53, %v161_v42  ;;  %v331_v57 = vpop.f32.mrb[3].mxu0 }
 0x14d   :  { %5267 = vst [vmem:[#allocation24_spill] sm:$0xff] %v4010_v50  ;;  %v4018_v58 = vadd.f32 %v351_v55, %v165_v43  ;;  %v4020_v59 = vadd.f32 %v331_v57, %v165_v43 }
 0x14e   :  { %5268 = vst [vmem:[#allocation25_spill] sm:$0xff] %v4014_v54  ;;  %5269 = vst [vmem:[#allocation26_spill] sm:$0xff] %v4016_v56 }
 0x14f   :  { %5270 = vst [vmem:[#allocation27_spill] sm:$0xff] %v4018_v58  ;;  %5271 = vst [vmem:[#allocation28_spill] sm:$0xff] %v4020_v59 }
 0x151   :  { %v355_v60 = vpop.f32.mrb[4].mxu1  ;;  %v335_v61 = vpop.f32.mrb[4].mxu0 }
 0x152   :  { %v4022_v62 = vadd.f32 %v355_v60, %v161_v42  ;;  %v357_v63 = vpop.f32.mrb[5].mxu1  ;;  %v4025_v2 = vadd.f32 %v335_v61, %v161_v42  ;;  %v337_v3 = vpop.f32.mrb[5].mxu0 }
 0x153   :  { %v4027_v4 = vadd.f32 %v357_v63, %v165_v43  ;;  %v359_v5 = vpop.f32.mrb[6].mxu1  ;;  %v4030_v7 = vadd.f32 %v337_v3, %v165_v43  ;;  %v339_v8 = vpop.f32.mrb[6].mxu0 }
 0x154   :  { %5272 = vst [vmem:[#allocation29_spill] sm:$0xff] %v4022_v62  ;;  %5273 = vst [vmem:[#allocation30_spill] sm:$0xff] %v4025_v2  ;;  %v4032_v9 = vadd.f32 %v359_v5, %v161_v42  ;;  %v361_v10 = vpop.f32.mrb[7].mxu1  ;;  %v4034_v11 = vadd.f32 %v339_v8, %v161_v42  ;;  %v341_v12 = vpop.f32.mrb[7].mxu0 }
 0x155   :  { %5274 = vst [vmem:[#allocation31_spill] sm:$0xff] %v4027_v4  ;;  %5275 = vst [vmem:[#allocation32_spill] sm:$0xff] %v4030_v7  ;;  %v4036_v13 = vadd.f32 %v361_v10, %v165_v43  ;;  %v4038_v14 = vadd.f32 %v341_v12, %v165_v43 }
 0x156   :  { %5276 = vst [vmem:[#allocation33_spill] sm:$0xff] %v4032_v9  ;;  %5277 = vst [vmem:[#allocation34_spill] sm:$0xff] %v4034_v11 }
 0x157   :  { %5278 = vst [vmem:[#allocation35_spill] sm:$0xff] %v4036_v13  ;;  %5279 = vst [vmem:[#allocation36_spill] sm:$0xff] %v4038_v14 }
 0x159   :  { %v398_v19 = vpop.f32.mrb[8].mxu1 }
 0x15a   :  { %v4052_v21 = vadd.f32 %v398_v19, %v169_v16  ;;  %v400_v22 = vpop.f32.mrb[9].mxu1 }
 0x15b   :  { %v4054_v23 = vadd.f32 %v400_v22, %v173_v17  ;;  %v402_v24 = vpop.f32.mrb[10].mxu1  ;;  %v623_v25 = vpop.f32.mrb[8].mxu0 }
 0x15c   :  { %v4056_v26 = vadd.f32 %v402_v24, %v169_v16  ;;  %v404_v27 = vpop.f32.mrb[11].mxu1  ;;  %v4059_v28 = vadd.f32 %v623_v25, %v4047_v18  ;;  %v625_v29 = vpop.f32.mrb[9].mxu0 }
 0x15d   :  { %v4061_v30 = vadd.f32 %v404_v27, %v173_v17  ;;  %v4064_v31 = vadd.f32 %v625_v29, %v4050_v20  ;;  %v627_v32 = vpop.f32.mrb[10].mxu0 }
 0x15e   :  { %5280 = vst [vmem:[#allocation37_spill] sm:$0xff] %v4056_v26  ;;  %5281 = vst [vmem:[#allocation38_spill] sm:$0xff] %v4059_v28  ;;  %v4067_v33 = vadd.f32 %v627_v32, %v4047_v18  ;;  %v629_v34 = vpop.f32.mrb[11].mxu0 }
 0x15f   :  { %5282 = vst [vmem:[#allocation39_spill] sm:$0xff] %v4061_v30  ;;  %5283 = vst [vmem:[#allocation40_spill] sm:$0xff] %v4064_v31  ;;  %v4070_v35 = vadd.f32 %v629_v34, %v4050_v20 }
 0x160   :  { %5284 = vst [vmem:[#allocation41_spill] sm:$0xff] %v4067_v33 }
 0x161   :  { %5285 = vst [vmem:[#allocation42_spill] sm:$0xff] %v4070_v35  ;;  %v408_v36 = vpop.f32.mrb[12].mxu1 }
 0x162   :  { %v4072_v37 = vadd.f32 %v408_v36, %v169_v16  ;;  %v410_v39 = vpop.f32.mrb[13].mxu1 }
 0x163   :  { %v4074_v40 = vadd.f32 %v410_v39, %v173_v17  ;;  %v412_v41 = vpop.f32.mrb[14].mxu1  ;;  %v633_v42 = vpop.f32.mrb[12].mxu0 }
 0x164   :  { %5286 = vst [vmem:[#allocation43_spill] sm:$0xff] %v4072_v37  ;;  %v4076_v43 = vadd.f32 %v412_v41, %v169_v16  ;;  %v414_v44 = vpop.f32.mrb[15].mxu1  ;;  %v4079_v45 = vadd.f32 %v633_v42, %v4047_v18  ;;  %v635_v47 = vpop.f32.mrb[13].mxu0 }
 0x165   :  { %5287 = vst [vmem:[#allocation44_spill] sm:$0xff] %v4074_v40  ;;  %v4081_v49 = vadd.f32 %v414_v44, %v173_v17  ;;  %v4084_v51 = vadd.f32 %v635_v47, %v4050_v20  ;;  %v637_v53 = vpop.f32.mrb[14].mxu0 }
 0x166   :  { %5288 = vst [vmem:[#allocation45_spill] sm:$0xff] %v4076_v43  ;;  %5289 = vst [vmem:[#allocation46_spill] sm:$0xff] %v4079_v45  ;;  %v4087_v55 = vadd.f32 %v637_v53, %v4047_v18  ;;  %v639_v57 = vpop.f32.mrb[15].mxu0 }
 0x167   :  { %5290 = vst [vmem:[#allocation47_spill] sm:$0xff] %v4081_v49  ;;  %5291 = vst [vmem:[#allocation48_spill] sm:$0xff] %v4084_v51  ;;  %v4090_v60 = vadd.f32 %v639_v57, %v4050_v20 }
 0x168   :  { %5292 = vst [vmem:[#allocation49_spill] sm:$0xff] %v4087_v55 }
 0x169   :  { %5293 = vst [vmem:[#allocation50_spill] sm:$0xff] %v4090_v60  ;;  %v418_v61 = vpop.f32.mrb[16].mxu1 }
 0x16a   :  { %v4092_v63 = vadd.f32 %v418_v61, %v169_v16  ;;  %v420_v3 = vpop.f32.mrb[17].mxu1 }
 0x16b   :  { %v4094_v5 = vadd.f32 %v420_v3, %v173_v17  ;;  %v422_v8 = vpop.f32.mrb[18].mxu1  ;;  %v643_v10 = vpop.f32.mrb[16].mxu0 }
 0x16c   :  { %5294 = vst [vmem:[#allocation51_spill] sm:$0xff] %v4092_v63  ;;  %v4096_v12 = vadd.f32 %v422_v8, %v169_v16  ;;  %v424_v19 = vpop.f32.mrb[19].mxu1  ;;  %v4099_v22 = vadd.f32 %v643_v10, %v4047_v18  ;;  %v645_v24 = vpop.f32.mrb[17].mxu0 }
 0x16d   :  { %5295 = vst [vmem:[#allocation52_spill] sm:$0xff] %v4094_v5  ;;  %v4101_v25 = vadd.f32 %v424_v19, %v173_v17  ;;  %v4104_v27 = vadd.f32 %v645_v24, %v4050_v20  ;;  %v647_v29 = vpop.f32.mrb[18].mxu0 }
 0x16e   :  { %5296 = vst [vmem:[#allocation53_spill] sm:$0xff] %v4096_v12  ;;  %5297 = vst [vmem:[#allocation54_spill] sm:$0xff] %v4099_v22  ;;  %v4107_v32 = vadd.f32 %v647_v29, %v4047_v18  ;;  %v649_v34 = vpop.f32.mrb[19].mxu0  ;;  %v500_v29 = vrot.slane %v4040_v15, %v168_v1 }
 0x16f   :  { %5298 = vst [vmem:[#allocation55_spill] sm:$0xff] %v4101_v25  ;;  %5299 = vst [vmem:[#allocation56_spill] sm:$0xff] %v4104_v27  ;;  %v4110_v36 = vadd.f32 %v649_v34, %v4050_v20 }
 0x170   :  { %5300 = vst [vmem:[#allocation57_spill] sm:$0xff] %v4107_v32 }
 0x171   :  { %5301 = vst [vmem:[#allocation58_spill] sm:$0xff] %v4110_v36  ;;  %v428_v39 = vpop.f32.mrb[20].mxu1 }
 0x172   :  { %v4112_v41 = vadd.f32 %v428_v39, %v169_v16  ;;  %v430_v42 = vpop.f32.mrb[21].mxu1  ;;  %v504_v39 = vrot.slane %v4040_v15, %v172_v6 }
 0x173   :  { %v4114_v44 = vadd.f32 %v430_v42, %v173_v17  ;;  %v432_v47 = vpop.f32.mrb[22].mxu1  ;;  %v653_v53 = vpop.f32.mrb[20].mxu0 }
 0x174   :  { %5302 = vst [vmem:[#allocation59_spill] sm:$0xff] %v4112_v41  ;;  %v4116_v57 = vadd.f32 %v432_v47, %v169_v16  ;;  %v434_v61 = vpop.f32.mrb[23].mxu1  ;;  %v4119_v3 = vadd.f32 %v653_v53, %v4047_v18  ;;  %v655_v8 = vpop.f32.mrb[21].mxu0 }
 0x175   :  { %5303 = vst [vmem:[#allocation60_spill] sm:$0xff] %v4114_v44  ;;  %v4121_v10 = vadd.f32 %v434_v61, %v173_v17  ;;  %v4124_v19 = vadd.f32 %v655_v8, %v4050_v20  ;;  %v657_v24 = vpop.f32.mrb[22].mxu0 }
 0x176   :  { %5304 = vst [vmem:[#allocation61_spill] sm:$0xff] %v4116_v57  ;;  %5305 = vst [vmem:[#allocation62_spill] sm:$0xff] %v4119_v3  ;;  %v4130_v34 = vadd.f32 %v657_v24, %v4047_v18  ;;  %v659_v16 = vpop.f32.mrb[23].mxu0 }
 0x177   :  { %5306 = vst [vmem:[#allocation63_spill] sm:$0xff] %v4121_v10  ;;  %5307 = vst [vmem:[#allocation64_spill] sm:$0xff] %v4124_v19  ;;  %v4136_v42 = vadd.f32 %v659_v16, %v4050_v20 }
 0x179   :  { %v696_v17 = vpop.f32.mrb[24].mxu1 }
 0x17a   :  { %v4138_v47 = vadd.f32 %v696_v17, %v500_v29  ;;  %v698_v53 = vpop.f32.mrb[25].mxu1 }
 0x17b   :  { %v4140_v61 = vadd.f32 %v698_v53, %v504_v39  ;;  %v700_v8 = vpop.f32.mrb[26].mxu1 }
 0x17c   :  { %5308 = vst [vmem:[#allocation65_spill] sm:$0xff] %v4138_v47  ;;  %v4142_v0 = vadd.f32 %v700_v8, %v500_v29  ;;  %v702_v1 = vpop.f32.mrb[27].mxu1 }
 0x17d   :  { %5309 = vst [vmem:[#allocation66_spill] sm:$0xff] %v4140_v61  ;;  %v4144_v18 = vadd.f32 %v702_v1, %v504_v39 }
 0x17e   :  { %5310 = vst [vmem:[#allocation67_spill] sm:$0xff] %v4142_v0 }
 0x17f   :  { %5311 = vst [vmem:[#allocation68_spill] sm:$0xff] %v4144_v18 }
 0x181   :  { %v706_v24 = vpop.f32.mrb[28].mxu1 }
 0x182   :  { %v4146_v31 = vadd.f32 %v706_v24, %v500_v29  ;;  %v708_v38 = vpop.f32.mrb[29].mxu1 }
 0x183   :  { %v4148_v6 = vadd.f32 %v708_v38, %v504_v39  ;;  %v710_v15 = vpop.f32.mrb[30].mxu1 }
 0x184   :  { %5312 = vst [vmem:[#allocation69_spill] sm:$0xff] %v4146_v31  ;;  %v4150_v20 = vadd.f32 %v710_v15, %v500_v29  ;;  %v712_v16 = vpop.f32.mrb[31].mxu1 }
 0x185   :  { %5313 = vst [vmem:[#allocation70_spill] sm:$0xff] %v4148_v6  ;;  %v4152_v17 = vadd.f32 %v712_v16, %v504_v39 }
 0x186   :  { %5314 = vst [vmem:[#allocation71_spill] sm:$0xff] %v4150_v20 }
 0x187   :  { %5315 = vst [vmem:[#allocation72_spill] sm:$0xff] %v4152_v17 }
 0x189   :  { %v716_v53 = vpop.f32.mrb[32].mxu1 }
 0x18a   :  { %v4154_v47 = vadd.f32 %v716_v53, %v500_v29  ;;  %v718_v8 = vpop.f32.mrb[33].mxu1 }
 0x18b   :  { %v4156_v61 = vadd.f32 %v718_v8, %v504_v39  ;;  %v720_v1 = vpop.f32.mrb[34].mxu1 }
 0x18c   :  { %5316 = vst [vmem:[#allocation73_spill] sm:$0xff] %v4154_v47  ;;  %v4158_v28 = vadd.f32 %v720_v1, %v500_v29  ;;  %v722_v24 = vpop.f32.mrb[35].mxu1 }
 0x18d   :  { %5317 = vst [vmem:[#allocation74_spill] sm:$0xff] %v4156_v61  ;;  %v4160_v57 = vadd.f32 %v722_v24, %v504_v39 }
 0x18e   :  { %5318 = vst [vmem:[#allocation75_spill] sm:$0xff] %v4158_v28 }
 0x18f   :  { %5319 = vst [vmem:[#allocation76_spill] sm:$0xff] %v4160_v57 }
 0x191   :  { %v726_v38 = vpop.f32.mrb[36].mxu1 }
 0x192   :  { %v4162_v10 = vadd.f32 %v726_v38, %v500_v29  ;;  %v728_v15 = vpop.f32.mrb[37].mxu1 }
 0x193   :  { %v4164_v13 = vadd.f32 %v728_v15, %v504_v39  ;;  %v730_v16 = vpop.f32.mrb[38].mxu1 }
 0x194   :  { %5320 = vst [vmem:[#allocation77_spill] sm:$0xff] %v4162_v10  ;;  %v4166_v9 = vadd.f32 %v730_v16, %v500_v29  ;;  %v732_v53 = vpop.f32.mrb[39].mxu1 }
 0x195   :  { %5321 = vst [vmem:[#allocation78_spill] sm:$0xff] %v4164_v13  ;;  %v4168_v0 = vadd.f32 %v732_v53, %v504_v39 }
 0x196   :  { %3808 = dma.done.wait [#allocation5], 8192 }
 0x197   :  { %3809 = vsyncadd [#allocation5], 4294959104  ;;  %v5322_v8 = vmov 0   ;;  %v4172_v1 = vld [vmem:[#allocation4 + $0x8] sm:$0xff]  ;;  %v4174_v24 = vld [vmem:[#allocation4] sm:$0xff]  ;;  %vm3829_vm1 = vmmov 0  }
 0x198   :  { %873 = vmatprep.mubr.bf16.mxu0 %v5322_v8  ;;  %914 = vmatprep.mubr.bf16.mxu1 %v5322_v8  ;;  %v4176_v38 = vld [vmem:[#allocation4 + $0x28] sm:$0xff]  ;;  %v4180_v29 = vld [vmem:[#allocation4 + $0x18] sm:$0xff]  ;;  %v4183_v39 = vld [vmem:[#allocation4 + $0x20] sm:$0xff]  ;;  %s3830_s22 = smov [#allocation15]  }
 0x199   :  { %841 = vmatprep.subr.bf16.mxu0 %v4172_v1  ;;  %882 = vmatprep.subr.bf16.mxu1 %v4180_v29  ;;  %v4186_v15 = vld [vmem:[#allocation4 + $0x10] sm:$0xff]  ;;  %v4188_v16 = vld [vmem:[#allocation4 + $0x38] sm:$0xff]  ;;  %v4190_v53 = vld [vmem:[#allocation4 + $0x48] sm:$0xff]  ;;  %s3014_s13 = sshll.u32 %s3830_s22, 4  ;;  %s3015_s13 = int_to_ptr.vmem [resolvable:$true] %s3014_s13 }
 0x19a   :  { %842 = vmatpush1.bf16.msra.mxu0 %v4174_v24  ;;  %883 = vmatpush1.bf16.msra.mxu1 %v4186_v15  ;;  %v4194_v18 = vld [vmem:[#allocation4 + $0x30] sm:$0xff]  ;;  %v4197_v35 = vld [vmem:[#allocation4 + $0x58] sm:$0xff]  ;;  %v4200_v33 = vld [vmem:[#allocation4 + $0x40] sm:$0xff]  ;;  %p3785_p13 = scmp.lt.s32.totalorder %s3015_s13, %s3015_s13 }
 0x19b   :  { %843 = vmatprep.subr.bf16.mxu0 %v4176_v38  ;;  %884 = vmatprep.subr.bf16.mxu1 %v4188_v16  ;;  %5323 = vst [vmem:[#allocation79_spill] sm:$0xff] %v4200_v33  ;;  %v4202_v41 = vld [vmem:[#allocation4 + $0x68] sm:$0xff]  ;;  %v4206_v44 = vld [vmem:[#allocation4 + $0x50] sm:$0xff]  ;;  %v4209_v4 = vld [vmem:[#allocation4 + $0x78] sm:$0xff] }
 0x19c   :  { %5324 = vst [vmem:[#allocation80_spill] sm:$0xff] %v4202_v41  ;;  %5325 = vst [vmem:[#allocation81_spill] sm:$0xff] %v4206_v44  ;;  %v4212_v62 = vld [vmem:[#allocation4 + $0x60] sm:$0xff]  ;;  %v4214_v31 = vld [vmem:[#allocation4 + $0x88] sm:$0xff] }
 0x19d   :  { %5326 = vst [vmem:[#allocation82_spill] sm:$0xff] %v4209_v4  ;;  %5327 = vst [vmem:[#allocation83_spill] sm:$0xff] %v4212_v62  ;;  %v4218_v6 = vld [vmem:[#allocation4 + $0x70] sm:$0xff]  ;;  %v4221_v51 = vld [vmem:[#allocation4 + $0x98] sm:$0xff] }
 0x19e   :  { %844 = vmatpush1.bf16.msra.mxu0 %v4183_v39  ;;  %885 = vmatpush1.bf16.msra.mxu1 %v4194_v18  ;;  %5328 = vst [vmem:[#allocation84_spill] sm:$0xff] %v4214_v31  ;;  %5329 = vst [vmem:[#allocation85_spill] sm:$0xff] %v4218_v6  ;;  %v4224_v45 = vld [vmem:[#allocation4 + $0x80] sm:$0xff]  ;;  %v4226_v12 = vld [vmem:[#allocation4 + $0xa8] sm:$0xff] }
 0x19f   :  { %845 = vmatprep.subr.bf16.mxu0 %v4190_v53  ;;  %886 = vmatprep.subr.bf16.mxu1 %v4197_v35  ;;  %5330 = vst [vmem:[#allocation86_spill] sm:$0xff] %v4221_v51  ;;  %5331 = vst [vmem:[#allocation87_spill] sm:$0xff] %v4224_v45  ;;  %v4230_v25 = vld [vmem:[#allocation4 + $0x90] sm:$0xff]  ;;  %v4233_v58 = vld [vmem:[#allocation4 + $0xb8] sm:$0xff] }
 0x1a0   :  { %5332 = vst [vmem:[#allocation88_spill] sm:$0xff] %v4226_v12  ;;  %5333 = vst [vmem:[#allocation89_spill] sm:$0xff] %v4230_v25  ;;  %v4236_v54 = vld [vmem:[#allocation4 + $0xa0] sm:$0xff]  ;;  %v4238_v20 = vld [vmem:[#allocation4 + $0xc8] sm:$0xff] }
 0x1a1   :  { %5334 = vst [vmem:[#allocation90_spill] sm:$0xff] %v4233_v58  ;;  %5335 = vst [vmem:[#allocation91_spill] sm:$0xff] %v4236_v54  ;;  %v4241_v17 = vld [vmem:[#allocation4 + $0xb0] sm:$0xff]  ;;  %v4243_v60 = vld [vmem:[#allocation4 + $0xc0] sm:$0xff] }
 0x1a2   :  { %846 = vmatpush1.bf16.msra.mxu0 %v4200_v33  ;;  %887 = vmatpush1.bf16.msra.mxu1 %v4206_v44  ;;  %5336 = vst [vmem:[#allocation92_spill] sm:$0xff] %v4238_v20  ;;  %5337 = vst [vmem:[#allocation93_spill] sm:$0xff] %v4241_v17  ;;  %v4246_v55 = vld [vmem:[#allocation4 + $0xd8] sm:$0xff]  ;;  %v4249_v63 = vld [vmem:[#allocation4 + $0xe8] sm:$0xff] }
 0x1a3   :  { %847 = vmatprep.subr.bf16.mxu0 %v4202_v41  ;;  %888 = vmatprep.subr.bf16.mxu1 %v4209_v4  ;;  %5338 = vst [vmem:[#allocation94_spill] sm:$0xff] %v4243_v60  ;;  %5339 = vst [vmem:[#allocation95_spill] sm:$0xff] %v4246_v55  ;;  %v4252_v5 = vld [vmem:[#allocation4 + $0xd0] sm:$0xff]  ;;  %v4255_v50 = vld [vmem:[#allocation4 + $0xf8] sm:$0xff] }
 0x1a4   :  { %5340 = vst [vmem:[#allocation96_spill] sm:$0xff] %v4249_v63  ;;  %5341 = vst [vmem:[#allocation97_spill] sm:$0xff] %v4252_v5  ;;  %v4257_v46 = vld [vmem:[#allocation4 + $0xe0] sm:$0xff]  ;;  %v4261_v47 = vld [vmem:[#allocation4 + $0x108] sm:$0xff] }
 0x1a5   :  { %5342 = vst [vmem:[#allocation98_spill] sm:$0xff] %v4255_v50  ;;  %5343 = vst [vmem:[#allocation99_spill] sm:$0xff] %v4257_v46  ;;  %v4264_v61 = vld [vmem:[#allocation4 + $0xf0] sm:$0xff]  ;;  %v4267_v27 = vld [vmem:[#allocation4 + $0x118] sm:$0xff] }
 0x1a6   :  { %848 = vmatpush1.bf16.msra.mxu0 %v4212_v62  ;;  %889 = vmatpush1.bf16.msra.mxu1 %v4218_v6  ;;  %5344 = vst [vmem:[#allocation100_spill] sm:$0xff] %v4261_v47  ;;  %5345 = vst [vmem:[#allocation101_spill] sm:$0xff] %v4264_v61  ;;  %v4269_v22 = vld [vmem:[#allocation4 + $0x100] sm:$0xff]  ;;  %v4273_v43 = vld [vmem:[#allocation4 + $0x128] sm:$0xff] }
 0x1a7   :  { %849 = vmatprep.subr.bf16.mxu0 %v4214_v31  ;;  %890 = vmatprep.subr.bf16.mxu1 %v4221_v51  ;;  %5346 = vst [vmem:[#allocation102_spill] sm:$0xff] %v4267_v27  ;;  %v4276_v49 = vld [vmem:[#allocation4 + $0x110] sm:$0xff]  ;;  %v4279_v14 = vld [vmem:[#allocation4 + $0x138] sm:$0xff]  ;;  %v4282_v11 = vld [vmem:[#allocation4 + $0x120] sm:$0xff] }
 0x1a8   :  { %v4286_v28 = vld [vmem:[#allocation4 + $0x148] sm:$0xff]  ;;  %v4294_v57 = vld [vmem:[#allocation4 + $0x130] sm:$0xff]  ;;  %v4297_v36 = vld [vmem:[#allocation4 + $0x158] sm:$0xff] }
 0x1a9   :  { %v4300_v32 = vld [vmem:[#allocation4 + $0x140] sm:$0xff]  ;;  %v4302_v37 = vld [vmem:[#allocation4 + $0x168] sm:$0xff]  ;;  %v4306_v40 = vld [vmem:[#allocation4 + $0x150] sm:$0xff] }
 0x1aa   :  { %850 = vmatpush1.bf16.msra.mxu0 %v4224_v45  ;;  %891 = vmatpush1.bf16.msra.mxu1 %v4230_v25  ;;  %v4309_v7 = vld [vmem:[#allocation4 + $0x178] sm:$0xff]  ;;  %v4312_v2 = vld [vmem:[#allocation4 + $0x160] sm:$0xff]  ;;  %v4314_v10 = vld [vmem:[#allocation4 + $0x188] sm:$0xff] }
 0x1ab   :  { %851 = vmatprep.subr.bf16.mxu0 %v4226_v12  ;;  %892 = vmatprep.subr.bf16.mxu1 %v4233_v58  ;;  %5347 = vst [vmem:[#allocation103_spill] sm:$0xff] %v4312_v2  ;;  %5348 = vst [vmem:[#allocation104_spill] sm:$0xff] %v4314_v10  ;;  %v4318_v13 = vld [vmem:[#allocation4 + $0x170] sm:$0xff]  ;;  %v4321_v19 = vld [vmem:[#allocation4 + $0x198] sm:$0xff] }
 0x1ac   :  { %5349 = vst [vmem:[#allocation105_spill] sm:$0xff] %v4318_v13  ;;  %5350 = vst [vmem:[#allocation106_spill] sm:$0xff] %v4321_v19  ;;  %v4324_v3 = vld [vmem:[#allocation4 + $0x180] sm:$0xff]  ;;  %v4326_v26 = vld [vmem:[#allocation4 + $0x1a8] sm:$0xff] }
 0x1ad   :  { %5351 = vst [vmem:[#allocation107_spill] sm:$0xff] %v4324_v3  ;;  %5352 = vst [vmem:[#allocation108_spill] sm:$0xff] %v4326_v26  ;;  %v4330_v30 = vld [vmem:[#allocation4 + $0x190] sm:$0xff]  ;;  %v4333_v59 = vld [vmem:[#allocation4 + $0x1b8] sm:$0xff] }
 0x1ae   :  { %852 = vmatpush1.bf16.msra.mxu0 %v4236_v54  ;;  %893 = vmatpush1.bf16.msra.mxu1 %v4241_v17  ;;  %5353 = vst [vmem:[#allocation109_spill] sm:$0xff] %v4333_v59  ;;  %v4336_v56 = vld [vmem:[#allocation4 + $0x1a0] sm:$0xff] }
 0x1af   :  { %853 = vmatprep.subr.bf16.mxu0 %v4238_v20  ;;  %894 = vmatprep.subr.bf16.mxu1 %v4246_v55  ;;  %5354 = vst [vmem:[#allocation110_spill] sm:$0xff] %v4336_v56 }
 0x1b2   :  { %854 = vmatpush1.bf16.msra.mxu0 %v4243_v60  ;;  %895 = vmatpush1.bf16.msra.mxu1 %v4252_v5 }
 0x1b3   :  { %855 = vmatprep.subr.bf16.mxu0 %v4249_v63  ;;  %896 = vmatprep.subr.bf16.mxu1 %v4255_v50 }
 0x1b6   :  { %856 = vmatpush1.bf16.msra.mxu0 %v4257_v46  ;;  %897 = vmatpush1.bf16.msra.mxu1 %v4264_v61 }
 0x1b7   :  { %931 = vmatprep.subr.bf16.mxu0 %v4261_v47  ;;  %972 = vmatprep.subr.bf16.mxu1 %v4267_v27 }
 0x1b9   :  { %874 = vmatmul.mubr.bf16.vlgmr.msra.gmra.mrb[24].mxu0 %v5322_v8  ;;  %915 = vmatmul.mubr.bf16.vlgmr.msra.gmra.mrb[40].mxu1 %v5322_v8 }
 0x1ba   :  { %932 = vmatpush1.bf16.msra.mxu0 %v4269_v22  ;;  %963 = vmatprep.mubr.bf16.mxu0 %v5322_v8 }
 0x1bb   :  { %933 = vmatprep.subr.bf16.mxu0 %v4273_v43  ;;  %973 = vmatpush1.bf16.msra.mxu1 %v4276_v49 }
 0x1bc   :  { %1004 = vmatprep.mubr.bf16.mxu1 %v5322_v8  ;;  %974 = vmatprep.subr.bf16.mxu1 %v4279_v14 }
 0x1be   :  { %934 = vmatpush1.bf16.msra.mxu0 %v4282_v11 }
 0x1bf   :  { %935 = vmatprep.subr.bf16.mxu0 %v4286_v28  ;;  %975 = vmatpush1.bf16.msra.mxu1 %v4294_v57 }
 0x1c0   :  { %976 = vmatprep.subr.bf16.mxu1 %v4297_v36 }
 0x1c2   :  { %936 = vmatpush1.bf16.msra.mxu0 %v4300_v32 }
 0x1c3   :  { %937 = vmatprep.subr.bf16.mxu0 %v4302_v37  ;;  %977 = vmatpush1.bf16.msra.mxu1 %v4306_v40 }
 0x1c4   :  { %978 = vmatprep.subr.bf16.mxu1 %v4309_v7 }
 0x1c6   :  { %938 = vmatpush1.bf16.msra.mxu0 %v4312_v2  ;;  %v4338_v2 = vld [vmem:[#allocation4 + $0x1c8] sm:$0xff] }
 0x1c7   :  { %939 = vmatprep.subr.bf16.mxu0 %v4314_v10  ;;  %979 = vmatpush1.bf16.msra.mxu1 %v4318_v13  ;;  %5355 = vst [vmem:[#allocation111_spill] sm:$0xff] %v4338_v2  ;;  %v4342_v10 = vld [vmem:[#allocation4 + $0x1b0] sm:$0xff]  ;;  %v4350_v13 = vld [vmem:[#allocation4 + $0x1e8] sm:$0xff] }
 0x1c8   :  { %980 = vmatprep.subr.bf16.mxu1 %v4321_v19  ;;  %v4345_v19 = vld [vmem:[#allocation4 + $0x1d8] sm:$0xff] }
 0x1ca   :  { %940 = vmatpush1.bf16.msra.mxu0 %v4324_v3  ;;  %v4348_v3 = vld [vmem:[#allocation4 + $0x1c0] sm:$0xff] }
 0x1cb   :  { %941 = vmatprep.subr.bf16.mxu0 %v4326_v26  ;;  %981 = vmatpush1.bf16.msra.mxu1 %v4330_v30  ;;  %v4354_v26 = vld [vmem:[#allocation4 + $0x1d0] sm:$0xff] }
 0x1cc   :  { %982 = vmatprep.subr.bf16.mxu1 %v4333_v59  ;;  %v4357_v59 = vld [vmem:[#allocation4 + $0x1f8] sm:$0xff] }
 0x1ce   :  { %942 = vmatpush1.bf16.msra.mxu0 %v4336_v56  ;;  %v4360_v56 = vld [vmem:[#allocation4 + $0x1e0] sm:$0xff] }
 0x1cf   :  { %943 = vmatprep.subr.bf16.mxu0 %v4338_v2  ;;  %983 = vmatpush1.bf16.msra.mxu1 %v4342_v10  ;;  %v4364_v2 = vld [vmem:[#allocation4 + $0x1f0] sm:$0xff] }
 0x1d0   :  { %984 = vmatprep.subr.bf16.mxu1 %v4345_v19 }
 0x1d2   :  { %944 = vmatpush1.bf16.msra.mxu0 %v4348_v3 }
 0x1d3   :  { %945 = vmatprep.subr.bf16.mxu0 %v4350_v13  ;;  %985 = vmatpush1.bf16.msra.mxu1 %v4354_v26 }
 0x1d4   :  { %986 = vmatprep.subr.bf16.mxu1 %v4357_v59 }
 0x1d6   :  { %946 = vmatpush1.bf16.msra.mxu0 %v4360_v56 }
 0x1d7   :  { %1070 = vmatprep.subr.bf16.mxu0 %v4172_v1  ;;  %987 = vmatpush1.bf16.msra.mxu1 %v4364_v2 }
 0x1d8   :  { %1111 = vmatprep.subr.bf16.mxu1 %v4180_v29 }
 0x1d9   :  { %964 = vmatmul.mubr.bf16.vlgmr.msra.gmra.mrb[28].mxu0 %v5322_v8 }
 0x1da   :  { %1071 = vmatpush1.bf16.msra.mxu0 %v4174_v24  ;;  %1102 = vmatprep.mubr.bf16.mxu0 %v5322_v8 }
 0x1db   :  { %1005 = vmatmul.mubr.bf16.vlgmr.msra.gmra.mrb[44].mxu1 %v5322_v8  ;;  %1072 = vmatprep.subr.bf16.mxu0 %v4176_v38 }
 0x1dc   :  { %1112 = vmatpush1.bf16.msra.mxu1 %v4186_v15  ;;  %1143 = vmatprep.mubr.bf16.mxu1 %v5322_v8 }
 0x1dd   :  { %1113 = vmatprep.subr.bf16.mxu1 %v4188_v16 }
 0x1de   :  { %1073 = vmatpush1.bf16.msra.mxu0 %v4183_v39 }
 0x1df   :  { %1074 = vmatprep.subr.bf16.mxu0 %v4190_v53 }
 0x1e0   :  { %1114 = vmatpush1.bf16.msra.mxu1 %v4194_v18 }
 0x1e1   :  { %1115 = vmatprep.subr.bf16.mxu1 %v4197_v35 }
 0x1e2   :  { %1075 = vmatpush1.bf16.msra.mxu0 %v4200_v33 }
 0x1e3   :  { %1076 = vmatprep.subr.bf16.mxu0 %v4202_v41 }
 0x1e4   :  { %1116 = vmatpush1.bf16.msra.mxu1 %v4206_v44 }
 0x1e5   :  { %1117 = vmatprep.subr.bf16.mxu1 %v4209_v4 }
 0x1e6   :  { %1077 = vmatpush1.bf16.msra.mxu0 %v4212_v62 }
 0x1e7   :  { %1078 = vmatprep.subr.bf16.mxu0 %v4214_v31 }
 0x1e8   :  { %1118 = vmatpush1.bf16.msra.mxu1 %v4218_v6 }
 0x1e9   :  { %1119 = vmatprep.subr.bf16.mxu1 %v4221_v51 }
 0x1ea   :  { %1079 = vmatpush1.bf16.msra.mxu0 %v4224_v45 }
 0x1eb   :  { %1080 = vmatprep.subr.bf16.mxu0 %v4226_v12 }
 0x1ec   :  { %1120 = vmatpush1.bf16.msra.mxu1 %v4230_v25 }
 0x1ed   :  { %1121 = vmatprep.subr.bf16.mxu1 %v4233_v58 }
 0x1ee   :  { %1081 = vmatpush1.bf16.msra.mxu0 %v4236_v54 }
 0x1ef   :  { %1082 = vmatprep.subr.bf16.mxu0 %v4238_v20 }
 0x1f0   :  { %1122 = vmatpush1.bf16.msra.mxu1 %v4241_v17 }
 0x1f1   :  { %1123 = vmatprep.subr.bf16.mxu1 %v4246_v55 }
 0x1f2   :  { %1083 = vmatpush1.bf16.msra.mxu0 %v4243_v60 }
 0x1f3   :  { %1084 = vmatprep.subr.bf16.mxu0 %v4249_v63 }
 0x1f4   :  { %1124 = vmatpush1.bf16.msra.mxu1 %v4252_v5 }
 0x1f5   :  { %1125 = vmatprep.subr.bf16.mxu1 %v4255_v50 }
 0x1f6   :  { %1085 = vmatpush1.bf16.msra.mxu0 %v4257_v46 }
 0x1f7   :  { %1161 = vmatprep.subr.bf16.mxu0 %v4261_v47 }
 0x1f8   :  { %1126 = vmatpush1.bf16.msra.mxu1 %v4264_v61 }
 0x1f9   :  { %1202 = vmatprep.subr.bf16.mxu1 %v4267_v27 }
 0x28c   :  { %v875_v20 = vpop.f32.mrb[24].mxu0  ;;  %v916_v63 = vpop.f32.mrb[40].mxu1 }
 0x28d   :  { %v923_v17 = vadd.f32 %v875_v20, %v4008_v48  ;;  %v877_v55 = vpop.f32.mrb[25].mxu0  ;;  %v918_v12 = vpop.f32.mrb[41].mxu1  ;;  %v925_v27 = vadd.f32 %v916_v63, %v4052_v21 }
 0x28e   :  { %v924_v60 = vadd.f32 %v877_v55, %v4012_v52  ;;  %v879_v54 = vpop.f32.mrb[26].mxu0  ;;  %v920_v25 = vpop.f32.mrb[42].mxu1  ;;  %v926_v47 = vadd.f32 %v918_v12, %v4054_v23 }
 0x28f   :  { %v3085_v58 = vmul.f32 -1.442695, %v923_v17  ;;  %v880_v5 = vpop.f32.mrb[27].mxu0  ;;  %v921_v46 = vpop.f32.mrb[43].mxu1 }
 0x290   :  { %v3086_v50 = vmul.f32 -1.442695, %v924_v60  ;;  %v3087_v61 = vmul.f32 -1.442695, %v926_v47 }
 0x291   :  { %3350 = vpow2.f32 %v3085_v58 }
 0x292   :  { %3352 = vpow2.f32 %v3086_v50 }
 0x293   :  { %3354 = vpow2.f32 %v3087_v61 }
 0x294   :  { %3356 = vtanh.f32 %v925_v27 }
 0x29b   :  { %v3351_v45 = vpop.eup %3350 }
 0x29c   :  { %v3353_v48 = vpop.eup %3352  ;;  %v1020_v20 = vadd.f32 1.0, %v3351_v45 }
 0x29d   :  { %v1026_v52 = vadd.f32 1.0, %v3353_v48  ;;  %v3355_v54 = vpop.eup %3354 }
 0x29e   :  { %3358 = vrcp.f32 %v1020_v20  ;;  %v3357_v55 = vpop.eup %3356  ;;  %v1033_v5 = vadd.f32 1.0, %v3355_v54 }
 0x29f   :  { %3360 = vrcp.f32 %v1026_v52 }
 0x2a0   :  { %3362 = vrcp.f32 %v1033_v5 }
 0x2a8   :  { %v3359_v60 = vpop.eup %3358 }
 0x2a9   :  { %v3361_v58 = vpop.eup %3360  ;;  %v1037_v46 = vmul.f32 %v3359_v60, %v3357_v55 }
 0x2aa   :  { %v1036_v50 = vmul.f32 0.0, %v3361_v58  ;;  %v3363_v55 = vpop.eup %3362 }
 0x2ac   :  { %v4410_v25 = vadd.f32 %v1037_v46, %v1036_v50  ;;  %v965_v23 = vpop.f32.mrb[28].mxu0 }
 0x2ad   :  { %v1013_v21 = vadd.f32 %v965_v23, %v4130_v34  ;;  %v967_v63 = vpop.f32.mrb[29].mxu0 }
 0x2ae   :  { %3364 = vtanh.f32 %v4410_v25  ;;  %v1014_v45 = vadd.f32 %v967_v63, %v4136_v42  ;;  %v969_v12 = vpop.f32.mrb[30].mxu0  ;;  %v1006_v27 = vpop.f32.mrb[44].mxu1 }
 0x2af   :  { %v3088_v47 = vmul.f32 -1.442695, %v1013_v21  ;;  %v970_v61 = vpop.f32.mrb[31].mxu0  ;;  %v1008_v17 = vpop.f32.mrb[45].mxu1  ;;  %v1015_v5 = vadd.f32 %v1006_v27, %v4166_v9 }
 0x2b0   :  { %v3089_v48 = vmul.f32 -1.442695, %v1014_v45  ;;  %v1010_v20 = vpop.f32.mrb[46].mxu1  ;;  %v1016_v54 = vadd.f32 %v1008_v17, %v4168_v0  ;;  %v5356_v61 = vld [vmem:[#allocation103_spill] sm:$0xff]  ;;  %v5357_v17 = vld [vmem:[#allocation105_spill] sm:$0xff] }
 0x2b1   :  { %3366 = vpow2.f32 %v3088_v47  ;;  %v1011_v52 = vpop.f32.mrb[47].mxu1  ;;  %v5359_v20 = vld [vmem:[#allocation106_spill] sm:$0xff] }
 0x2b2   :  { %3368 = vpow2.f32 %v3089_v48  ;;  %v3090_v60 = vmul.f32 -1.442695, %v1016_v54  ;;  %v5358_v48 = vld [vmem:[#allocation104_spill] sm:$0xff]  ;;  %v5360_v54 = vld [vmem:[#allocation107_spill] sm:$0xff] }
 0x2b4   :  { %3370 = vpow2.f32 %v3090_v60  ;;  %v5362_v60 = vld [vmem:[#allocation109_spill] sm:$0xff] }
 0x2b5   :  { %3372 = vtanh.f32 %v1015_v5  ;;  %v5364_v5 = vld [vmem:[#allocation111_spill] sm:$0xff] }
 0x2b8   :  { %v3365_v34 = vpop.eup %3364 }
 0x2b9   :  { %v1040_v58 = vmul.f32 %v3365_v34, %v3363_v55  ;;  %v5361_v55 = vld [vmem:[#allocation108_spill] sm:$0xff]  ;;  %v5363_v34 = vld [vmem:[#allocation110_spill] sm:$0xff] }
 0x2bb   :  { %v3367_v46 = vpop.eup %3366  ;;  %v1069_v42 = vpack.c.bf16 %v1040_v58, %v1040_v58 }
 0x2bc   :  { %v3369_v50 = vpop.eup %3368  ;;  %v1044_v23 = vadd.f32 1.0, %v3367_v46 }
 0x2bd   :  { %v1050_v21 = vadd.f32 1.0, %v3369_v50  ;;  %1103 = vmatmul.mubr.bf16.vlgmr.msra.gmra.mrb[32].mxu0 %v1069_v42  ;;  %1144 = vmatmul.mubr.bf16.vlgmr.msra.gmra.mrb[48].mxu1 %v1069_v42 }
 0x2be   :  { %3374 = vrcp.f32 %v1044_v23  ;;  %1162 = vmatpush1.bf16.msra.mxu0 %v4269_v22  ;;  %1203 = vmatpush1.bf16.msra.mxu1 %v4276_v49  ;;  %v3371_v0 = vpop.eup %3370  ;;  %v5365_v23 = vld [vmem:[#allocation87_spill] sm:$0xff] }
 0x2bf   :  { %3376 = vrcp.f32 %v1050_v21  ;;  %1163 = vmatprep.subr.bf16.mxu0 %v4273_v43  ;;  %1204 = vmatprep.subr.bf16.mxu1 %v4279_v14  ;;  %v3373_v9 = vpop.eup %3372  ;;  %v1057_v45 = vadd.f32 1.0, %v3371_v0  ;;  %v5366_v21 = vld [vmem:[#allocation89_spill] sm:$0xff]  ;;  %v5367_v0 = vld [vmem:[#allocation88_spill] sm:$0xff] }
 0x2c0   :  { %1193 = vmatprep.mubr.bf16.mxu0 %v5322_v8  ;;  %1234 = vmatprep.mubr.bf16.mxu1 %v5322_v8 }
 0x2c1   :  { %3378 = vrcp.f32 %v1057_v45  ;;  %v5370_v45 = vld [vmem:[#allocation93_spill] sm:$0xff] }
 0x2c2   :  { %1164 = vmatpush1.bf16.msra.mxu0 %v4282_v11  ;;  %1205 = vmatpush1.bf16.msra.mxu1 %v4294_v57 }
 0x2c3   :  { %1165 = vmatprep.subr.bf16.mxu0 %v4286_v28  ;;  %1206 = vmatprep.subr.bf16.mxu1 %v4297_v36 }
 0x2c6   :  { %1166 = vmatpush1.bf16.msra.mxu0 %v4300_v32  ;;  %1207 = vmatpush1.bf16.msra.mxu1 %v4306_v40 }
 0x2c7   :  { %1167 = vmatprep.subr.bf16.mxu0 %v4302_v37  ;;  %1208 = vmatprep.subr.bf16.mxu1 %v4309_v7 }
 0x2c8   :  { %v3375_v63 = vpop.eup %3374 }
 0x2c9   :  { %v3377_v12 = vpop.eup %3376  ;;  %v1061_v27 = vmul.f32 %v3375_v63, %v3373_v9  ;;  %v5368_v9 = vld [vmem:[#allocation90_spill] sm:$0xff]  ;;  %v5369_v63 = vld [vmem:[#allocation91_spill] sm:$0xff] }
 0x2ca   :  { %v1060_v47 = vmul.f32 0.0, %v3377_v12  ;;  %1168 = vmatpush1.bf16.msra.mxu0 %v5356_v61  ;;  %1209 = vmatpush1.bf16.msra.mxu1 %v5357_v17  ;;  %v5371_v12 = vld [vmem:[#allocation92_spill] sm:$0xff] }
 0x2cb   :  { %1169 = vmatprep.subr.bf16.mxu0 %v5358_v48  ;;  %1210 = vmatprep.subr.bf16.mxu1 %v5359_v20  ;;  %v3379_v58 = vpop.eup %3378 }
 0x2cc   :  { %v4435_v52 = vadd.f32 %v1061_v27, %v1060_v47  ;;  %v5372_v27 = vld [vmem:[#allocation95_spill] sm:$0xff]  ;;  %v5373_v47 = vld [vmem:[#allocation94_spill] sm:$0xff] }
 0x2ce   :  { %3380 = vtanh.f32 %v4435_v52  ;;  %1170 = vmatpush1.bf16.msra.mxu0 %v5360_v54  ;;  %1211 = vmatpush1.bf16.msra.mxu1 %v4330_v30 }
 0x2cf   :  { %1171 = vmatprep.subr.bf16.mxu0 %v5361_v55  ;;  %1212 = vmatprep.subr.bf16.mxu1 %v5362_v60 }
 0x2d2   :  { %1172 = vmatpush1.bf16.msra.mxu0 %v5363_v34  ;;  %1213 = vmatpush1.bf16.msra.mxu1 %v4342_v10 }
 0x2d3   :  { %1173 = vmatprep.subr.bf16.mxu0 %v5364_v5  ;;  %1214 = vmatprep.subr.bf16.mxu1 %v4345_v19 }
 0x2d6   :  { %1174 = vmatpush1.bf16.msra.mxu0 %v4348_v3  ;;  %1215 = vmatpush1.bf16.msra.mxu1 %v4354_v26 }
 0x2d7   :  { %1175 = vmatprep.subr.bf16.mxu0 %v4350_v13  ;;  %1216 = vmatprep.subr.bf16.mxu1 %v4357_v59 }
 0x2d8   :  { %v3381_v46 = vpop.eup %3380 }
 0x2d9   :  { %v1064_v42 = vmul.f32 %v3381_v46, %v3379_v58  ;;  %v5374_v58 = vld [vmem:[#allocation97_spill] sm:$0xff]  ;;  %v5375_v46 = vld [vmem:[#allocation96_spill] sm:$0xff] }
 0x2da   :  { %1176 = vmatpush1.bf16.msra.mxu0 %v4360_v56  ;;  %1217 = vmatpush1.bf16.msra.mxu1 %v4364_v2 }
 0x2db   :  { %v1160_v50 = vpack.c.bf16 %v1064_v42, %v1064_v42  ;;  %1300 = vmatprep.subr.bf16.mxu0 %v4172_v1  ;;  %1341 = vmatprep.subr.bf16.mxu1 %v4180_v29  ;;  %v5376_v42 = vld [vmem:[#allocation98_spill] sm:$0xff] }
 0x2dd   :  { %1194 = vmatmul.mubr.bf16.vlgmr.msra.gmra.mrb[36].mxu0 %v1160_v50  ;;  %1235 = vmatmul.mubr.bf16.vlgmr.msra.gmra.mrb[52].mxu1 %v1160_v50  ;;  %v5377_v50 = vld [vmem:[#allocation99_spill] sm:$0xff] }
 0x2de   :  { %1301 = vmatpush1.bf16.msra.mxu0 %v4174_v24  ;;  %1342 = vmatpush1.bf16.msra.mxu1 %v4186_v15 }
 0x2df   :  { %1302 = vmatprep.subr.bf16.mxu0 %v4176_v38  ;;  %1343 = vmatprep.subr.bf16.mxu1 %v4188_v16 }
 0x2e0   :  { %1332 = vmatprep.mubr.bf16.mxu0 %v5322_v8  ;;  %1373 = vmatprep.mubr.bf16.mxu1 %v5322_v8 }
 0x2e2   :  { %1303 = vmatpush1.bf16.msra.mxu0 %v4183_v39  ;;  %1344 = vmatpush1.bf16.msra.mxu1 %v4194_v18 }
 0x2e3   :  { %1304 = vmatprep.subr.bf16.mxu0 %v4190_v53  ;;  %1345 = vmatprep.subr.bf16.mxu1 %v4197_v35 }
 0x2e6   :  { %1305 = vmatpush1.bf16.msra.mxu0 %v4200_v33  ;;  %1346 = vmatpush1.bf16.msra.mxu1 %v4206_v44 }
 0x2e7   :  { %1306 = vmatprep.subr.bf16.mxu0 %v4202_v41  ;;  %1347 = vmatprep.subr.bf16.mxu1 %v4209_v4 }
 0x2ea   :  { %1307 = vmatpush1.bf16.msra.mxu0 %v4212_v62  ;;  %1348 = vmatpush1.bf16.msra.mxu1 %v4218_v6 }
 0x2eb   :  { %1308 = vmatprep.subr.bf16.mxu0 %v4214_v31  ;;  %1349 = vmatprep.subr.bf16.mxu1 %v4221_v51  ;;  %v5382_v51 = vld [vmem:[#allocation28_spill] sm:$0xff] }
 0x2ee   :  { %1309 = vmatpush1.bf16.msra.mxu0 %v5365_v23  ;;  %1350 = vmatpush1.bf16.msra.mxu1 %v5366_v21  ;;  %v5381_v21 = vld [vmem:[#allocation26_spill] sm:$0xff] }
 0x2ef   :  { %1310 = vmatprep.subr.bf16.mxu0 %v5367_v0  ;;  %1351 = vmatprep.subr.bf16.mxu1 %v5368_v9  ;;  %v5378_v0 = vld [vmem:[#allocation101_spill] sm:$0xff]  ;;  %v5379_v9 = vld [vmem:[#allocation100_spill] sm:$0xff] }
 0x2f2   :  { %1311 = vmatpush1.bf16.msra.mxu0 %v5369_v63  ;;  %1352 = vmatpush1.bf16.msra.mxu1 %v5370_v45  ;;  %v5380_v63 = vld [vmem:[#allocation102_spill] sm:$0xff] }
 0x2f3   :  { %1312 = vmatprep.subr.bf16.mxu0 %v5371_v12  ;;  %1353 = vmatprep.subr.bf16.mxu1 %v5372_v27 }
 0x2f6   :  { %1313 = vmatpush1.bf16.msra.mxu0 %v5373_v47  ;;  %1354 = vmatpush1.bf16.msra.mxu1 %v5374_v58 }
 0x2f7   :  { %1314 = vmatprep.subr.bf16.mxu0 %v5375_v46  ;;  %1355 = vmatprep.subr.bf16.mxu1 %v5376_v42 }
 0x2fa   :  { %1315 = vmatpush1.bf16.msra.mxu0 %v5377_v50  ;;  %1356 = vmatpush1.bf16.msra.mxu1 %v5378_v0  ;;  %v5383_v0 = vld [vmem:[#allocation39_spill] sm:$0xff] }
 0x2fb   :  { %1391 = vmatprep.subr.bf16.mxu0 %v5379_v9  ;;  %1432 = vmatprep.subr.bf16.mxu1 %v5380_v63  ;;  %v5384_v63 = vld [vmem:[#allocation37_spill] sm:$0xff] }
 0x390   :  { %v1104_v45 = vpop.f32.mrb[32].mxu0  ;;  %v1145_v12 = vpop.f32.mrb[48].mxu1 }
 0x391   :  { %v1152_v27 = vadd.f32 %v1104_v45, %v5381_v21  ;;  %v1106_v23 = vpop.f32.mrb[33].mxu0  ;;  %v1147_v47 = vpop.f32.mrb[49].mxu1  ;;  %v1154_v41 = vadd.f32 %v1145_v12, %v5384_v63  ;;  %v5385_v12 = vld [vmem:[#allocation62_spill] sm:$0xff] }
 0x392   :  { %v1153_v58 = vadd.f32 %v1106_v23, %v5382_v51  ;;  %v1108_v31 = vpop.f32.mrb[34].mxu0  ;;  %v1149_v46 = vpop.f32.mrb[50].mxu1  ;;  %v1155_v9 = vadd.f32 %v1147_v47, %v5383_v0 }
 0x393   :  { %v3091_v6 = vmul.f32 -1.442695, %v1152_v27  ;;  %v1109_v42 = vpop.f32.mrb[35].mxu0  ;;  %v1150_v62 = vpop.f32.mrb[51].mxu1 }
 0x394   :  { %v3092_v50 = vmul.f32 -1.442695, %v1153_v58  ;;  %v3093_v4 = vmul.f32 -1.442695, %v1155_v9 }
 0x395   :  { %3382 = vpow2.f32 %v3091_v6 }
 0x396   :  { %3384 = vpow2.f32 %v3092_v50 }
 0x397   :  { %3386 = vpow2.f32 %v3093_v4 }
 0x398   :  { %3388 = vtanh.f32 %v1154_v41 }
 0x39f   :  { %v3383_v44 = vpop.eup %3382 }
 0x3a0   :  { %v3385_v33 = vpop.eup %3384  ;;  %v1250_v21 = vadd.f32 1.0, %v3383_v44 }
 0x3a1   :  { %v1256_v45 = vadd.f32 1.0, %v3385_v33  ;;  %v3387_v31 = vpop.eup %3386  ;;  %v5386_v33 = vld [vmem:[#allocation64_spill] sm:$0xff] }
 0x3a2   :  { %3390 = vrcp.f32 %v1250_v21  ;;  %v3389_v51 = vpop.eup %3388  ;;  %v1263_v6 = vadd.f32 1.0, %v3387_v31 }
 0x3a3   :  { %3392 = vrcp.f32 %v1256_v45 }
 0x3a4   :  { %3394 = vrcp.f32 %v1263_v6  ;;  %v5388_v6 = vld [vmem:[#allocation77_spill] sm:$0xff] }
 0x3ac   :  { %v3391_v23 = vpop.eup %3390 }
 0x3ad   :  { %v3393_v62 = vpop.eup %3392  ;;  %v1267_v27 = vmul.f32 %v3391_v23, %v3389_v51 }
 0x3ae   :  { %v1266_v58 = vmul.f32 %v3393_v62, %v4410_v25  ;;  %v5387_v25 = vld [vmem:[#allocation78_spill] sm:$0xff]  ;;  %v3395_v23 = vpop.eup %3394 }
 0x3b0   :  { %v4493_v0 = vadd.f32 %v1267_v27, %v1266_v58  ;;  %v1195_v9 = vpop.f32.mrb[36].mxu0  ;;  %v1236_v63 = vpop.f32.mrb[52].mxu1 }
 0x3b1   :  { %v1243_v44 = vadd.f32 %v1195_v9, %v5385_v12  ;;  %v1197_v4 = vpop.f32.mrb[37].mxu0  ;;  %v1238_v41 = vpop.f32.mrb[53].mxu1  ;;  %v1245_v58 = vadd.f32 %v1236_v63, %v5388_v6  ;;  %v5401_v6 = vld [vmem:[#allocation91_spill] sm:$0xff] }
 0x3b2   :  { %v1244_v47 = vadd.f32 %v1197_v4, %v5386_v33  ;;  %v1199_v46 = vpop.f32.mrb[38].mxu0  ;;  %v1240_v42 = vpop.f32.mrb[54].mxu1  ;;  %3396 = vtanh.f32 %v4493_v0  ;;  %v1246_v51 = vadd.f32 %v1238_v41, %v5387_v25 }
 0x3b3   :  { %v3094_v50 = vmul.f32 -1.442695, %v1243_v44  ;;  %v1200_v21 = vpop.f32.mrb[39].mxu0  ;;  %v1241_v45 = vpop.f32.mrb[55].mxu1 }
 0x3b4   :  { %v3095_v31 = vmul.f32 -1.442695, %v1244_v47  ;;  %v3096_v27 = vmul.f32 -1.442695, %v1246_v51 }
 0x3b5   :  { %3398 = vpow2.f32 %v3094_v50 }
 0x3b6   :  { %3400 = vpow2.f32 %v3095_v31 }
 0x3b7   :  { %3402 = vpow2.f32 %v3096_v27  ;;  %v5400_v27 = vld [vmem:[#allocation90_spill] sm:$0xff] }
 0x3b8   :  { %3404 = vtanh.f32 %v1245_v58  ;;  %v5402_v58 = vld [vmem:[#allocation93_spill] sm:$0xff] }
 0x3bc   :  { %v3397_v62 = vpop.eup %3396 }
 0x3bd   :  { %v1270_v9 = vmul.f32 %v3397_v62, %v3395_v23  ;;  %v5395_v62 = vld [vmem:[#allocation84_spill] sm:$0xff] }
 0x3bf   :  { %v3399_v12 = vpop.eup %3398  ;;  %v1299_v4 = vpack.c.bf16 %v1270_v9, %v1270_v9  ;;  %v5403_v9 = vld [vmem:[#allocation92_spill] sm:$0xff] }
 0x3c0   :  { %v3401_v33 = vpop.eup %3400  ;;  %v1274_v46 = vadd.f32 1.0, %v3399_v12  ;;  %v5404_v12 = vld [vmem:[#allocation95_spill] sm:$0xff] }
 0x3c1   :  { %v1280_v44 = vadd.f32 1.0, %v3401_v33  ;;  %1333 = vmatmul.mubr.bf16.vlgmr.msra.gmra.mrb[40].mxu0 %v1299_v4  ;;  %1374 = vmatmul.mubr.bf16.vlgmr.msra.gmra.mrb[56].mxu1 %v1299_v4  ;;  %v3403_v63 = vpop.eup %3402  ;;  %v5405_v4 = vld [vmem:[#allocation94_spill] sm:$0xff]  ;;  %v5406_v33 = vld [vmem:[#allocation97_spill] sm:$0xff] }
 0x3c2   :  { %3406 = vrcp.f32 %v1274_v46  ;;  %1392 = vmatpush1.bf16.msra.mxu0 %v4269_v22  ;;  %1433 = vmatpush1.bf16.msra.mxu1 %v4276_v49  ;;  %v3405_v41 = vpop.eup %3404  ;;  %v1287_v21 = vadd.f32 1.0, %v3403_v63  ;;  %v5407_v46 = vld [vmem:[#allocation96_spill] sm:$0xff]  ;;  %v5409_v63 = vld [vmem:[#allocation99_spill] sm:$0xff] }
 0x3c3   :  { %3408 = vrcp.f32 %v1280_v44  ;;  %1393 = vmatprep.subr.bf16.mxu0 %v4273_v43  ;;  %1434 = vmatprep.subr.bf16.mxu1 %v4279_v14  ;;  %v5408_v44 = vld [vmem:[#allocation98_spill] sm:$0xff] }
 0x3c4   :  { %1423 = vmatprep.mubr.bf16.mxu0 %v5322_v8  ;;  %1464 = vmatprep.mubr.bf16.mxu1 %v5322_v8  ;;  %3410 = vrcp.f32 %v1287_v21 }
 0x3c6   :  { %1394 = vmatpush1.bf16.msra.mxu0 %v4282_v11  ;;  %1435 = vmatpush1.bf16.msra.mxu1 %v4294_v57 }
 0x3c7   :  { %1395 = vmatprep.subr.bf16.mxu0 %v4286_v28  ;;  %1436 = vmatprep.subr.bf16.mxu1 %v4297_v36 }
 0x3ca   :  { %1396 = vmatpush1.bf16.msra.mxu0 %v4300_v32  ;;  %1437 = vmatpush1.bf16.msra.mxu1 %v4306_v40 }
 0x3cb   :  { %1397 = vmatprep.subr.bf16.mxu0 %v4302_v37  ;;  %1438 = vmatprep.subr.bf16.mxu1 %v4309_v7 }
 0x3cc   :  { %v3407_v47 = vpop.eup %3406 }
 0x3cd   :  { %v3409_v42 = vpop.eup %3408  ;;  %v1291_v50 = vmul.f32 %v3407_v47, %v3405_v41  ;;  %v5410_v41 = vld [vmem:[#allocation101_spill] sm:$0xff]  ;;  %v5411_v47 = vld [vmem:[#allocation100_spill] sm:$0xff] }
 0x3ce   :  { %v1290_v45 = vmul.f32 %v3409_v42, %v4435_v52  ;;  %1398 = vmatpush1.bf16.msra.mxu0 %v5356_v61  ;;  %1439 = vmatpush1.bf16.msra.mxu1 %v5357_v17  ;;  %v3411_v52 = vpop.eup %3410  ;;  %v5412_v42 = vld [vmem:[#allocation102_spill] sm:$0xff] }
 0x3cf   :  { %1399 = vmatprep.subr.bf16.mxu0 %v5358_v48  ;;  %1440 = vmatprep.subr.bf16.mxu1 %v5359_v20 }
 0x3d0   :  { %v4519_v31 = vadd.f32 %v1291_v50, %v1290_v45  ;;  %v5413_v45 = vld [vmem:[#allocation30_spill] sm:$0xff] }
 0x3d2   :  { %1400 = vmatpush1.bf16.msra.mxu0 %v5360_v54  ;;  %1441 = vmatpush1.bf16.msra.mxu1 %v4330_v30  ;;  %3412 = vtanh.f32 %v4519_v31 }
 0x3d3   :  { %1401 = vmatprep.subr.bf16.mxu0 %v5361_v55  ;;  %1442 = vmatprep.subr.bf16.mxu1 %v5362_v60 }
 0x3d6   :  { %1402 = vmatpush1.bf16.msra.mxu0 %v5363_v34  ;;  %1443 = vmatpush1.bf16.msra.mxu1 %v4342_v10 }
 0x3d7   :  { %1403 = vmatprep.subr.bf16.mxu0 %v5364_v5  ;;  %1444 = vmatprep.subr.bf16.mxu1 %v4345_v19 }
 0x3da   :  { %1404 = vmatpush1.bf16.msra.mxu0 %v4348_v3  ;;  %1445 = vmatpush1.bf16.msra.mxu1 %v4354_v26 }
 0x3db   :  { %1405 = vmatprep.subr.bf16.mxu0 %v4350_v13  ;;  %1446 = vmatprep.subr.bf16.mxu1 %v4357_v59 }
 0x3dc   :  { %v3413_v25 = vpop.eup %3412 }
 0x3dd   :  { %v1294_v51 = vmul.f32 %v3413_v25, %v3411_v52 }
 0x3de   :  { %1406 = vmatpush1.bf16.msra.mxu0 %v4360_v56  ;;  %1447 = vmatpush1.bf16.msra.mxu1 %v4364_v2 }
 0x3df   :  { %v1390_v23 = vpack.c.bf16 %v1294_v51, %v1294_v51  ;;  %1530 = vmatprep.subr.bf16.mxu0 %v4172_v1  ;;  %1571 = vmatprep.subr.bf16.mxu1 %v4180_v29  ;;  %v5389_v1 = vld [vmem:[#allocation79_spill] sm:$0xff]  ;;  %v5391_v29 = vld [vmem:[#allocation80_spill] sm:$0xff] }
 0x3e1   :  { %1424 = vmatmul.mubr.bf16.vlgmr.msra.gmra.mrb[44].mxu0 %v1390_v23  ;;  %1465 = vmatmul.mubr.bf16.vlgmr.msra.gmra.mrb[60].mxu1 %v1390_v23  ;;  %v5414_v23 = vld [vmem:[#allocation32_spill] sm:$0xff] }
 0x3e2   :  { %1531 = vmatpush1.bf16.msra.mxu0 %v4174_v24  ;;  %1572 = vmatpush1.bf16.msra.mxu1 %v4186_v15  ;;  %v5390_v24 = vld [vmem:[#allocation81_spill] sm:$0xff]  ;;  %v5393_v15 = vld [vmem:[#allocation83_spill] sm:$0xff] }
 0x3e3   :  { %1532 = vmatprep.subr.bf16.mxu0 %v4176_v38  ;;  %1573 = vmatprep.subr.bf16.mxu1 %v4188_v16  ;;  %v5392_v38 = vld [vmem:[#allocation82_spill] sm:$0xff]  ;;  %v5394_v16 = vld [vmem:[#allocation85_spill] sm:$0xff] }
 0x3e4   :  { %1562 = vmatprep.mubr.bf16.mxu0 %v5322_v8  ;;  %1603 = vmatprep.mubr.bf16.mxu1 %v5322_v8 }
 0x3e6   :  { %1533 = vmatpush1.bf16.msra.mxu0 %v4183_v39  ;;  %1574 = vmatpush1.bf16.msra.mxu1 %v4194_v18  ;;  %v5396_v39 = vld [vmem:[#allocation86_spill] sm:$0xff]  ;;  %v5397_v18 = vld [vmem:[#allocation87_spill] sm:$0xff] }
 0x3e7   :  { %1534 = vmatprep.subr.bf16.mxu0 %v4190_v53  ;;  %1575 = vmatprep.subr.bf16.mxu1 %v4197_v35  ;;  %v5398_v53 = vld [vmem:[#allocation89_spill] sm:$0xff]  ;;  %v5399_v35 = vld [vmem:[#allocation88_spill] sm:$0xff] }
 0x3ea   :  { %1535 = vmatpush1.bf16.msra.mxu0 %v5389_v1  ;;  %1576 = vmatpush1.bf16.msra.mxu1 %v5390_v24 }
 0x3eb   :  { %1536 = vmatprep.subr.bf16.mxu0 %v5391_v29  ;;  %1577 = vmatprep.subr.bf16.mxu1 %v5392_v38 }
 0x3ee   :  { %1537 = vmatpush1.bf16.msra.mxu0 %v5393_v15  ;;  %1578 = vmatpush1.bf16.msra.mxu1 %v5394_v16 }
 0x3ef   :  { %1538 = vmatprep.subr.bf16.mxu0 %v5395_v62  ;;  %1579 = vmatprep.subr.bf16.mxu1 %v5396_v39  ;;  %v5415_v39 = vld [vmem:[#allocation44_spill] sm:$0xff] }
 0x3f2   :  { %1539 = vmatpush1.bf16.msra.mxu0 %v5397_v18  ;;  %1580 = vmatpush1.bf16.msra.mxu1 %v5398_v53 }
 0x3f3   :  { %1540 = vmatprep.subr.bf16.mxu0 %v5399_v35  ;;  %1581 = vmatprep.subr.bf16.mxu1 %v5400_v27  ;;  %v5416_v35 = vld [vmem:[#allocation43_spill] sm:$0xff] }
 0x3f6   :  { %1541 = vmatpush1.bf16.msra.mxu0 %v5401_v6  ;;  %1582 = vmatpush1.bf16.msra.mxu1 %v5402_v58 }
 0x3f7   :  { %1542 = vmatprep.subr.bf16.mxu0 %v5403_v9  ;;  %1583 = vmatprep.subr.bf16.mxu1 %v5404_v12 }
 0x3fa   :  { %1543 = vmatpush1.bf16.msra.mxu0 %v5405_v4  ;;  %1584 = vmatpush1.bf16.msra.mxu1 %v5406_v33 }
 0x3fb   :  { %1544 = vmatprep.subr.bf16.mxu0 %v5407_v46  ;;  %1585 = vmatprep.subr.bf16.mxu1 %v5408_v44 }
 0x3fe   :  { %1545 = vmatpush1.bf16.msra.mxu0 %v5409_v63  ;;  %1586 = vmatpush1.bf16.msra.mxu1 %v5410_v41 }
 0x3ff   :  { %1621 = vmatprep.subr.bf16.mxu0 %v5411_v47  ;;  %1662 = vmatprep.subr.bf16.mxu1 %v5412_v42 }
 0x494   :  { %v1334_v50 = vpop.f32.mrb[40].mxu0  ;;  %v1375_v21 = vpop.f32.mrb[56].mxu1 }
 0x495   :  { %v1382_v52 = vadd.f32 %v1334_v50, %v5413_v45  ;;  %v1336_v25 = vpop.f32.mrb[41].mxu0  ;;  %v1377_v51 = vpop.f32.mrb[57].mxu1  ;;  %v1384_v27 = vadd.f32 %v1375_v21, %v5416_v35  ;;  %v5417_v45 = vld [vmem:[#allocation57_spill] sm:$0xff] }
 0x496   :  { %v1383_v1 = vadd.f32 %v1336_v25, %v5414_v23  ;;  %v1338_v24 = vpop.f32.mrb[42].mxu0  ;;  %v1379_v29 = vpop.f32.mrb[58].mxu1  ;;  %v1385_v18 = vadd.f32 %v1377_v51, %v5415_v39  ;;  %v5418_v23 = vld [vmem:[#allocation58_spill] sm:$0xff] }
 0x497   :  { %v3097_v38 = vmul.f32 -1.442695, %v1382_v52  ;;  %v1339_v15 = vpop.f32.mrb[43].mxu0  ;;  %v1380_v16 = vpop.f32.mrb[59].mxu1 }
 0x498   :  { %v3098_v62 = vmul.f32 -1.442695, %v1383_v1  ;;  %v3099_v53 = vmul.f32 -1.442695, %v1385_v18 }
 0x499   :  { %3414 = vpow2.f32 %v3097_v38 }
 0x49a   :  { %3416 = vpow2.f32 %v3098_v62 }
 0x49b   :  { %3418 = vpow2.f32 %v3099_v53 }
 0x49c   :  { %3420 = vtanh.f32 %v1384_v27  ;;  %v5420_v27 = vld [vmem:[#allocation75_spill] sm:$0xff] }
 0x4a3   :  { %v3415_v6 = vpop.eup %3414 }
 0x4a4   :  { %v3417_v58 = vpop.eup %3416  ;;  %v1480_v9 = vadd.f32 1.0, %v3415_v6 }
 0x4a5   :  { %v1486_v12 = vadd.f32 1.0, %v3417_v58  ;;  %v3419_v4 = vpop.eup %3418 }
 0x4a6   :  { %3422 = vrcp.f32 %v1480_v9  ;;  %v3421_v33 = vpop.eup %3420  ;;  %v1493_v41 = vadd.f32 1.0, %v3419_v4 }
 0x4a7   :  { %3424 = vrcp.f32 %v1486_v12 }
 0x4a8   :  { %3426 = vrcp.f32 %v1493_v41  ;;  %v4685_v41 = vld [vmem:[#allocation4 + $0xb8] sm:$0xff] }
 0x4a9   :  { %5432 = vst [vmem:[#allocation39_spill] sm:$0xff] %v4685_v41 }
 0x4b0   :  { %v3423_v46 = vpop.eup %3422 }
 0x4b1   :  { %v3425_v44 = vpop.eup %3424  ;;  %v1497_v63 = vmul.f32 %v3423_v46, %v3421_v33 }
 0x4b2   :  { %v1496_v47 = vmul.f32 %v3425_v44, %v4493_v0  ;;  %v5419_v0 = vld [vmem:[#allocation76_spill] sm:$0xff]  ;;  %v3427_v18 = vpop.eup %3426 }
 0x4b4   :  { %v4577_v42 = vadd.f32 %v1497_v63, %v1496_v47  ;;  %v1425_v50 = vpop.f32.mrb[44].mxu0  ;;  %v1466_v21 = vpop.f32.mrb[60].mxu1  ;;  %v4682_v63 = vld [vmem:[#allocation4 + $0xa8] sm:$0xff]  ;;  %v4688_v47 = vld [vmem:[#allocation4 + $0xa0] sm:$0xff] }
 0x4b5   :  { %v1473_v52 = vadd.f32 %v1425_v50, %v5417_v45  ;;  %v1427_v25 = vpop.f32.mrb[45].mxu0  ;;  %v1468_v51 = vpop.f32.mrb[61].mxu1  ;;  %v1475_v6 = vadd.f32 %v1466_v21, %v5420_v27  ;;  %5431 = vst [vmem:[#allocation28_spill] sm:$0xff] %v4682_v63  ;;  %5433 = vst [vmem:[#allocation37_spill] sm:$0xff] %v4688_v47  ;;  %v4691_v50 = vld [vmem:[#allocation4 + $0xb0] sm:$0xff]  ;;  %v4694_v21 = vld [vmem:[#allocation4 + $0xc8] sm:$0xff] }
 0x4b6   :  { %v1474_v1 = vadd.f32 %v1427_v25, %v5418_v23  ;;  %v1429_v24 = vpop.f32.mrb[46].mxu0  ;;  %v1470_v29 = vpop.f32.mrb[62].mxu1  ;;  %3428 = vtanh.f32 %v4577_v42  ;;  %v1476_v39 = vadd.f32 %v1468_v51, %v5419_v0  ;;  %5434 = vst [vmem:[#allocation62_spill] sm:$0xff] %v4691_v50  ;;  %5435 = vst [vmem:[#allocation64_spill] sm:$0xff] %v4694_v21  ;;  %v4697_v45 = vld [vmem:[#allocation4 + $0xd8] sm:$0xff]  ;;  %v4703_v25 = vld [vmem:[#allocation4 + $0xd0] sm:$0xff] }
 0x4b7   :  { %v3100_v38 = vmul.f32 -1.442695, %v1473_v52  ;;  %v1430_v15 = vpop.f32.mrb[47].mxu0  ;;  %v1471_v16 = vpop.f32.mrb[63].mxu1  ;;  %5436 = vst [vmem:[#allocation78_spill] sm:$0xff] %v4697_v45  ;;  %v4700_v52 = vld [vmem:[#allocation4 + $0xc0] sm:$0xff] }
 0x4b8   :  { %v3101_v62 = vmul.f32 -1.442695, %v1474_v1  ;;  %v3102_v35 = vmul.f32 -1.442695, %v1476_v39  ;;  %5437 = vst [vmem:[#allocation77_spill] sm:$0xff] %v4700_v52  ;;  %5438 = vst [vmem:[#allocation79_spill] sm:$0xff] %v4703_v25 }
 0x4b9   :  { %3430 = vpow2.f32 %v3100_v38  ;;  %v4706_v51 = vld [vmem:[#allocation4 + $0xe8] sm:$0xff]  ;;  %v4709_v23 = vld [vmem:[#allocation4 + $0xf8] sm:$0xff]  ;;  %v4712_v1 = vld [vmem:[#allocation4 + $0xe0] sm:$0xff] }
 0x4ba   :  { %3432 = vpow2.f32 %v3101_v62  ;;  %5439 = vst [vmem:[#allocation81_spill] sm:$0xff] %v4706_v51  ;;  %5440 = vst [vmem:[#allocation80_spill] sm:$0xff] %v4709_v23  ;;  %v4715_v24 = vld [vmem:[#allocation4 + $0xf0] sm:$0xff]  ;;  %v4718_v29 = vld [vmem:[#allocation4 + $0x108] sm:$0xff] }
 0x4bb   :  { %3434 = vpow2.f32 %v3102_v35  ;;  %5441 = vst [vmem:[#allocation82_spill] sm:$0xff] %v4712_v1  ;;  %5442 = vst [vmem:[#allocation83_spill] sm:$0xff] %v4715_v24  ;;  %v4721_v38 = vld [vmem:[#allocation4 + $0x118] sm:$0xff]  ;;  %v5445_v62 = vld [vmem:[#allocation34_spill] sm:$0xff] }
 0x4bc   :  { %3436 = vtanh.f32 %v1475_v6  ;;  %5443 = vst [vmem:[#allocation85_spill] sm:$0xff] %v4718_v29  ;;  %5444 = vst [vmem:[#allocation84_spill] sm:$0xff] %v4721_v38 }
 0x4c0   :  { %v3429_v53 = vpop.eup %3428 }
 0x4c1   :  { %v1500_v58 = vmul.f32 %v3429_v53, %v3427_v18  ;;  %v5446_v53 = vld [vmem:[#allocation36_spill] sm:$0xff] }
 0x4c3   :  { %v3431_v9 = vpop.eup %3430  ;;  %v1529_v12 = vpack.c.bf16 %v1500_v58, %v1500_v58 }
 0x4c4   :  { %v3433_v4 = vpop.eup %3432  ;;  %v1504_v33 = vadd.f32 1.0, %v3431_v9 }
 0x4c5   :  { %v1510_v46 = vadd.f32 1.0, %v3433_v4  ;;  %1563 = vmatmul.mubr.bf16.vlgmr.msra.gmra.mrb[48].mxu0 %v1529_v12  ;;  %1604 = vmatmul.mubr.bf16.vlgmr.msra.gmra.mrb[64].mxu1 %v1529_v12 }
 0x4c6   :  { %3438 = vrcp.f32 %v1504_v33  ;;  %1622 = vmatpush1.bf16.msra.mxu0 %v4269_v22  ;;  %1663 = vmatpush1.bf16.msra.mxu1 %v4276_v49  ;;  %v3435_v22 = vpop.eup %3434  ;;  %v5447_v33 = vld [vmem:[#allocation47_spill] sm:$0xff] }
 0x4c7   :  { %3440 = vrcp.f32 %v1510_v46  ;;  %1623 = vmatprep.subr.bf16.mxu0 %v4273_v43  ;;  %1664 = vmatprep.subr.bf16.mxu1 %v4279_v14  ;;  %v3437_v43 = vpop.eup %3436 }
 0x4c8   :  { %1653 = vmatprep.mubr.bf16.mxu0 %v5322_v8  ;;  %1694 = vmatprep.mubr.bf16.mxu1 %v5322_v8 }
 0x4ca   :  { %1624 = vmatpush1.bf16.msra.mxu0 %v4282_v11  ;;  %1665 = vmatpush1.bf16.msra.mxu1 %v4294_v57  ;;  %v1517_v11 = vadd.f32 1.0, %v3435_v22 }
 0x4cb   :  { %1625 = vmatprep.subr.bf16.mxu0 %v4286_v28  ;;  %1666 = vmatprep.subr.bf16.mxu1 %v4297_v36  ;;  %v4623_v36 = vld [vmem:[#allocation4 + $0x18] sm:$0xff] }
 0x4cc   :  { %3442 = vrcp.f32 %v1517_v11 }
 0x4ce   :  { %1626 = vmatpush1.bf16.msra.mxu0 %v4300_v32  ;;  %1667 = vmatpush1.bf16.msra.mxu1 %v4306_v40  ;;  %v4620_v32 = vld [vmem:[#allocation4 + $0x8] sm:$0xff] }
 0x4cf   :  { %1627 = vmatprep.subr.bf16.mxu0 %v4302_v37  ;;  %1668 = vmatprep.subr.bf16.mxu1 %v4309_v7 }
 0x4d0   :  { %v3439_v14 = vpop.eup %3438 }
 0x4d1   :  { %v3441_v49 = vpop.eup %3440  ;;  %v1521_v44 = vmul.f32 %v3439_v14, %v3437_v43  ;;  %v5448_v43 = vld [vmem:[#allocation45_spill] sm:$0xff] }
 0x4d2   :  { %v1520_v57 = vmul.f32 %v3441_v49, %v4519_v31  ;;  %1628 = vmatpush1.bf16.msra.mxu0 %v5356_v61  ;;  %1669 = vmatpush1.bf16.msra.mxu1 %v5357_v17  ;;  %v4652_v61 = vld [vmem:[#allocation4 + $0x40] sm:$0xff]  ;;  %v4655_v17 = vld [vmem:[#allocation4 + $0x50] sm:$0xff] }
 0x4d3   :  { %1629 = vmatprep.subr.bf16.mxu0 %v5358_v48  ;;  %1670 = vmatprep.subr.bf16.mxu1 %v5359_v20  ;;  %5421 = vst [vmem:[#allocation103_spill] sm:$0xff] %v4652_v61  ;;  %5422 = vst [vmem:[#allocation105_spill] sm:$0xff] %v4655_v17  ;;  %v4658_v48 = vld [vmem:[#allocation4 + $0x68] sm:$0xff]  ;;  %v4661_v20 = vld [vmem:[#allocation4 + $0x78] sm:$0xff] }
 0x4d4   :  { %v4603_v28 = vadd.f32 %v1521_v44, %v1520_v57  ;;  %5423 = vst [vmem:[#allocation104_spill] sm:$0xff] %v4658_v48  ;;  %5424 = vst [vmem:[#allocation106_spill] sm:$0xff] %v4661_v20  ;;  %v4679_v31 = vld [vmem:[#allocation4 + $0x90] sm:$0xff] }
 0x4d5   :  { %5430 = vst [vmem:[#allocation26_spill] sm:$0xff] %v4679_v31 }
 0x4d6   :  { %1630 = vmatpush1.bf16.msra.mxu0 %v5360_v54  ;;  %1671 = vmatpush1.bf16.msra.mxu1 %v4330_v30  ;;  %3444 = vtanh.f32 %v4603_v28  ;;  %v3443_v7 = vpop.eup %3442  ;;  %v4664_v54 = vld [vmem:[#allocation4 + $0x60] sm:$0xff] }
 0x4d7   :  { %1631 = vmatprep.subr.bf16.mxu0 %v5361_v55  ;;  %1672 = vmatprep.subr.bf16.mxu1 %v5362_v60  ;;  %5425 = vst [vmem:[#allocation107_spill] sm:$0xff] %v4664_v54  ;;  %v4667_v55 = vld [vmem:[#allocation4 + $0x70] sm:$0xff]  ;;  %v4670_v60 = vld [vmem:[#allocation4 + $0x88] sm:$0xff] }
 0x4d8   :  { %5426 = vst [vmem:[#allocation108_spill] sm:$0xff] %v4667_v55  ;;  %5427 = vst [vmem:[#allocation109_spill] sm:$0xff] %v4670_v60 }
 0x4da   :  { %1632 = vmatpush1.bf16.msra.mxu0 %v5363_v34  ;;  %1673 = vmatpush1.bf16.msra.mxu1 %v4342_v10  ;;  %v4646_v10 = vld [vmem:[#allocation4 + $0x48] sm:$0xff]  ;;  %v4673_v34 = vld [vmem:[#allocation4 + $0x98] sm:$0xff] }
 0x4db   :  { %1633 = vmatprep.subr.bf16.mxu0 %v5364_v5  ;;  %1674 = vmatprep.subr.bf16.mxu1 %v4345_v19  ;;  %v4649_v19 = vld [vmem:[#allocation4 + $0x58] sm:$0xff]  ;;  %5428 = vst [vmem:[#allocation110_spill] sm:$0xff] %v4673_v34  ;;  %v4676_v5 = vld [vmem:[#allocation4 + $0x80] sm:$0xff] }
 0x4dc   :  { %5429 = vst [vmem:[#allocation111_spill] sm:$0xff] %v4676_v5 }
 0x4de   :  { %1634 = vmatpush1.bf16.msra.mxu0 %v4348_v3  ;;  %1675 = vmatpush1.bf16.msra.mxu1 %v4354_v26  ;;  %v4640_v26 = vld [vmem:[#allocation4 + $0x20] sm:$0xff]  ;;  %v4643_v3 = vld [vmem:[#allocation4 + $0x30] sm:$0xff] }
 0x4df   :  { %1635 = vmatprep.subr.bf16.mxu0 %v4350_v13  ;;  %1676 = vmatprep.subr.bf16.mxu1 %v4357_v59  ;;  %v4626_v13 = vld [vmem:[#allocation4] sm:$0xff]  ;;  %v4629_v59 = vld [vmem:[#allocation4 + $0x10] sm:$0xff] }
 0x4e0   :  { %v3445_v30 = vpop.eup %3444 }
 0x4e1   :  { %v1524_v37 = vmul.f32 %v3445_v30, %v3443_v7 }
 0x4e2   :  { %1636 = vmatpush1.bf16.msra.mxu0 %v4360_v56  ;;  %1677 = vmatpush1.bf16.msra.mxu1 %v4364_v2  ;;  %v4632_v56 = vld [vmem:[#allocation4 + $0x28] sm:$0xff]  ;;  %v4635_v2 = vld [vmem:[#allocation4 + $0x38] sm:$0xff] }
 0x4e3   :  { %v1620_v40 = vpack.c.bf16 %v1524_v37, %v1524_v37  ;;  %1760 = vmatprep.subr.bf16.mxu0 %v4620_v32  ;;  %1801 = vmatprep.subr.bf16.mxu1 %v4623_v36 }
 0x4e5   :  { %1654 = vmatmul.mubr.bf16.vlgmr.msra.gmra.mrb[52].mxu0 %v1620_v40  ;;  %1695 = vmatmul.mubr.bf16.vlgmr.msra.gmra.mrb[68].mxu1 %v1620_v40 }
 0x4e6   :  { %1761 = vmatpush1.bf16.msra.mxu0 %v4626_v13  ;;  %1802 = vmatpush1.bf16.msra.mxu1 %v4629_v59 }
 0x4e7   :  { %1762 = vmatprep.subr.bf16.mxu0 %v4632_v56  ;;  %1803 = vmatprep.subr.bf16.mxu1 %v4635_v2 }
 0x4e8   :  { %1792 = vmatprep.mubr.bf16.mxu0 %v5322_v8  ;;  %1833 = vmatprep.mubr.bf16.mxu1 %v5322_v8 }
 0x4ea   :  { %1763 = vmatpush1.bf16.msra.mxu0 %v4640_v26  ;;  %1804 = vmatpush1.bf16.msra.mxu1 %v4643_v3 }
 0x4eb   :  { %1764 = vmatprep.subr.bf16.mxu0 %v4646_v10  ;;  %1805 = vmatprep.subr.bf16.mxu1 %v4649_v19 }
 0x4ee   :  { %1765 = vmatpush1.bf16.msra.mxu0 %v4652_v61  ;;  %1806 = vmatpush1.bf16.msra.mxu1 %v4655_v17 }
 0x4ef   :  { %1766 = vmatprep.subr.bf16.mxu0 %v4658_v48  ;;  %1807 = vmatprep.subr.bf16.mxu1 %v4661_v20 }
 0x4f2   :  { %1767 = vmatpush1.bf16.msra.mxu0 %v4664_v54  ;;  %1808 = vmatpush1.bf16.msra.mxu1 %v4667_v55 }
 0x4f3   :  { %1768 = vmatprep.subr.bf16.mxu0 %v4670_v60  ;;  %1809 = vmatprep.subr.bf16.mxu1 %v4673_v34 }
 0x4f6   :  { %1769 = vmatpush1.bf16.msra.mxu0 %v4676_v5  ;;  %1810 = vmatpush1.bf16.msra.mxu1 %v4679_v31 }
 0x4f7   :  { %1770 = vmatprep.subr.bf16.mxu0 %v4682_v63  ;;  %1811 = vmatprep.subr.bf16.mxu1 %v4685_v41 }
 0x4fa   :  { %1771 = vmatpush1.bf16.msra.mxu0 %v4688_v47  ;;  %1812 = vmatpush1.bf16.msra.mxu1 %v4691_v50 }
 0x4fb   :  { %1772 = vmatprep.subr.bf16.mxu0 %v4694_v21  ;;  %1813 = vmatprep.subr.bf16.mxu1 %v4697_v45 }
 0x4fe   :  { %1773 = vmatpush1.bf16.msra.mxu0 %v4700_v52  ;;  %1814 = vmatpush1.bf16.msra.mxu1 %v4703_v25 }
 0x4ff   :  { %1774 = vmatprep.subr.bf16.mxu0 %v4706_v51  ;;  %1815 = vmatprep.subr.bf16.mxu1 %v4709_v23 }
 0x502   :  { %1775 = vmatpush1.bf16.msra.mxu0 %v4712_v1  ;;  %1816 = vmatpush1.bf16.msra.mxu1 %v4715_v24 }
 0x503   :  { %1851 = vmatprep.subr.bf16.mxu0 %v4718_v29  ;;  %1892 = vmatprep.subr.bf16.mxu1 %v4721_v38 }
 0x598   :  { %v1564_v15 = vpop.f32.mrb[48].mxu0  ;;  %v1605_v16 = vpop.f32.mrb[64].mxu1 }
 0x599   :  { %v1612_v0 = vadd.f32 %v1564_v15, %v5445_v62  ;;  %v1566_v39 = vpop.f32.mrb[49].mxu0  ;;  %v1607_v18 = vpop.f32.mrb[65].mxu1  ;;  %v1614_v14 = vadd.f32 %v1605_v16, %v5448_v43 }
 0x59a   :  { %v1613_v35 = vadd.f32 %v1566_v39, %v5446_v53  ;;  %v1568_v27 = vpop.f32.mrb[50].mxu0  ;;  %v1609_v6 = vpop.f32.mrb[66].mxu1  ;;  %v1615_v46 = vadd.f32 %v1607_v18, %v5447_v33  ;;  %v5449_v53 = vld [vmem:[#allocation54_spill] sm:$0xff] }
 0x59b   :  { %v3103_v58 = vmul.f32 -1.442695, %v1612_v0  ;;  %v1569_v9 = vpop.f32.mrb[51].mxu0  ;;  %v1610_v12 = vpop.f32.mrb[67].mxu1 }
 0x59c   :  { %v3104_v4 = vmul.f32 -1.442695, %v1613_v35  ;;  %v3105_v22 = vmul.f32 -1.442695, %v1615_v46 }
 0x59d   :  { %3446 = vpow2.f32 %v3103_v58  ;;  %v5450_v58 = vld [vmem:[#allocation56_spill] sm:$0xff] }
 0x59e   :  { %3448 = vpow2.f32 %v3104_v4 }
 0x59f   :  { %3450 = vpow2.f32 %v3105_v22 }
 0x5a0   :  { %3452 = vtanh.f32 %v1614_v14 }
 0x5a7   :  { %v3447_v49 = vpop.eup %3446 }
 0x5a8   :  { %v3449_v44 = vpop.eup %3448  ;;  %v1710_v11 = vadd.f32 1.0, %v3447_v49 }
 0x5a9   :  { %v1716_v57 = vadd.f32 1.0, %v3449_v44  ;;  %v3451_v7 = vpop.eup %3450 }
 0x5aa   :  { %3454 = vrcp.f32 %v1710_v11  ;;  %v3453_v30 = vpop.eup %3452  ;;  %v1723_v62 = vadd.f32 1.0, %v3451_v7 }
 0x5ab   :  { %3456 = vrcp.f32 %v1716_v57  ;;  %v5452_v57 = vld [vmem:[#allocation73_spill] sm:$0xff] }
 0x5ac   :  { %3458 = vrcp.f32 %v1723_v62 }
 0x5b4   :  { %v3455_v37 = vpop.eup %3454 }
 0x5b5   :  { %v3457_v40 = vpop.eup %3456  ;;  %v1727_v15 = vmul.f32 %v3455_v37, %v3453_v30 }
 0x5b6   :  { %v1726_v0 = vmul.f32 %v3457_v40, %v4577_v42  ;;  %v5451_v42 = vld [vmem:[#allocation74_spill] sm:$0xff]  ;;  %v3459_v49 = vpop.eup %3458 }
 0x5b8   :  { %v4729_v39 = vadd.f32 %v1727_v15, %v1726_v0  ;;  %v1655_v18 = vpop.f32.mrb[52].mxu0  ;;  %v1696_v16 = vpop.f32.mrb[68].mxu1 }
 0x5b9   :  { %v1703_v35 = vadd.f32 %v1655_v18, %v5449_v53  ;;  %v1657_v27 = vpop.f32.mrb[53].mxu0  ;;  %v1698_v6 = vpop.f32.mrb[69].mxu1  ;;  %v1705_v7 = vadd.f32 %v1696_v16, %v5452_v57  ;;  %v4736_v18 = vld [vmem:[#allocation4 + $0x100] sm:$0xff]  ;;  %v4739_v53 = vld [vmem:[#allocation4 + $0x110] sm:$0xff]  ;;  %v4742_v16 = vld [vmem:[#allocation4 + $0x128] sm:$0xff] }
 0x5ba   :  { %v1704_v9 = vadd.f32 %v1657_v27, %v5450_v58  ;;  %v1659_v12 = vpop.f32.mrb[54].mxu0  ;;  %v1700_v4 = vpop.f32.mrb[70].mxu1  ;;  %3460 = vtanh.f32 %v4729_v39  ;;  %v1706_v14 = vadd.f32 %v1698_v6, %v5451_v42  ;;  %v4750_v27 = vld [vmem:[#allocation4 + $0x120] sm:$0xff]  ;;  %v4753_v6 = vld [vmem:[#allocation4 + $0x130] sm:$0xff]  ;;  %v4756_v58 = vld [vmem:[#allocation4 + $0x148] sm:$0xff] }
 0x5bb   :  { %v3106_v33 = vmul.f32 -1.442695, %v1703_v35  ;;  %v1660_v46 = vpop.f32.mrb[55].mxu0  ;;  %v1701_v22 = vpop.f32.mrb[71].mxu1  ;;  %v4745_v35 = vld [vmem:[#allocation4 + $0x138] sm:$0xff]  ;;  %v4762_v4 = vld [vmem:[#allocation4 + $0x140] sm:$0xff] }
 0x5bc   :  { %v3107_v43 = vmul.f32 -1.442695, %v1704_v9  ;;  %v3108_v11 = vmul.f32 -1.442695, %v1706_v14  ;;  %v4759_v9 = vld [vmem:[#allocation4 + $0x158] sm:$0xff]  ;;  %v4768_v22 = vld [vmem:[#allocation4 + $0x168] sm:$0xff] }
 0x5bd   :  { %3462 = vpow2.f32 %v3106_v33  ;;  %v4765_v33 = vld [vmem:[#allocation4 + $0x150] sm:$0xff]  ;;  %v4775_v57 = vld [vmem:[#allocation4 + $0x160] sm:$0xff] }
 0x5be   :  { %3464 = vpow2.f32 %v3107_v43  ;;  %v4771_v43 = vld [vmem:[#allocation4 + $0x178] sm:$0xff] }
 0x5bf   :  { %3466 = vpow2.f32 %v3108_v11 }
 0x5c0   :  { %3468 = vtanh.f32 %v1705_v7  ;;  %v4778_v7 = vld [vmem:[#allocation4 + $0x170] sm:$0xff] }
 0x5c4   :  { %v3461_v44 = vpop.eup %3460 }
 0x5c5   :  { %v1730_v30 = vmul.f32 %v3461_v44, %v3459_v49 }
 0x5c7   :  { %v3463_v37 = vpop.eup %3462  ;;  %v1759_v40 = vpack.c.bf16 %v1730_v30, %v1730_v30  ;;  %v4781_v30 = vld [vmem:[#allocation4 + $0x188] sm:$0xff] }
 0x5c8   :  { %v3465_v15 = vpop.eup %3464  ;;  %v1734_v62 = vadd.f32 1.0, %v3463_v37  ;;  %v4784_v37 = vld [vmem:[#allocation4 + $0x198] sm:$0xff] }
 0x5c9   :  { %v1740_v0 = vadd.f32 1.0, %v3465_v15  ;;  %1793 = vmatmul.mubr.bf16.vlgmr.msra.gmra.mrb[56].mxu0 %v1759_v40  ;;  %1834 = vmatmul.mubr.bf16.vlgmr.msra.gmra.mrb[72].mxu1 %v1759_v40  ;;  %v3467_v12 = vpop.eup %3466  ;;  %v4792_v15 = vld [vmem:[#allocation4 + $0x190] sm:$0xff] }
 0x5ca   :  { %3470 = vrcp.f32 %v1734_v62  ;;  %1852 = vmatpush1.bf16.msra.mxu0 %v4736_v18  ;;  %1893 = vmatpush1.bf16.msra.mxu1 %v4739_v53  ;;  %v3469_v46 = vpop.eup %3468  ;;  %v1747_v44 = vadd.f32 1.0, %v3467_v12  ;;  %v4796_v62 = vld [vmem:[#allocation4 + $0x1a8] sm:$0xff]  ;;  %v4802_v12 = vld [vmem:[#allocation4 + $0x1a0] sm:$0xff] }
 0x5cb   :  { %3472 = vrcp.f32 %v1740_v0  ;;  %1853 = vmatprep.subr.bf16.mxu0 %v4742_v16  ;;  %1894 = vmatprep.subr.bf16.mxu1 %v4745_v35  ;;  %v4799_v0 = vld [vmem:[#allocation4 + $0x1b8] sm:$0xff]  ;;  %5454 = vst [vmem:[#allocation87_spill] sm:$0xff] %v4802_v12 }
 0x5cc   :  { %1883 = vmatprep.mubr.bf16.mxu0 %v5322_v8  ;;  %1924 = vmatprep.mubr.bf16.mxu1 %v5322_v8  ;;  %3474 = vrcp.f32 %v1747_v44  ;;  %5453 = vst [vmem:[#allocation86_spill] sm:$0xff] %v4799_v0  ;;  %v4817_v44 = vld [vmem:[#allocation4 + $0x1d0] sm:$0xff] }
 0x5cd   :  { %5459 = vst [vmem:[#allocation93_spill] sm:$0xff] %v4817_v44 }
 0x5ce   :  { %1854 = vmatpush1.bf16.msra.mxu0 %v4750_v27  ;;  %1895 = vmatpush1.bf16.msra.mxu1 %v4753_v6 }
 0x5cf   :  { %1855 = vmatprep.subr.bf16.mxu0 %v4756_v58  ;;  %1896 = vmatprep.subr.bf16.mxu1 %v4759_v9 }
 0x5d2   :  { %1856 = vmatpush1.bf16.msra.mxu0 %v4762_v4  ;;  %1897 = vmatpush1.bf16.msra.mxu1 %v4765_v33 }
 0x5d3   :  { %1857 = vmatprep.subr.bf16.mxu0 %v4768_v22  ;;  %1898 = vmatprep.subr.bf16.mxu1 %v4771_v43 }
 0x5d4   :  { %v3471_v42 = vpop.eup %3470 }
 0x5d5   :  { %v3473_v14 = vpop.eup %3472  ;;  %v1751_v49 = vmul.f32 %v3471_v42, %v3469_v46  ;;  %v4805_v46 = vld [vmem:[#allocation4 + $0x1b0] sm:$0xff]  ;;  %v4808_v42 = vld [vmem:[#allocation4 + $0x1c8] sm:$0xff] }
 0x5d6   :  { %v1750_v11 = vmul.f32 %v3473_v14, %v4603_v28  ;;  %1858 = vmatpush1.bf16.msra.mxu0 %v4775_v57  ;;  %1899 = vmatpush1.bf16.msra.mxu1 %v4778_v7  ;;  %v4789_v28 = vld [vmem:[#allocation4 + $0x180] sm:$0xff]  ;;  %5455 = vst [vmem:[#allocation89_spill] sm:$0xff] %v4805_v46  ;;  %5456 = vst [vmem:[#allocation88_spill] sm:$0xff] %v4808_v42  ;;  %v4811_v14 = vld [vmem:[#allocation4 + $0x1d8] sm:$0xff] }
 0x5d7   :  { %1859 = vmatprep.subr.bf16.mxu0 %v4781_v30  ;;  %1900 = vmatprep.subr.bf16.mxu1 %v4784_v37  ;;  %5457 = vst [vmem:[#allocation90_spill] sm:$0xff] %v4811_v14 }
 0x5d8   :  { %v4787_v40 = vadd.f32 %v1751_v49, %v1750_v11  ;;  %v4814_v49 = vld [vmem:[#allocation4 + $0x1c0] sm:$0xff]  ;;  %v3475_v11 = vpop.eup %3474 }
 0x5d9   :  { %5458 = vst [vmem:[#allocation91_spill] sm:$0xff] %v4814_v49 }
 0x5da   :  { %1860 = vmatpush1.bf16.msra.mxu0 %v4789_v28  ;;  %1901 = vmatpush1.bf16.msra.mxu1 %v4792_v15  ;;  %3476 = vtanh.f32 %v4787_v40 }
 0x5db   :  { %1861 = vmatprep.subr.bf16.mxu0 %v4796_v62  ;;  %1902 = vmatprep.subr.bf16.mxu1 %v4799_v0 }
 0x5de   :  { %1862 = vmatpush1.bf16.msra.mxu0 %v4802_v12  ;;  %1903 = vmatpush1.bf16.msra.mxu1 %v4805_v46  ;;  %v4820_v12 = vld [vmem:[#allocation4 + $0x1e8] sm:$0xff]  ;;  %v4823_v46 = vld [vmem:[#allocation4 + $0x1f8] sm:$0xff] }
 0x5df   :  { %1863 = vmatprep.subr.bf16.mxu0 %v4808_v42  ;;  %1904 = vmatprep.subr.bf16.mxu1 %v4811_v14  ;;  %v4826_v14 = vld [vmem:[#allocation4 + $0x1e0] sm:$0xff] }
 0x5e2   :  { %1864 = vmatpush1.bf16.msra.mxu0 %v4814_v49  ;;  %1905 = vmatpush1.bf16.msra.mxu1 %v4817_v44  ;;  %v4829_v49 = vld [vmem:[#allocation4 + $0x1f0] sm:$0xff] }
 0x5e3   :  { %1865 = vmatprep.subr.bf16.mxu0 %v4820_v12  ;;  %1906 = vmatprep.subr.bf16.mxu1 %v4823_v46 }
 0x5e4   :  { %v3477_v42 = vpop.eup %3476 }
 0x5e5   :  { %v1754_v0 = vmul.f32 %v3477_v42, %v3475_v11 }
 0x5e6   :  { %1866 = vmatpush1.bf16.msra.mxu0 %v4826_v14  ;;  %1907 = vmatpush1.bf16.msra.mxu1 %v4829_v49 }
 0x5e7   :  { %v1850_v44 = vpack.c.bf16 %v1754_v0, %v1754_v0  ;;  %1990 = vmatprep.subr.bf16.mxu0 %v4620_v32  ;;  %2031 = vmatprep.subr.bf16.mxu1 %v4623_v36 }
 0x5e9   :  { %1884 = vmatmul.mubr.bf16.vlgmr.msra.gmra.mrb[60].mxu0 %v1850_v44  ;;  %1925 = vmatmul.mubr.bf16.vlgmr.msra.gmra.mrb[76].mxu1 %v1850_v44  ;;  %v5460_v44 = vld [vmem:[#allocation23_spill] sm:$0xff] }
 0x5ea   :  { %1991 = vmatpush1.bf16.msra.mxu0 %v4626_v13  ;;  %2032 = vmatpush1.bf16.msra.mxu1 %v4629_v59 }
 0x5eb   :  { %1992 = vmatprep.subr.bf16.mxu0 %v4632_v56  ;;  %2033 = vmatprep.subr.bf16.mxu1 %v4635_v2 }
 0x5ec   :  { %2022 = vmatprep.mubr.bf16.mxu0 %v5322_v8  ;;  %2063 = vmatprep.mubr.bf16.mxu1 %v5322_v8 }
 0x5ee   :  { %1993 = vmatpush1.bf16.msra.mxu0 %v4640_v26  ;;  %2034 = vmatpush1.bf16.msra.mxu1 %v4643_v3 }
 0x5ef   :  { %1994 = vmatprep.subr.bf16.mxu0 %v4646_v10  ;;  %2035 = vmatprep.subr.bf16.mxu1 %v4649_v19 }
 0x5f2   :  { %1995 = vmatpush1.bf16.msra.mxu0 %v4652_v61  ;;  %2036 = vmatpush1.bf16.msra.mxu1 %v4655_v17 }
 0x5f3   :  { %1996 = vmatprep.subr.bf16.mxu0 %v4658_v48  ;;  %2037 = vmatprep.subr.bf16.mxu1 %v4661_v20 }
 0x5f6   :  { %1997 = vmatpush1.bf16.msra.mxu0 %v4664_v54  ;;  %2038 = vmatpush1.bf16.msra.mxu1 %v4667_v55 }
 0x5f7   :  { %1998 = vmatprep.subr.bf16.mxu0 %v4670_v60  ;;  %2039 = vmatprep.subr.bf16.mxu1 %v4673_v34 }
 0x5fa   :  { %1999 = vmatpush1.bf16.msra.mxu0 %v4676_v5  ;;  %2040 = vmatpush1.bf16.msra.mxu1 %v4679_v31 }
 0x5fb   :  { %2000 = vmatprep.subr.bf16.mxu0 %v4682_v63  ;;  %2041 = vmatprep.subr.bf16.mxu1 %v4685_v41 }
 0x5fe   :  { %2001 = vmatpush1.bf16.msra.mxu0 %v4688_v47  ;;  %2042 = vmatpush1.bf16.msra.mxu1 %v4691_v50 }
 0x5ff   :  { %2002 = vmatprep.subr.bf16.mxu0 %v4694_v21  ;;  %2043 = vmatprep.subr.bf16.mxu1 %v4697_v45  ;;  %v5461_v21 = vld [vmem:[#allocation24_spill] sm:$0xff] }
 0x602   :  { %2003 = vmatpush1.bf16.msra.mxu0 %v4700_v52  ;;  %2044 = vmatpush1.bf16.msra.mxu1 %v4703_v25 }
 0x603   :  { %2004 = vmatprep.subr.bf16.mxu0 %v4706_v51  ;;  %2045 = vmatprep.subr.bf16.mxu1 %v4709_v23 }
 0x606   :  { %2005 = vmatpush1.bf16.msra.mxu0 %v4712_v1  ;;  %2046 = vmatpush1.bf16.msra.mxu1 %v4715_v24  ;;  %v5462_v24 = vld [vmem:[#allocation52_spill] sm:$0xff] }
 0x607   :  { %2081 = vmatprep.subr.bf16.mxu0 %v4718_v29  ;;  %2122 = vmatprep.subr.bf16.mxu1 %v4721_v38  ;;  %v5463_v38 = vld [vmem:[#allocation51_spill] sm:$0xff] }
 0x69c   :  { %v1794_v0 = vpop.f32.mrb[56].mxu0  ;;  %v1835_v42 = vpop.f32.mrb[72].mxu1 }
 0x69d   :  { %v1842_v11 = vadd.f32 %v1794_v0, %v5460_v44  ;;  %v1796_v45 = vpop.f32.mrb[57].mxu0  ;;  %v1837_v52 = vpop.f32.mrb[73].mxu1  ;;  %v1844_v31 = vadd.f32 %v1835_v42, %v5463_v38 }
 0x69e   :  { %v1843_v25 = vadd.f32 %v1796_v45, %v5461_v21  ;;  %v1798_v50 = vpop.f32.mrb[58].mxu0  ;;  %v1839_v51 = vpop.f32.mrb[74].mxu1  ;;  %v1845_v29 = vadd.f32 %v1837_v52, %v5462_v24  ;;  %v5464_v24 = vld [vmem:[#allocation49_spill] sm:$0xff] }
 0x69f   :  { %v3109_v47 = vmul.f32 -1.442695, %v1842_v11  ;;  %v1799_v23 = vpop.f32.mrb[59].mxu0  ;;  %v1840_v41 = vpop.f32.mrb[75].mxu1 }
 0x6a0   :  { %v3110_v1 = vmul.f32 -1.442695, %v1843_v25  ;;  %v3111_v63 = vmul.f32 -1.442695, %v1845_v29 }
 0x6a1   :  { %3478 = vpow2.f32 %v3109_v47 }
 0x6a2   :  { %3480 = vpow2.f32 %v3110_v1 }
 0x6a3   :  { %3482 = vpow2.f32 %v3111_v63 }
 0x6a4   :  { %3484 = vtanh.f32 %v1844_v31 }
 0x6ab   :  { %v3479_v5 = vpop.eup %3478 }
 0x6ac   :  { %v3481_v34 = vpop.eup %3480  ;;  %v1940_v0 = vadd.f32 1.0, %v3479_v5 }
 0x6ad   :  { %v1946_v44 = vadd.f32 1.0, %v3481_v34  ;;  %v3483_v50 = vpop.eup %3482  ;;  %v5465_v34 = vld [vmem:[#allocation50_spill] sm:$0xff] }
 0x6ae   :  { %3486 = vrcp.f32 %v1940_v0  ;;  %v3485_v21 = vpop.eup %3484  ;;  %v1953_v47 = vadd.f32 1.0, %v3483_v50 }
 0x6af   :  { %3488 = vrcp.f32 %v1946_v44 }
 0x6b0   :  { %3490 = vrcp.f32 %v1953_v47  ;;  %v5467_v47 = vld [vmem:[#allocation71_spill] sm:$0xff] }
 0x6b8   :  { %v3487_v45 = vpop.eup %3486 }
 0x6b9   :  { %v3489_v41 = vpop.eup %3488  ;;  %v1957_v25 = vmul.f32 %v3487_v45, %v3485_v21 }
 0x6ba   :  { %v1956_v51 = vmul.f32 %v3489_v41, %v4729_v39  ;;  %v5466_v39 = vld [vmem:[#allocation72_spill] sm:$0xff]  ;;  %v3491_v45 = vpop.eup %3490 }
 0x6bc   :  { %v4873_v52 = vadd.f32 %v1957_v25, %v1956_v51  ;;  %v1885_v23 = vpop.f32.mrb[60].mxu0  ;;  %v1926_v1 = vpop.f32.mrb[76].mxu1 }
 0x6bd   :  { %v1933_v5 = vadd.f32 %v1885_v23, %v5464_v24  ;;  %v1887_v63 = vpop.f32.mrb[61].mxu0  ;;  %v1928_v31 = vpop.f32.mrb[77].mxu1  ;;  %v1935_v51 = vadd.f32 %v1926_v1, %v5467_v47  ;;  %v5474_v47 = vld [vmem:[#allocation93_spill] sm:$0xff] }
 0x6be   :  { %v1934_v29 = vadd.f32 %v1887_v63, %v5465_v34  ;;  %v1889_v38 = vpop.f32.mrb[62].mxu0  ;;  %v1930_v42 = vpop.f32.mrb[78].mxu1  ;;  %3492 = vtanh.f32 %v4873_v52  ;;  %v1936_v21 = vadd.f32 %v1928_v31, %v5466_v39  ;;  %v5469_v39 = vld [vmem:[#allocation87_spill] sm:$0xff] }
 0x6bf   :  { %v3112_v11 = vmul.f32 -1.442695, %v1933_v5  ;;  %v1890_v0 = vpop.f32.mrb[63].mxu0  ;;  %v1931_v44 = vpop.f32.mrb[79].mxu1 }
 0x6c0   :  { %v3113_v50 = vmul.f32 -1.442695, %v1934_v29  ;;  %v3114_v25 = vmul.f32 -1.442695, %v1936_v21  ;;  %v5470_v21 = vld [vmem:[#allocation89_spill] sm:$0xff] }
 0x6c1   :  { %3494 = vpow2.f32 %v3112_v11 }
 0x6c2   :  { %3496 = vpow2.f32 %v3113_v50 }
 0x6c3   :  { %3498 = vpow2.f32 %v3114_v25  ;;  %v5473_v25 = vld [vmem:[#allocation91_spill] sm:$0xff] }
 0x6c4   :  { %3500 = vtanh.f32 %v1935_v51 }
 0x6c8   :  { %v3493_v41 = vpop.eup %3492 }
 0x6c9   :  { %v1960_v23 = vmul.f32 %v3493_v41, %v3491_v45  ;;  %v5471_v45 = vld [vmem:[#allocation88_spill] sm:$0xff]  ;;  %v5472_v41 = vld [vmem:[#allocation90_spill] sm:$0xff] }
 0x6cb   :  { %v3495_v24 = vpop.eup %3494  ;;  %v1989_v63 = vpack.c.bf16 %v1960_v23, %v1960_v23 }
 0x6cc   :  { %v3497_v34 = vpop.eup %3496  ;;  %v1964_v38 = vadd.f32 1.0, %v3495_v24 }
 0x6cd   :  { %v1970_v5 = vadd.f32 1.0, %v3497_v34  ;;  %2023 = vmatmul.mubr.bf16.vlgmr.msra.gmra.mrb[64].mxu0 %v1989_v63  ;;  %2064 = vmatmul.mubr.bf16.vlgmr.msra.gmra.mrb[80].mxu1 %v1989_v63  ;;  %v3499_v1 = vpop.eup %3498  ;;  %v5475_v34 = vld [vmem:[#allocation110_spill] sm:$0xff] }
 0x6ce   :  { %3502 = vrcp.f32 %v1964_v38  ;;  %2082 = vmatpush1.bf16.msra.mxu0 %v4736_v18  ;;  %2123 = vmatpush1.bf16.msra.mxu1 %v4739_v53  ;;  %v3501_v31 = vpop.eup %3500  ;;  %v1977_v0 = vadd.f32 1.0, %v3499_v1  ;;  %v5476_v38 = vld [vmem:[#allocation111_spill] sm:$0xff]  ;;  %v5478_v1 = vld [vmem:[#allocation28_spill] sm:$0xff] }
 0x6cf   :  { %3504 = vrcp.f32 %v1970_v5  ;;  %2083 = vmatprep.subr.bf16.mxu0 %v4742_v16  ;;  %2124 = vmatprep.subr.bf16.mxu1 %v4745_v35  ;;  %v5477_v5 = vld [vmem:[#allocation26_spill] sm:$0xff] }
 0x6d0   :  { %2113 = vmatprep.mubr.bf16.mxu0 %v5322_v8  ;;  %2154 = vmatprep.mubr.bf16.mxu1 %v5322_v8  ;;  %3506 = vrcp.f32 %v1977_v0  ;;  %v5483_v0 = vld [vmem:[#allocation78_spill] sm:$0xff] }
 0x6d2   :  { %2084 = vmatpush1.bf16.msra.mxu0 %v4750_v27  ;;  %2125 = vmatpush1.bf16.msra.mxu1 %v4753_v6 }
 0x6d3   :  { %2085 = vmatprep.subr.bf16.mxu0 %v4756_v58  ;;  %2126 = vmatprep.subr.bf16.mxu1 %v4759_v9 }
 0x6d6   :  { %2086 = vmatpush1.bf16.msra.mxu0 %v4762_v4  ;;  %2127 = vmatpush1.bf16.msra.mxu1 %v4765_v33 }
 0x6d7   :  { %2087 = vmatprep.subr.bf16.mxu0 %v4768_v22  ;;  %2128 = vmatprep.subr.bf16.mxu1 %v4771_v43 }
 0x6d8   :  { %v3503_v29 = vpop.eup %3502 }
 0x6d9   :  { %v3505_v42 = vpop.eup %3504  ;;  %v1981_v11 = vmul.f32 %v3503_v29, %v3501_v31  ;;  %v5479_v31 = vld [vmem:[#allocation39_spill] sm:$0xff]  ;;  %v5480_v29 = vld [vmem:[#allocation37_spill] sm:$0xff] }
 0x6da   :  { %v1980_v44 = vmul.f32 %v3505_v42, %v4787_v40  ;;  %2088 = vmatpush1.bf16.msra.mxu0 %v4775_v57  ;;  %2129 = vmatpush1.bf16.msra.mxu1 %v4778_v7  ;;  %v5468_v40 = vld [vmem:[#allocation86_spill] sm:$0xff]  ;;  %v3507_v51 = vpop.eup %3506 }
 0x6db   :  { %2089 = vmatprep.subr.bf16.mxu0 %v4781_v30  ;;  %2130 = vmatprep.subr.bf16.mxu1 %v4784_v37  ;;  %v5481_v42 = vld [vmem:[#allocation62_spill] sm:$0xff] }
 0x6dc   :  { %v4899_v50 = vadd.f32 %v1981_v11, %v1980_v44  ;;  %v5482_v11 = vld [vmem:[#allocation64_spill] sm:$0xff]  ;;  %v5484_v44 = vld [vmem:[#allocation77_spill] sm:$0xff] }
 0x6de   :  { %2090 = vmatpush1.bf16.msra.mxu0 %v4789_v28  ;;  %2131 = vmatpush1.bf16.msra.mxu1 %v4792_v15  ;;  %3508 = vtanh.f32 %v4899_v50 }
 0x6df   :  { %2091 = vmatprep.subr.bf16.mxu0 %v4796_v62  ;;  %2132 = vmatprep.subr.bf16.mxu1 %v5468_v40 }
 0x6e2   :  { %2092 = vmatpush1.bf16.msra.mxu0 %v5469_v39  ;;  %2133 = vmatpush1.bf16.msra.mxu1 %v5470_v21 }
 0x6e3   :  { %2093 = vmatprep.subr.bf16.mxu0 %v5471_v45  ;;  %2134 = vmatprep.subr.bf16.mxu1 %v5472_v41 }
 0x6e6   :  { %2094 = vmatpush1.bf16.msra.mxu0 %v5473_v25  ;;  %2135 = vmatpush1.bf16.msra.mxu1 %v5474_v47 }
 0x6e7   :  { %2095 = vmatprep.subr.bf16.mxu0 %v4820_v12  ;;  %2136 = vmatprep.subr.bf16.mxu1 %v4823_v46 }
 0x6e8   :  { %v3509_v23 = vpop.eup %3508 }
 0x6e9   :  { %v1984_v24 = vmul.f32 %v3509_v23, %v3507_v51  ;;  %v5485_v51 = vld [vmem:[#allocation79_spill] sm:$0xff]  ;;  %v5486_v23 = vld [vmem:[#allocation81_spill] sm:$0xff] }
 0x6ea   :  { %2096 = vmatpush1.bf16.msra.mxu0 %v4826_v14  ;;  %2137 = vmatpush1.bf16.msra.mxu1 %v4829_v49 }
 0x6eb   :  { %v2080_v63 = vpack.c.bf16 %v1984_v24, %v1984_v24  ;;  %2220 = vmatprep.subr.bf16.mxu0 %v4620_v32  ;;  %2261 = vmatprep.subr.bf16.mxu1 %v4623_v36  ;;  %v5487_v24 = vld [vmem:[#allocation80_spill] sm:$0xff] }
 0x6ed   :  { %2114 = vmatmul.mubr.bf16.vlgmr.msra.gmra.mrb[68].mxu0 %v2080_v63  ;;  %2155 = vmatmul.mubr.bf16.vlgmr.msra.gmra.mrb[84].mxu1 %v2080_v63  ;;  %v5488_v63 = vld [vmem:[#allocation82_spill] sm:$0xff] }
 0x6ee   :  { %2221 = vmatpush1.bf16.msra.mxu0 %v4626_v13  ;;  %2262 = vmatpush1.bf16.msra.mxu1 %v4629_v59 }
 0x6ef   :  { %2222 = vmatprep.subr.bf16.mxu0 %v4632_v56  ;;  %2263 = vmatprep.subr.bf16.mxu1 %v4635_v2 }
 0x6f0   :  { %2252 = vmatprep.mubr.bf16.mxu0 %v5322_v8  ;;  %2293 = vmatprep.mubr.bf16.mxu1 %v5322_v8 }
 0x6f2   :  { %2223 = vmatpush1.bf16.msra.mxu0 %v4640_v26  ;;  %2264 = vmatpush1.bf16.msra.mxu1 %v4643_v3 }
 0x6f3   :  { %2224 = vmatprep.subr.bf16.mxu0 %v4646_v10  ;;  %2265 = vmatprep.subr.bf16.mxu1 %v4649_v19 }
 0x6f6   :  { %2225 = vmatpush1.bf16.msra.mxu0 %v4652_v61  ;;  %2266 = vmatpush1.bf16.msra.mxu1 %v4655_v17 }
 0x6f7   :  { %2226 = vmatprep.subr.bf16.mxu0 %v4658_v48  ;;  %2267 = vmatprep.subr.bf16.mxu1 %v4661_v20 }
 0x6fa   :  { %2227 = vmatpush1.bf16.msra.mxu0 %v4664_v54  ;;  %2268 = vmatpush1.bf16.msra.mxu1 %v4667_v55 }
 0x6fb   :  { %2228 = vmatprep.subr.bf16.mxu0 %v4670_v60  ;;  %2269 = vmatprep.subr.bf16.mxu1 %v5475_v34  ;;  %v5493_v34 = vld [vmem:[#allocation27_spill] sm:$0xff] }
 0x6fe   :  { %2229 = vmatpush1.bf16.msra.mxu0 %v5476_v38  ;;  %2270 = vmatpush1.bf16.msra.mxu1 %v5477_v5  ;;  %v5492_v5 = vld [vmem:[#allocation25_spill] sm:$0xff] }
 0x6ff   :  { %2230 = vmatprep.subr.bf16.mxu0 %v5478_v1  ;;  %2271 = vmatprep.subr.bf16.mxu1 %v5479_v31  ;;  %v5489_v1 = vld [vmem:[#allocation83_spill] sm:$0xff]  ;;  %v5490_v31 = vld [vmem:[#allocation85_spill] sm:$0xff] }
 0x702   :  { %2231 = vmatpush1.bf16.msra.mxu0 %v5480_v29  ;;  %2272 = vmatpush1.bf16.msra.mxu1 %v5481_v42  ;;  %v5491_v29 = vld [vmem:[#allocation84_spill] sm:$0xff] }
 0x703   :  { %2232 = vmatprep.subr.bf16.mxu0 %v5482_v11  ;;  %2273 = vmatprep.subr.bf16.mxu1 %v5483_v0 }
 0x706   :  { %2233 = vmatpush1.bf16.msra.mxu0 %v5484_v44  ;;  %2274 = vmatpush1.bf16.msra.mxu1 %v5485_v51 }
 0x707   :  { %2234 = vmatprep.subr.bf16.mxu0 %v5486_v23  ;;  %2275 = vmatprep.subr.bf16.mxu1 %v5487_v24 }
 0x70a   :  { %2235 = vmatpush1.bf16.msra.mxu0 %v5488_v63  ;;  %2276 = vmatpush1.bf16.msra.mxu1 %v5489_v1  ;;  %v5494_v1 = vld [vmem:[#allocation55_spill] sm:$0xff] }
 0x70b   :  { %2311 = vmatprep.subr.bf16.mxu0 %v5490_v31  ;;  %2352 = vmatprep.subr.bf16.mxu1 %v5491_v29  ;;  %v5495_v29 = vld [vmem:[#allocation53_spill] sm:$0xff] }
 0x7a0   :  { %v2024_v42 = vpop.f32.mrb[64].mxu0  ;;  %v2065_v11 = vpop.f32.mrb[80].mxu1 }
 0x7a1   :  { %v2072_v0 = vadd.f32 %v2024_v42, %v5492_v5  ;;  %v2026_v38 = vpop.f32.mrb[65].mxu0  ;;  %v2067_v44 = vpop.f32.mrb[81].mxu1  ;;  %v2074_v48 = vadd.f32 %v2065_v11, %v5495_v29  ;;  %v5496_v11 = vld [vmem:[#allocation46_spill] sm:$0xff] }
 0x7a2   :  { %v2073_v51 = vadd.f32 %v2026_v38, %v5493_v34  ;;  %v2028_v60 = vpop.f32.mrb[66].mxu0  ;;  %v2069_v23 = vpop.f32.mrb[82].mxu1  ;;  %v2075_v31 = vadd.f32 %v2067_v44, %v5494_v1 }
 0x7a3   :  { %v3115_v55 = vmul.f32 -1.442695, %v2072_v0  ;;  %v2029_v24 = vpop.f32.mrb[67].mxu0  ;;  %v2070_v54 = vpop.f32.mrb[83].mxu1 }
 0x7a4   :  { %v3116_v63 = vmul.f32 -1.442695, %v2073_v51  ;;  %v3117_v20 = vmul.f32 -1.442695, %v2075_v31 }
 0x7a5   :  { %3510 = vpow2.f32 %v3115_v55 }
 0x7a6   :  { %3512 = vpow2.f32 %v3116_v63 }
 0x7a7   :  { %3514 = vpow2.f32 %v3117_v20 }
 0x7a8   :  { %3516 = vtanh.f32 %v2074_v48 }
 0x7af   :  { %v3511_v17 = vpop.eup %3510 }
 0x7b0   :  { %v3513_v61 = vpop.eup %3512  ;;  %v2170_v5 = vadd.f32 1.0, %v3511_v17 }
 0x7b1   :  { %v2176_v42 = vadd.f32 1.0, %v3513_v61  ;;  %v3515_v60 = vpop.eup %3514  ;;  %v5497_v61 = vld [vmem:[#allocation48_spill] sm:$0xff] }
 0x7b2   :  { %3518 = vrcp.f32 %v2170_v5  ;;  %v3517_v34 = vpop.eup %3516  ;;  %v2183_v55 = vadd.f32 1.0, %v3515_v60 }
 0x7b3   :  { %3520 = vrcp.f32 %v2176_v42 }
 0x7b4   :  { %3522 = vrcp.f32 %v2183_v55  ;;  %v5499_v55 = vld [vmem:[#allocation69_spill] sm:$0xff] }
 0x7bc   :  { %v3519_v38 = vpop.eup %3518 }
 0x7bd   :  { %v3521_v54 = vpop.eup %3520  ;;  %v2187_v0 = vmul.f32 %v3519_v38, %v3517_v34 }
 0x7be   :  { %v2186_v51 = vmul.f32 %v3521_v54, %v4873_v52  ;;  %v5498_v52 = vld [vmem:[#allocation70_spill] sm:$0xff]  ;;  %v3523_v38 = vpop.eup %3522 }
 0x7c0   :  { %v4957_v1 = vadd.f32 %v2187_v0, %v2186_v51  ;;  %v2115_v31 = vpop.f32.mrb[68].mxu0  ;;  %v2156_v29 = vpop.f32.mrb[84].mxu1 }
 0x7c1   :  { %v2163_v17 = vadd.f32 %v2115_v31, %v5496_v11  ;;  %v2117_v20 = vpop.f32.mrb[69].mxu0  ;;  %v2158_v48 = vpop.f32.mrb[85].mxu1  ;;  %v2165_v51 = vadd.f32 %v2156_v29, %v5499_v55  ;;  %v5512_v55 = vld [vmem:[#allocation37_spill] sm:$0xff] }
 0x7c2   :  { %v2164_v44 = vadd.f32 %v2117_v20, %v5497_v61  ;;  %v2119_v23 = vpop.f32.mrb[70].mxu0  ;;  %v2160_v24 = vpop.f32.mrb[86].mxu1  ;;  %3524 = vtanh.f32 %v4957_v1  ;;  %v2166_v34 = vadd.f32 %v2158_v48, %v5498_v52 }
 0x7c3   :  { %v3118_v63 = vmul.f32 -1.442695, %v2163_v17  ;;  %v2120_v5 = vpop.f32.mrb[71].mxu0  ;;  %v2161_v42 = vpop.f32.mrb[87].mxu1 }
 0x7c4   :  { %v3119_v60 = vmul.f32 -1.442695, %v2164_v44  ;;  %v3120_v0 = vmul.f32 -1.442695, %v2166_v34 }
 0x7c5   :  { %3526 = vpow2.f32 %v3118_v63 }
 0x7c6   :  { %3528 = vpow2.f32 %v3119_v60 }
 0x7c7   :  { %3530 = vpow2.f32 %v3120_v0  ;;  %v5511_v0 = vld [vmem:[#allocation39_spill] sm:$0xff] }
 0x7c8   :  { %3532 = vtanh.f32 %v2165_v51  ;;  %v5513_v51 = vld [vmem:[#allocation62_spill] sm:$0xff] }
 0x7cc   :  { %v3525_v54 = vpop.eup %3524 }
 0x7cd   :  { %v2190_v31 = vmul.f32 %v3525_v54, %v3523_v38  ;;  %v5506_v54 = vld [vmem:[#allocation109_spill] sm:$0xff] }
 0x7cf   :  { %v3527_v11 = vpop.eup %3526  ;;  %v2219_v20 = vpack.c.bf16 %v2190_v31, %v2190_v31  ;;  %v5514_v31 = vld [vmem:[#allocation64_spill] sm:$0xff] }
 0x7d0   :  { %v3529_v61 = vpop.eup %3528  ;;  %v2194_v23 = vadd.f32 1.0, %v3527_v11  ;;  %v5515_v11 = vld [vmem:[#allocation78_spill] sm:$0xff] }
 0x7d1   :  { %v2200_v17 = vadd.f32 1.0, %v3529_v61  ;;  %2253 = vmatmul.mubr.bf16.vlgmr.msra.gmra.mrb[72].mxu0 %v2219_v20  ;;  %2294 = vmatmul.mubr.bf16.vlgmr.msra.gmra.mrb[88].mxu1 %v2219_v20  ;;  %v3531_v29 = vpop.eup %3530  ;;  %v5516_v20 = vld [vmem:[#allocation77_spill] sm:$0xff]  ;;  %v5517_v61 = vld [vmem:[#allocation79_spill] sm:$0xff] }
 0x7d2   :  { %3534 = vrcp.f32 %v2194_v23  ;;  %2312 = vmatpush1.bf16.msra.mxu0 %v4736_v18  ;;  %2353 = vmatpush1.bf16.msra.mxu1 %v4739_v53  ;;  %v3533_v48 = vpop.eup %3532  ;;  %v2207_v5 = vadd.f32 1.0, %v3531_v29  ;;  %v5518_v23 = vld [vmem:[#allocation81_spill] sm:$0xff]  ;;  %v5520_v29 = vld [vmem:[#allocation82_spill] sm:$0xff] }
 0x7d3   :  { %3536 = vrcp.f32 %v2200_v17  ;;  %2313 = vmatprep.subr.bf16.mxu0 %v4742_v16  ;;  %2354 = vmatprep.subr.bf16.mxu1 %v4745_v35  ;;  %v5519_v17 = vld [vmem:[#allocation80_spill] sm:$0xff] }
 0x7d4   :  { %2343 = vmatprep.mubr.bf16.mxu0 %v5322_v8  ;;  %2384 = vmatprep.mubr.bf16.mxu1 %v5322_v8  ;;  %3538 = vrcp.f32 %v2207_v5 }
 0x7d6   :  { %2314 = vmatpush1.bf16.msra.mxu0 %v4750_v27  ;;  %2355 = vmatpush1.bf16.msra.mxu1 %v4753_v6 }
 0x7d7   :  { %2315 = vmatprep.subr.bf16.mxu0 %v4756_v58  ;;  %2356 = vmatprep.subr.bf16.mxu1 %v4759_v9 }
 0x7da   :  { %2316 = vmatpush1.bf16.msra.mxu0 %v4762_v4  ;;  %2357 = vmatpush1.bf16.msra.mxu1 %v4765_v33 }
 0x7db   :  { %2317 = vmatprep.subr.bf16.mxu0 %v4768_v22  ;;  %2358 = vmatprep.subr.bf16.mxu1 %v4771_v43 }
 0x7dc   :  { %v3535_v44 = vpop.eup %3534 }
 0x7dd   :  { %v3537_v24 = vpop.eup %3536  ;;  %v2211_v63 = vmul.f32 %v3535_v44, %v3533_v48  ;;  %v5521_v48 = vld [vmem:[#allocation83_spill] sm:$0xff]  ;;  %v5522_v44 = vld [vmem:[#allocation85_spill] sm:$0xff] }
 0x7de   :  { %v2210_v42 = vmul.f32 %v3537_v24, %v4899_v50  ;;  %2318 = vmatpush1.bf16.msra.mxu0 %v4775_v57  ;;  %2359 = vmatpush1.bf16.msra.mxu1 %v4778_v7  ;;  %v3539_v50 = vpop.eup %3538  ;;  %v5523_v24 = vld [vmem:[#allocation84_spill] sm:$0xff] }
 0x7df   :  { %2319 = vmatprep.subr.bf16.mxu0 %v4781_v30  ;;  %2360 = vmatprep.subr.bf16.mxu1 %v4784_v37 }
 0x7e0   :  { %v4983_v60 = vadd.f32 %v2211_v63, %v2210_v42  ;;  %v5524_v42 = vld [vmem:[#allocation29_spill] sm:$0xff] }
 0x7e2   :  { %2320 = vmatpush1.bf16.msra.mxu0 %v4789_v28  ;;  %2361 = vmatpush1.bf16.msra.mxu1 %v4792_v15  ;;  %3540 = vtanh.f32 %v4983_v60 }
 0x7e3   :  { %2321 = vmatprep.subr.bf16.mxu0 %v4796_v62  ;;  %2362 = vmatprep.subr.bf16.mxu1 %v5468_v40 }
 0x7e6   :  { %2322 = vmatpush1.bf16.msra.mxu0 %v5469_v39  ;;  %2363 = vmatpush1.bf16.msra.mxu1 %v5470_v21 }
 0x7e7   :  { %2323 = vmatprep.subr.bf16.mxu0 %v5471_v45  ;;  %2364 = vmatprep.subr.bf16.mxu1 %v5472_v41 }
 0x7ea   :  { %2324 = vmatpush1.bf16.msra.mxu0 %v5473_v25  ;;  %2365 = vmatpush1.bf16.msra.mxu1 %v5474_v47 }
 0x7eb   :  { %2325 = vmatprep.subr.bf16.mxu0 %v4820_v12  ;;  %2366 = vmatprep.subr.bf16.mxu1 %v4823_v46 }
 0x7ec   :  { %v3541_v52 = vpop.eup %3540 }
 0x7ed   :  { %v2214_v34 = vmul.f32 %v3541_v52, %v3539_v50 }
 0x7ee   :  { %2326 = vmatpush1.bf16.msra.mxu0 %v4826_v14  ;;  %2367 = vmatpush1.bf16.msra.mxu1 %v4829_v49 }
 0x7ef   :  { %v2310_v38 = vpack.c.bf16 %v2214_v34, %v2214_v34  ;;  %2450 = vmatprep.subr.bf16.mxu0 %v4620_v32  ;;  %2491 = vmatprep.subr.bf16.mxu1 %v4623_v36  ;;  %v5500_v32 = vld [vmem:[#allocation103_spill] sm:$0xff]  ;;  %v5501_v36 = vld [vmem:[#allocation105_spill] sm:$0xff] }
 0x7f1   :  { %2344 = vmatmul.mubr.bf16.vlgmr.msra.gmra.mrb[76].mxu0 %v2310_v38  ;;  %2385 = vmatmul.mubr.bf16.vlgmr.msra.gmra.mrb[92].mxu1 %v2310_v38  ;;  %v5525_v38 = vld [vmem:[#allocation31_spill] sm:$0xff] }
 0x7f2   :  { %2451 = vmatpush1.bf16.msra.mxu0 %v4626_v13  ;;  %2492 = vmatpush1.bf16.msra.mxu1 %v4629_v59  ;;  %v5502_v13 = vld [vmem:[#allocation104_spill] sm:$0xff]  ;;  %v5503_v59 = vld [vmem:[#allocation106_spill] sm:$0xff] }
 0x7f3   :  { %2452 = vmatprep.subr.bf16.mxu0 %v4632_v56  ;;  %2493 = vmatprep.subr.bf16.mxu1 %v4635_v2  ;;  %v5504_v56 = vld [vmem:[#allocation107_spill] sm:$0xff]  ;;  %v5505_v2 = vld [vmem:[#allocation108_spill] sm:$0xff] }
 0x7f4   :  { %2482 = vmatprep.mubr.bf16.mxu0 %v5322_v8  ;;  %2523 = vmatprep.mubr.bf16.mxu1 %v5322_v8 }
 0x7f6   :  { %2453 = vmatpush1.bf16.msra.mxu0 %v4640_v26  ;;  %2494 = vmatpush1.bf16.msra.mxu1 %v4643_v3  ;;  %v5507_v26 = vld [vmem:[#allocation110_spill] sm:$0xff]  ;;  %v5508_v3 = vld [vmem:[#allocation111_spill] sm:$0xff] }
 0x7f7   :  { %2454 = vmatprep.subr.bf16.mxu0 %v4646_v10  ;;  %2495 = vmatprep.subr.bf16.mxu1 %v4649_v19  ;;  %v5509_v10 = vld [vmem:[#allocation26_spill] sm:$0xff]  ;;  %v5510_v19 = vld [vmem:[#allocation28_spill] sm:$0xff] }
 0x7fa   :  { %2455 = vmatpush1.bf16.msra.mxu0 %v5500_v32  ;;  %2496 = vmatpush1.bf16.msra.mxu1 %v5501_v36 }
 0x7fb   :  { %2456 = vmatprep.subr.bf16.mxu0 %v5502_v13  ;;  %2497 = vmatprep.subr.bf16.mxu1 %v5503_v59 }
 0x7fe   :  { %2457 = vmatpush1.bf16.msra.mxu0 %v5504_v56  ;;  %2498 = vmatpush1.bf16.msra.mxu1 %v5505_v2 }
 0x7ff   :  { %2458 = vmatprep.subr.bf16.mxu0 %v5506_v54  ;;  %2499 = vmatprep.subr.bf16.mxu1 %v5507_v26  ;;  %v5526_v26 = vld [vmem:[#allocation60_spill] sm:$0xff] }
 0x802   :  { %2459 = vmatpush1.bf16.msra.mxu0 %v5508_v3  ;;  %2500 = vmatpush1.bf16.msra.mxu1 %v5509_v10 }
 0x803   :  { %2460 = vmatprep.subr.bf16.mxu0 %v5510_v19  ;;  %2501 = vmatprep.subr.bf16.mxu1 %v5511_v0  ;;  %v5527_v19 = vld [vmem:[#allocation59_spill] sm:$0xff] }
 0x806   :  { %2461 = vmatpush1.bf16.msra.mxu0 %v5512_v55  ;;  %2502 = vmatpush1.bf16.msra.mxu1 %v5513_v51 }
 0x807   :  { %2462 = vmatprep.subr.bf16.mxu0 %v5514_v31  ;;  %2503 = vmatprep.subr.bf16.mxu1 %v5515_v11 }
 0x80a   :  { %2463 = vmatpush1.bf16.msra.mxu0 %v5516_v20  ;;  %2504 = vmatpush1.bf16.msra.mxu1 %v5517_v61 }
 0x80b   :  { %2464 = vmatprep.subr.bf16.mxu0 %v5518_v23  ;;  %2505 = vmatprep.subr.bf16.mxu1 %v5519_v17 }
 0x80e   :  { %2465 = vmatpush1.bf16.msra.mxu0 %v5520_v29  ;;  %2506 = vmatpush1.bf16.msra.mxu1 %v5521_v48 }
 0x80f   :  { %2541 = vmatprep.subr.bf16.mxu0 %v5522_v44  ;;  %2582 = vmatprep.subr.bf16.mxu1 %v5523_v24 }
 0x8a4   :  { %v2254_v63 = vpop.f32.mrb[72].mxu0  ;;  %v2295_v5 = vpop.f32.mrb[88].mxu1 }
 0x8a5   :  { %v2302_v50 = vadd.f32 %v2254_v63, %v5524_v42  ;;  %v2256_v52 = vpop.f32.mrb[73].mxu0  ;;  %v2297_v34 = vpop.f32.mrb[89].mxu1  ;;  %v2304_v0 = vadd.f32 %v2295_v5, %v5527_v19  ;;  %v5528_v42 = vld [vmem:[#allocation41_spill] sm:$0xff] }
 0x8a6   :  { %v2303_v32 = vadd.f32 %v2256_v52, %v5525_v38  ;;  %v2258_v36 = vpop.f32.mrb[74].mxu0  ;;  %v2299_v13 = vpop.f32.mrb[90].mxu1  ;;  %v2305_v3 = vadd.f32 %v2297_v34, %v5526_v26  ;;  %v5529_v38 = vld [vmem:[#allocation42_spill] sm:$0xff] }
 0x8a7   :  { %v3121_v59 = vmul.f32 -1.442695, %v2302_v50  ;;  %v2259_v56 = vpop.f32.mrb[75].mxu0  ;;  %v2300_v2 = vpop.f32.mrb[91].mxu1 }
 0x8a8   :  { %v3122_v54 = vmul.f32 -1.442695, %v2303_v32  ;;  %v3123_v10 = vmul.f32 -1.442695, %v2305_v3 }
 0x8a9   :  { %3542 = vpow2.f32 %v3121_v59 }
 0x8aa   :  { %3544 = vpow2.f32 %v3122_v54 }
 0x8ab   :  { %3546 = vpow2.f32 %v3123_v10 }
 0x8ac   :  { %3548 = vtanh.f32 %v2304_v0  ;;  %v5531_v0 = vld [vmem:[#allocation67_spill] sm:$0xff] }
 0x8b3   :  { %v3543_v55 = vpop.eup %3542 }
 0x8b4   :  { %v3545_v51 = vpop.eup %3544  ;;  %v2400_v31 = vadd.f32 1.0, %v3543_v55 }
 0x8b5   :  { %v2406_v11 = vadd.f32 1.0, %v3545_v51  ;;  %v3547_v20 = vpop.eup %3546 }
 0x8b6   :  { %3550 = vrcp.f32 %v2400_v31  ;;  %v3549_v61 = vpop.eup %3548  ;;  %v2413_v48 = vadd.f32 1.0, %v3547_v20 }
 0x8b7   :  { %3552 = vrcp.f32 %v2406_v11 }
 0x8b8   :  { %3554 = vrcp.f32 %v2413_v48 }
 0x8c0   :  { %v3551_v23 = vpop.eup %3550 }
 0x8c1   :  { %v3553_v17 = vpop.eup %3552  ;;  %v2417_v29 = vmul.f32 %v3551_v23, %v3549_v61 }
 0x8c2   :  { %v2416_v44 = vmul.f32 %v3553_v17, %v4957_v1  ;;  %v5530_v1 = vld [vmem:[#allocation68_spill] sm:$0xff]  ;;  %v3555_v3 = vpop.eup %3554 }
 0x8c4   :  { %v5041_v24 = vadd.f32 %v2417_v29, %v2416_v44  ;;  %v2345_v63 = vpop.f32.mrb[76].mxu0  ;;  %v2386_v5 = vpop.f32.mrb[92].mxu1  ;;  %v5533_v44 = vld [vmem:[#allocation35_spill] sm:$0xff] }
 0x8c5   :  { %v2393_v50 = vadd.f32 %v2345_v63, %v5528_v42  ;;  %v2347_v52 = vpop.f32.mrb[77].mxu0  ;;  %v2388_v34 = vpop.f32.mrb[93].mxu1  ;;  %v2395_v55 = vadd.f32 %v2386_v5, %v5531_v0 }
 0x8c6   :  { %v2394_v32 = vadd.f32 %v2347_v52, %v5529_v38  ;;  %v2349_v36 = vpop.f32.mrb[78].mxu0  ;;  %v2390_v13 = vpop.f32.mrb[94].mxu1  ;;  %3556 = vtanh.f32 %v5041_v24  ;;  %v2396_v26 = vadd.f32 %v2388_v34, %v5530_v1 }
 0x8c7   :  { %v3124_v59 = vmul.f32 -1.442695, %v2393_v50  ;;  %v2350_v56 = vpop.f32.mrb[79].mxu0  ;;  %v2391_v2 = vpop.f32.mrb[95].mxu1 }
 0x8c8   :  { %v3125_v54 = vmul.f32 -1.442695, %v2394_v32  ;;  %v3126_v19 = vmul.f32 -1.442695, %v2396_v26  ;;  %v5534_v32 = vld [vmem:[#allocation63_spill] sm:$0xff] }
 0x8c9   :  { %3558 = vpow2.f32 %v3124_v59  ;;  %v5535_v59 = vld [vmem:[#allocation61_spill] sm:$0xff] }
 0x8ca   :  { %3560 = vpow2.f32 %v3125_v54 }
 0x8cb   :  { %3562 = vpow2.f32 %v3126_v19 }
 0x8cc   :  { %3564 = vtanh.f32 %v2395_v55 }
 0x8d0   :  { %v3557_v10 = vpop.eup %3556 }
 0x8d1   :  { %v2420_v51 = vmul.f32 %v3557_v10, %v3555_v3 }
 0x8d3   :  { %v3559_v31 = vpop.eup %3558  ;;  %v2449_v11 = vpack.c.bf16 %v2420_v51, %v2420_v51 }
 0x8d4   :  { %v3561_v20 = vpop.eup %3560  ;;  %v2424_v61 = vadd.f32 1.0, %v3559_v31 }
 0x8d5   :  { %v2430_v23 = vadd.f32 1.0, %v3561_v20  ;;  %2483 = vmatmul.mubr.bf16.vlgmr.msra.gmra.mrb[80].mxu0 %v2449_v11  ;;  %2524 = vmatmul.mubr.bf16.vlgmr.msra.gmra.mrb[96].mxu1 %v2449_v11 }
 0x8d6   :  { %3566 = vrcp.f32 %v2424_v61  ;;  %2542 = vmatpush1.bf16.msra.mxu0 %v4736_v18  ;;  %2583 = vmatpush1.bf16.msra.mxu1 %v4739_v53  ;;  %v3563_v18 = vpop.eup %3562 }
 0x8d7   :  { %3568 = vrcp.f32 %v2430_v23  ;;  %2543 = vmatprep.subr.bf16.mxu0 %v4742_v16  ;;  %2584 = vmatprep.subr.bf16.mxu1 %v4745_v35  ;;  %v3565_v53 = vpop.eup %3564  ;;  %v5536_v23 = vld [vmem:[#allocation38_spill] sm:$0xff] }
 0x8d8   :  { %2573 = vmatprep.mubr.bf16.mxu0 %v5322_v8  ;;  %2614 = vmatprep.mubr.bf16.mxu1 %v5322_v8 }
 0x8da   :  { %2544 = vmatpush1.bf16.msra.mxu0 %v4750_v27  ;;  %2585 = vmatpush1.bf16.msra.mxu1 %v4753_v6  ;;  %v2437_v27 = vadd.f32 1.0, %v3563_v18 }
 0x8db   :  { %2545 = vmatprep.subr.bf16.mxu0 %v4756_v58  ;;  %2586 = vmatprep.subr.bf16.mxu1 %v4759_v9 }
 0x8dc   :  { %3570 = vrcp.f32 %v2437_v27 }
 0x8de   :  { %2546 = vmatpush1.bf16.msra.mxu0 %v4762_v4  ;;  %2587 = vmatpush1.bf16.msra.mxu1 %v4765_v33 }
 0x8df   :  { %2547 = vmatprep.subr.bf16.mxu0 %v4768_v22  ;;  %2588 = vmatprep.subr.bf16.mxu1 %v4771_v43  ;;  %v3326_v43 = vld [vmem:[#allocation12] sm:$0xff]  }
 0x8e0   :  { %v3567_v16 = vpop.eup %3566 }
 0x8e1   :  { %v3569_v8 = vpop.eup %3568  ;;  %v2441_v35 = vmul.f32 %v3567_v16, %v3565_v53 }
 0x8e2   :  { %v2440_v6 = vmul.f32 %v3569_v8, %v4983_v60  ;;  %2548 = vmatpush1.bf16.msra.mxu0 %v4775_v57  ;;  %2589 = vmatpush1.bf16.msra.mxu1 %v4778_v7  ;;  %v3828_v57 = vmov 0.0   ;;  %v3327_v7 = vld [vmem:[#allocation12 + $0x8] sm:$0xff]   ;;  %v5532_v60 = vld [vmem:[#allocation33_spill] sm:$0xff]  ;;  %v5537_v8 = vld [vmem:[#allocation40_spill] sm:$0xff] }
 0x8e3   :  { %2549 = vmatprep.subr.bf16.mxu0 %v4781_v30  ;;  %2590 = vmatprep.subr.bf16.mxu1 %v4784_v37  ;;  %v3328_v30 = vld [vmem:[#allocation12 + $0x10] sm:$0xff]   ;;  %v3329_v37 = vld [vmem:[#allocation12 + $0x18] sm:$0xff]  }
 0x8e4   :  { %v5067_v58 = vadd.f32 %v2441_v35, %v2440_v6 }
 0x8e6   :  { %2550 = vmatpush1.bf16.msra.mxu0 %v4789_v28  ;;  %2591 = vmatpush1.bf16.msra.mxu1 %v4792_v15  ;;  %3572 = vtanh.f32 %v5067_v58  ;;  %v3571_v9 = vpop.eup %3570  ;;  %v3330_v28 = vld [vmem:[#allocation12 + $0x20] sm:$0xff]   ;;  %v3331_v15 = vld [vmem:[#allocation12 + $0x28] sm:$0xff]  }
 0x8e7   :  { %2551 = vmatprep.subr.bf16.mxu0 %v4796_v62  ;;  %2592 = vmatprep.subr.bf16.mxu1 %v5468_v40  ;;  %v3332_v62 = vld [vmem:[#allocation12 + $0x30] sm:$0xff]   ;;  %v3337_v40 = vld [vmem:[#allocation12 + $0x58] sm:$0xff]  }
 0x8ea   :  { %2552 = vmatpush1.bf16.msra.mxu0 %v5469_v39  ;;  %2593 = vmatpush1.bf16.msra.mxu1 %v5470_v21  ;;  %v3338_v39 = vld [vmem:[#allocation12 + $0x60] sm:$0xff]   ;;  %v3339_v21 = vld [vmem:[#allocation12 + $0x68] sm:$0xff]  }
 0x8eb   :  { %2553 = vmatprep.subr.bf16.mxu0 %v5471_v45  ;;  %2594 = vmatprep.subr.bf16.mxu1 %v5472_v41  ;;  %v3340_v45 = vld [vmem:[#allocation12 + $0x70] sm:$0xff]   ;;  %v3341_v41 = vld [vmem:[#allocation12 + $0x78] sm:$0xff]  }
 0x8ee   :  { %2554 = vmatpush1.bf16.msra.mxu0 %v5473_v25  ;;  %2595 = vmatpush1.bf16.msra.mxu1 %v5474_v47 }
 0x8ef   :  { %2555 = vmatprep.subr.bf16.mxu0 %v4820_v12  ;;  %2596 = vmatprep.subr.bf16.mxu1 %v4823_v46  ;;  %v3333_v12 = vld [vmem:[#allocation12 + $0x38] sm:$0xff]   ;;  %v3334_v46 = vld [vmem:[#allocation12 + $0x40] sm:$0xff]  }
 0x8f0   :  { %v3573_v4 = vpop.eup %3572 }
 0x8f1   :  { %v2444_v33 = vmul.f32 %v3573_v4, %v3571_v9 }
 0x8f2   :  { %2556 = vmatpush1.bf16.msra.mxu0 %v4826_v14  ;;  %2597 = vmatpush1.bf16.msra.mxu1 %v4829_v49  ;;  %v3335_v14 = vld [vmem:[#allocation12 + $0x48] sm:$0xff]   ;;  %v3336_v49 = vld [vmem:[#allocation12 + $0x50] sm:$0xff]  }
 0x8f3   :  { %v2540_v22 = vpack.c.bf16 %v2444_v33, %v2444_v33  ;;  %3207 = vmatprep.subr.bf16.mxu1 %v3828_v57  ;;  %3187 = vmatprep.subr.bf16.mxu0 %v3828_v57 }
 0x8f5   :  { %2574 = vmatmul.mubr.bf16.vlgmr.msra.gmra.mrb[84].mxu0 %v2540_v22  ;;  %2615 = vmatmul.mubr.bf16.vlgmr.msra.gmra.mrb[100].mxu1 %v2540_v22 }
 0x8f6   :  { %3208 = vmatpush3.bf16.msra.mxu1 %v3326_v43  ;;  %3223 = vmatprep.mubr.msk.bf16.mxu1 %vm3829_vm1, %v3828_v57 }
 0x8f7   :  { %3209 = vmatprep.subr.bf16.mxu1 %v3828_v57  ;;  %3203 = vmatprep.mubr.msk.bf16.mxu0 %vm3829_vm1, %v3828_v57 }
 0x8f8   :  { %3188 = vmatpush3.bf16.msra.mxu0 %v3334_v46 }
 0x8f9   :  { %3189 = vmatprep.subr.bf16.mxu0 %v3828_v57 }
 0x8fa   :  { %3210 = vmatpush3.bf16.msra.mxu1 %v3327_v7 }
 0x8fb   :  { %3211 = vmatprep.subr.bf16.mxu1 %v3828_v57 }
 0x8fc   :  { %3190 = vmatpush3.bf16.msra.mxu0 %v3335_v14 }
 0x8fd   :  { %3191 = vmatprep.subr.bf16.mxu0 %v3828_v57 }
 0x8fe   :  { %3212 = vmatpush3.bf16.msra.mxu1 %v3328_v30 }
 0x8ff   :  { %3213 = vmatprep.subr.bf16.mxu1 %v3828_v57 }
 0x900   :  { %3192 = vmatpush3.bf16.msra.mxu0 %v3336_v49 }
 0x901   :  { %3193 = vmatprep.subr.bf16.mxu0 %v3828_v57 }
 0x902   :  { %3214 = vmatpush3.bf16.msra.mxu1 %v3329_v37 }
 0x903   :  { %3215 = vmatprep.subr.bf16.mxu1 %v3828_v57 }
 0x904   :  { %3194 = vmatpush3.bf16.msra.mxu0 %v3337_v40 }
 0x905   :  { %3195 = vmatprep.subr.bf16.mxu0 %v3828_v57 }
 0x906   :  { %3216 = vmatpush3.bf16.msra.mxu1 %v3330_v28  ;;  %v5539_v28 = vld [vmem:[#allocation65_spill] sm:$0xff] }
 0x907   :  { %3217 = vmatprep.subr.bf16.mxu1 %v3828_v57 }
 0x908   :  { %3196 = vmatpush3.bf16.msra.mxu0 %v3338_v39 }
 0x909   :  { %3197 = vmatprep.subr.bf16.mxu0 %v3828_v57 }
 0x90a   :  { %3218 = vmatpush3.bf16.msra.mxu1 %v3331_v15 }
 0x90b   :  { %3219 = vmatprep.subr.bf16.mxu1 %v3828_v57 }
 0x90c   :  { %3198 = vmatpush3.bf16.msra.mxu0 %v3339_v21 }
 0x90d   :  { %3199 = vmatprep.subr.bf16.mxu0 %v3828_v57 }
 0x90e   :  { %3220 = vmatpush3.bf16.msra.mxu1 %v3332_v62 }
 0x90f   :  { %3221 = vmatprep.subr.bf16.mxu1 %v3828_v57 }
 0x910   :  { %3200 = vmatpush3.bf16.msra.mxu0 %v3340_v45 }
 0x911   :  { %3201 = vmatprep.subr.bf16.mxu0 %v3828_v57 }
 0x912   :  { %3222 = vmatpush3.bf16.msra.mxu1 %v3333_v12 }
 0x914   :  { %3202 = vmatpush3.bf16.msra.mxu0 %v3341_v41 }
 0x915   :  { %3227 = vmatprep.subr.bf16.mxu0 %v3828_v57 }
 0x9a8   :  { %v2484_v25 = vpop.f32.mrb[80].mxu0  ;;  %v2525_v47 = vpop.f32.mrb[96].mxu1 }
 0x9a9   :  { %v2532_v17 = vadd.f32 %v2484_v25, %v5532_v60  ;;  %v2486_v29 = vpop.f32.mrb[81].mxu0  ;;  %v2527_v48 = vpop.f32.mrb[97].mxu1  ;;  %v2534_v56 = vadd.f32 %v2525_v47, %v5535_v59 }
 0x9aa   :  { %v2533_v63 = vadd.f32 %v2486_v29, %v5533_v44  ;;  %v2488_v5 = vpop.f32.mrb[82].mxu0  ;;  %v2529_v42 = vpop.f32.mrb[98].mxu1  ;;  %v2535_v36 = vadd.f32 %v2527_v48, %v5534_v32  ;;  %v3349_v32 = vld [vmem:[#allocation14 + $0x38] sm:$0xff]  }
 0x9ab   :  { %v3127_v50 = vmul.f32 -1.442695, %v2532_v17  ;;  %v2489_v52 = vpop.f32.mrb[83].mxu0  ;;  %v2530_v34 = vpop.f32.mrb[99].mxu1  ;;  %v3342_v5 = vld [vmem:[#allocation14] sm:$0xff]   ;;  %v3343_v42 = vld [vmem:[#allocation14 + $0x8] sm:$0xff]  }
 0x9ac   :  { %v3128_v38 = vmul.f32 -1.442695, %v2533_v63  ;;  %v3129_v13 = vmul.f32 -1.442695, %v2535_v36  ;;  %v3346_v52 = vld [vmem:[#allocation14 + $0x20] sm:$0xff]   ;;  %v3347_v34 = vld [vmem:[#allocation14 + $0x28] sm:$0xff]  }
 0x9ad   :  { %3574 = vpow2.f32 %v3127_v50  ;;  %v3344_v50 = vld [vmem:[#allocation14 + $0x10] sm:$0xff]  }
 0x9ae   :  { %3576 = vpow2.f32 %v3128_v38  ;;  %v3348_v38 = vld [vmem:[#allocation14 + $0x30] sm:$0xff]  }
 0x9af   :  { %3578 = vpow2.f32 %v3129_v13 }
 0x9b0   :  { %3580 = vtanh.f32 %v2534_v56 }
 0x9b7   :  { %v3575_v2 = vpop.eup %3574 }
 0x9b8   :  { %v3577_v54 = vpop.eup %3576  ;;  %v2630_v1 = vadd.f32 1.0, %v3575_v2 }
 0x9b9   :  { %v2636_v26 = vadd.f32 1.0, %v3577_v54  ;;  %v3579_v3 = vpop.eup %3578  ;;  %v3149_v54 = vld [vmem:[%s5147_s5] ss:$0 sm:$0xff]  ;;  %s3780_s5 = scalar_lea.vmem %s3015_s13, 128 }
 0x9ba   :  { %3582 = vrcp.f32 %v2630_v1  ;;  %v3581_v10 = vpop.eup %3580  ;;  %v2643_v51 = vadd.f32 1.0, %v3579_v3  ;;  %p3781_p12 = scmp.ne.s32.totalorder %s3015_s13, %s3780_s5  ;;  %p3786_p0 = scmp.lt.s32.totalorder %s3780_s5, %s3780_s5 }
 0x9bb   :  { %3584 = vrcp.f32 %v2636_v26 }
 0x9bc   :  { %3586 = vrcp.f32 %v2643_v51  ;;  %p3787_p1 = por %p3786_p0, %p3785_p13 }
 0x9be   :  { %p3788_p2 = pnand %p3787_p1, %p3781_p12 }
 0x9c4   :  { %v3583_v19 = vpop.eup %3582 }
 0x9c5   :  { %v3585_v0 = vpop.eup %3584  ;;  %v2647_v55 = vmul.f32 %v3583_v19, %v3581_v10 }
 0x9c6   :  { %v2646_v31 = vmul.f32 %v3585_v0, %v5041_v24  ;;  %v5538_v24 = vld [vmem:[#allocation66_spill] sm:$0xff]  ;;  %v3587_v7 = vpop.eup %3586 }
 0x9c8   :  { %v2648_v11 = vadd.f32 %v2647_v55, %v2646_v31  ;;  %v2575_v20 = vpop.f32.mrb[84].mxu0  ;;  %v2616_v61 = vpop.f32.mrb[100].mxu1 }
 0x9c9   :  { %v2623_v18 = vadd.f32 %v2575_v20, %v5536_v23  ;;  %v2577_v53 = vpop.f32.mrb[85].mxu0  ;;  %v2618_v16 = vpop.f32.mrb[101].mxu1  ;;  %v2625_v15 = vadd.f32 %v2616_v61, %v5539_v28 }
 0x9ca   :  { %3588 = vtanh.f32 %v2648_v11  ;;  %v2624_v35 = vadd.f32 %v2577_v53, %v5537_v8  ;;  %v2579_v27 = vpop.f32.mrb[86].mxu0  ;;  %v2620_v6 = vpop.f32.mrb[102].mxu1  ;;  %v2626_v43 = vadd.f32 %v2618_v16, %v5538_v24 }
 0x9cb   :  { %v3130_v9 = vmul.f32 -1.442695, %v2623_v18  ;;  %v2580_v4 = vpop.f32.mrb[87].mxu0  ;;  %v2621_v33 = vpop.f32.mrb[103].mxu1 }
 0x9cc   :  { %v3131_v22 = vmul.f32 -1.442695, %v2624_v35  ;;  %v3132_v37 = vmul.f32 -1.442695, %v2626_v43 }
 0x9cd   :  { %3590 = vpow2.f32 %v3130_v9 }
 0x9ce   :  { %3592 = vpow2.f32 %v3131_v22 }
 0x9cf   :  { %3594 = vpow2.f32 %v3132_v37 }
 0x9d0   :  { %3596 = vtanh.f32 %v2625_v15 }
 0x9d4   :  { %v3589_v30 = vpop.eup %3588 }
 0x9d5   :  { %v2650_v62 = vmul.f32 %v3589_v30, %v3587_v7 }
 0x9d7   :  { %v3591_v12 = vpop.eup %3590  ;;  %v2675_v46 = vpack.c.bf16 %v2650_v62, %v2650_v62 }
 0x9d8   :  { %v3593_v14 = vpop.eup %3592  ;;  %v2654_v49 = vadd.f32 1.0, %v3591_v12 }
 0x9d9   :  { %v2660_v40 = vadd.f32 1.0, %v3593_v14  ;;  %3224 = vmatmul.mubr.bf16.vlgmr.msra.gmra.mrb[104].mxu1 %v2675_v46  ;;  %v3595_v39 = vpop.eup %3594 }
 0x9da   :  { %3598 = vrcp.f32 %v2654_v49  ;;  %v3597_v21 = vpop.eup %3596  ;;  %v2667_v47 = vadd.f32 1.0, %v3595_v39 }
 0x9db   :  { %3600 = vrcp.f32 %v2660_v40 }
 0x9dc   :  { %3602 = vrcp.f32 %v2667_v47 }
 0x9e4   :  { %v3599_v45 = vpop.eup %3598 }
 0x9e5   :  { %v3601_v41 = vpop.eup %3600  ;;  %v2671_v25 = vmul.f32 %v3599_v45, %v3597_v21 }
 0x9e6   :  { %v2670_v60 = vmul.f32 %v3601_v41, %v5067_v58  ;;  %v3603_v29 = vpop.eup %3602  ;;  %v3345_v58 = vld [vmem:[#allocation14 + $0x18] sm:$0xff]  }
 0x9e8   :  { %v2672_v17 = vadd.f32 %v2671_v25, %v2670_v60 }
 0x9ea   :  { %3604 = vtanh.f32 %v2672_v17 }
 0x9f4   :  { %v3605_v48 = vpop.eup %3604 }
 0x9f5   :  { %v2674_v44 = vmul.f32 %v3605_v48, %v3603_v29 }
 0x9f7   :  { %v2692_v63 = vpack.c.bf16 %v2674_v44, %v2674_v44 }
 0x9f9   :  { %3204 = vmatmul.mubr.bf16.vlgmr.msra.gmra.mrb[88].mxu0 %v2692_v63 }
 0x9fa   :  { %3243 = vmatprep.mubr.msk.bf16.mxu0 %vm3829_vm1, %v3828_v57  ;;  %3228 = vmatpush3.bf16.msra.mxu0 %v3342_v5 }
 0x9fb   :  { %3229 = vmatprep.subr.bf16.mxu0 %v3828_v57 }
 0x9fe   :  { %3230 = vmatpush3.bf16.msra.mxu0 %v3343_v42 }
 0x9ff   :  { %3231 = vmatprep.subr.bf16.mxu0 %v3828_v57 }
 0xa02   :  { %3232 = vmatpush3.bf16.msra.mxu0 %v3344_v50 }
 0xa03   :  { %3233 = vmatprep.subr.bf16.mxu0 %v3828_v57 }
 0xa06   :  { %3234 = vmatpush3.bf16.msra.mxu0 %v3345_v58 }
 0xa07   :  { %3235 = vmatprep.subr.bf16.mxu0 %v3828_v57 }
 0xa0a   :  { %3236 = vmatpush3.bf16.msra.mxu0 %v3346_v52 }
 0xa0b   :  { %3237 = vmatprep.subr.bf16.mxu0 %v3828_v57 }
 0xa0e   :  { %3238 = vmatpush3.bf16.msra.mxu0 %v3347_v34 }
 0xa0f   :  { %3239 = vmatprep.subr.bf16.mxu0 %v3828_v57 }
 0xa12   :  { %3240 = vmatpush3.bf16.msra.mxu0 %v3348_v38 }
 0xa13   :  { %3241 = vmatprep.subr.bf16.mxu0 %v3828_v57  ;;  %v3150_v57 = vld [vmem:[%s5149_s7] ss:$0 sm:$0xff] }
 0xa16   :  { %3242 = vmatpush3.bf16.msra.mxu0 %v3349_v32 }
 0xaac   :  { %v2880_v36 = vpop.f32.mrb[104].mxu1 }
 0xaad   :  { %v3225_v13 = vpop.f32.mrb[105].mxu1 }
 0xaae   :  { %v2883_v59 = vpop.f32.mrb[106].mxu1 }
 0xaaf   :  { %v3226_v56 = vpop.f32.mrb[107].mxu1 }
 0xacc   :  { %v2792_v2 = vpop.f32.mrb[88].mxu0 }
 0xacd   :  { %v2881_v1 = vadd.f32 %v2880_v36, %v2792_v2  ;;  %v3205_v26 = vpop.f32.mrb[89].mxu0 }
 0xace   :  { %v2795_v3 = vpop.f32.mrb[90].mxu0 }
 0xacf   :  { %v2893_v10 = vadd.f32 %v3149_v54, %v2881_v1  ;;  %v3206_v19 = vpop.f32.mrb[91].mxu0 }
 0xad1   :  { %v2894_v0 = vmax.f32 %v2893_v10, 0.0 }
 0xad3   :  { %v2895_v55 = vpack.c.bf16 %v2894_v0, %v2894_v0 }
 0xad5   :  { %3244 = vmatmul.mubr.bf16.vlgmr.msra.gmra.mrb[92].mxu0 %v2895_v55 }
 0xba8   :  { %v3001_v51 = vpop.f32.mrb[92].mxu0 }
 0xba9   :  { %v3002_v31 = vadd.f32 %v3150_v57, %v3001_v51  ;;  %v3245_v11 = vpop.f32.mrb[93].mxu0 }
 0xbaa   :  { %v3004_v20 = vpop.f32.mrb[94].mxu0 }
 0xbab   :  { %3007 = vst [vmem:[#allocation15] sm:$0xff] %v3002_v31  ;;  %v3246_v61 = vpop.f32.mrb[95].mxu0 }
 0xbac   :  { %3791 = shalt.err (!%p3788_p2)
}
 0xbad   :  { %s3792_s7 = scalar_lea.hbm %s5150_s8, 128 }
 0xbae   :  { %p3793_p3 = scmp.ne.s32.totalorder %s5150_s8, %s3792_s7  ;;  %p3796_p4 = scmp.lt.u32.totalorder %s3792_s7, %s5150_s8 }
 0xbb0   :  { %p3798_p5 = pnand %p3796_p4, %p3793_p3 }
 0xbb2   :  { %3801 = shalt.err (!%p3798_p5)
}
 0xbb3   :  { %3017 = dma.vmem_to_hbm [thread:$0]  %s3015_s13, 128, %s5150_s8, [#allocation8]  }
 0xbb4   :  { %3810 = dma.done.wait [#allocation8], 128  }
 0xbb5   :  { %3811 = vsyncadd [#allocation8], 4294967168 }
 0xbb6   :  { %3021 = vsyncpa [#allocation7], 1 }
 0xbb7   :  { %3022 = vsyncpa [#allocation10], 1 }
 0xbb8   :  { %3023 = vsyncpa [#allocation13], 1 }
 0xbb9   :  { %3024 = vsyncpa [#allocation8], 1 }
 0xbba   :  { %3025 = vsyncmov [#allocation5] }
 0xbbd   :  { %s3026_s2 = vpop.sfrf %3025 }
 0xbbe   :  { %p3159_p6 = scmp.ne.s32.totalorder %s3026_s2, 0 }
 0xbc0   :  { %3030 = shalt.err (%p3159_p6)  }

</bundles_post_ra>
